<compile_context>
chip_gen: v7x
topology: tpu7x:2x2x1
jax: 0.10.0
libtpu: 0.0.40
codegen_flags: <defaults>
</compile_context>

<pallas_src>
import functools

import jax
import jax.numpy as jnp
from jax.experimental import pallas as pl
from jax.experimental.pallas import tpu as pltpu


# ----------------------------------------------------------------------------
# Pallas kernel: tiled matmul (bf16 in, f32 accumulate) with fused bias + ReLU.
# Grid = (M/tm, N/tn, K/tk); K is a sequential reduction ("arbitrary"), and the
# f32 output block itself is the accumulator (its block index is k-invariant,
# so it stays VMEM-resident across the K axis).
# ----------------------------------------------------------------------------
def _matmul_bias_kernel(a_ref, b_ref, bias_ref, o_ref, *, apply_relu, single_k):
    if single_k:
        # Whole contraction in one block: no init/accumulate round trip.
        out = jnp.dot(a_ref[...], b_ref[...],
                      preferred_element_type=jnp.float32) + bias_ref[...]
        if apply_relu:
            out = jnp.maximum(out, 0.0)
        o_ref[...] = out
    else:
        @pl.when(pl.program_id(2) == 0)
        def _init():
            o_ref[...] = jnp.zeros_like(o_ref)

        o_ref[...] += jnp.dot(a_ref[...], b_ref[...],
                              preferred_element_type=jnp.float32)

        @pl.when(pl.program_id(2) == pl.num_programs(2) - 1)
        def _finalize():
            out = o_ref[...] + bias_ref[...]
            if apply_relu:
                out = jnp.maximum(out, 0.0)
            o_ref[...] = out


def _round_up(x, m):
    return ((x + m - 1) // m) * m


def pallas_linear(a, w, bias, *, relu, tm=None, tn=None, tk=None):
    """relu_opt(a @ w + bias) with a tiled Pallas TPU matmul.

    a: (M, K), w: (K, N) (any float dtype; cast to bf16), bias: (N,) f32.
    Returns (M, N) f32.  Tiles are chosen from the shapes:
      * tm: min(round_up(M, 16), 256)   -- small-batch FC layers get tm=16
      * tn: min(round_up(N, 128), 256)  -- lane-aligned, >=2 N blocks for fc1
      * tk: full K when K <= 4096 (single-block contraction), else 2048
    """
    M, K = a.shape
    K2, N = w.shape
    assert K == K2, (K, K2)

    if tm is None:
        tm = min(_round_up(M, 16), 256)
    if tn is None:
        tn = min(_round_up(N, 128), 256)
    if tk is None:
        tk = K if K <= 4096 else 2048

    Mp, Kp, Np = _round_up(M, tm), _round_up(K, tk), _round_up(N, tn)

    a_p = a.astype(jnp.bfloat16)
    if (Mp, Kp) != (M, K):
        a_p = jnp.pad(a_p, ((0, Mp - M), (0, Kp - K)))
    w_p = w.astype(jnp.bfloat16)
    if (Kp, Np) != (K, N):
        w_p = jnp.pad(w_p, ((0, Kp - K), (0, Np - N)))
    b_p = bias.reshape(1, N).astype(jnp.float32)
    if Np != N:
        b_p = jnp.pad(b_p, ((0, 0), (0, Np - N)))

    grid = (Mp // tm, Np // tn, Kp // tk)
    single_k = grid[2] == 1

    out = pl.pallas_call(
        functools.partial(_matmul_bias_kernel, apply_relu=relu,
                          single_k=single_k),
        out_shape=jax.ShapeDtypeStruct((Mp, Np), jnp.float32),
        grid_spec=pltpu.PrefetchScalarGridSpec(
            num_scalar_prefetch=0,
            grid=grid,
            in_specs=[
                pl.BlockSpec((tm, tk), lambda i, j, k: (i, k)),
                pl.BlockSpec((tk, tn), lambda i, j, k: (k, j)),
                pl.BlockSpec((1, tn), lambda i, j, k: (0, j)),
            ],
            out_specs=pl.BlockSpec((tm, tn), lambda i, j, k: (i, j)),
        ),
        compiler_params=pltpu.CompilerParams(
            dimension_semantics=("parallel", "parallel", "arbitrary")),
    )(a_p, w_p, b_p)

    if (Mp, Np) != (M, N):
        out = out[:M, :N]
    return out


# ----------------------------------------------------------------------------
# Conv2d (stride=1, no padding) on NHWC activations via im2col + Pallas GEMM.
# Patch flattening order along K is (kh, kw, cin); conv weights are stored
# pre-transposed to (KH*KW*Cin, Cout) at init, so no transposes per forward.
# TODO(synk): fuse patch extraction into the GEMM via BlockSpec index_map to
#             remove the ~KH*KW x im2col activation blow-up in XLA glue.
# ----------------------------------------------------------------------------
def conv2d_nhwc(x, w2d, b, *, kh, kw, relu):
    B, H, W, C = x.shape
    Ho, Wo = H - kh + 1, W - kw + 1
    cols = jnp.concatenate(
        [x[:, i:i + Ho, j:j + Wo, :] for i in range(kh) for j in range(kw)],
        axis=-1)                                   # (B, Ho, Wo, kh*kw*C)
    patches = cols.reshape(B * Ho * Wo, kh * kw * C)
    y = pallas_linear(patches, w2d, b, relu=relu)  # (B*Ho*Wo, Cout) f32
    return y.reshape(B, Ho, Wo, -1)                # NHWC, no transpose


# ----------------------------------------------------------------------------
# Parameters: generated in PyTorch layouts (uniform 1/sqrt(fan_in)), then
# converted ONCE at init into kernel-friendly (K, N) bf16 GEMM layouts.
# ----------------------------------------------------------------------------
def init_params(key):
    ks = jax.random.split(key, 10)

    def u(k, shape, fan_in):
        bound = 1.0 / jnp.sqrt(float(fan_in))
        return jax.random.uniform(k, shape, jnp.float32, -bound, bound)

    conv1_w = u(ks[0], (64, 3, 3, 3), 3 * 9)        # (Cout, Cin, KH, KW)
    conv1_b = u(ks[1], (64,), 3 * 9)
    conv2_w = u(ks[2], (128, 64, 3, 3), 64 * 9)
    conv2_b = u(ks[3], (128,), 64 * 9)
    fc1_w = u(ks[4], (512, 128 * 28 * 28), 128 * 28 * 28)   # (N, K) torch
    fc1_b = u(ks[5], (512,), 128 * 28 * 28)
    fc2_w = u(ks[6], (256, 512), 512)
    fc2_b = u(ks[7], (256,), 512)
    fc3_w = u(ks[8], (10, 256), 256)
    fc3_b = u(ks[9], (10,), 256)

    def conv_w_to_gemm(w):
        # (Cout, Cin, KH, KW) -> (KH*KW*Cin, Cout): matches NHWC im2col order.
        cout, cin, kh, kw = w.shape
        return w.transpose(2, 3, 1, 0).reshape(kh * kw * cin, cout)

    # fc1: reorder K from NCHW-flatten (C, H, W) -> NHWC-flatten (H, W, C) and
    # transpose to (K, N) so the kernel consumes it with zero per-forward work.
    fc1_w_kxn = (fc1_w.reshape(512, 128, 28, 28)
                 .transpose(2, 3, 1, 0)
                 .reshape(28 * 28 * 128, 512))

    return {
        "conv1_w": conv_w_to_gemm(conv1_w).astype(jnp.bfloat16),
        "conv1_b": conv1_b,
        "conv2_w": conv_w_to_gemm(conv2_w).astype(jnp.bfloat16),
        "conv2_b": conv2_b,
        "fc1_w": fc1_w_kxn.astype(jnp.bfloat16),
        "fc1_b": fc1_b,
        "fc2_w": fc2_w.T.astype(jnp.bfloat16),
        "fc2_b": fc2_b,
        "fc3_w": fc3_w.T.astype(jnp.bfloat16),
        "fc3_b": fc3_b,
    }


# ----------------------------------------------------------------------------
# Forward pass matching CustomCNN1.forward (dropout == identity in eval mode).
# ----------------------------------------------------------------------------
@jax.jit
def custom_cnn1_forward(params, x):
    # Module boundary is NCHW (PyTorch); convert to NHWC once, bf16 compute.
    x = jnp.transpose(x, (0, 2, 3, 1)).astype(jnp.bfloat16)          # (B,32,32,3)
    x = conv2d_nhwc(x, params["conv1_w"], params["conv1_b"],
                    kh=3, kw=3, relu=True)                           # (B,30,30,64) f32
    x = conv2d_nhwc(x.astype(jnp.bfloat16), params["conv2_w"],
                    params["conv2_b"], kh=3, kw=3, relu=True)        # (B,28,28,128) f32
    # dropout1: identity (inference)
    B = x.shape[0]
    # NHWC flatten; equivalence with torch.flatten(NCHW) is baked into fc1_w.
    x = x.reshape(B, -1)                                             # (B, 100352)
    x = pallas_linear(x, params["fc1_w"], params["fc1_b"], relu=True)
    # dropout2: identity (inference)
    x = pallas_linear(x, params["fc2_w"], params["fc2_b"], relu=True)
    x = pallas_linear(x, params["fc3_w"], params["fc3_b"], relu=False)
    return x                                                         # (B, 10) f32 logits


if __name__ == "__main__":
    key = jax.random.PRNGKey(0)
    pkey, xkey = jax.random.split(key)
    params = init_params(pkey)
    # Input consistent with the module: fc1 expects 128*28*28, i.e. 32x32 RGB.
    x = jax.random.normal(xkey, (2, 3, 32, 32), dtype=jnp.float32)

    out = custom_cnn1_forward(params, x)
    jax.block_until_ready(out)
    assert out.shape == (2, 10) and out.dtype == jnp.float32
    print("KERNEL_OK")
</pallas_src>

<mosaic_0001>
module attributes {stable_mosaic.version = 11 : i64} {
  func.func @_matmul_bias_kernel(%arg0: i32, %arg1: i32, %arg2: i32, %arg3: memref<256x27xbf16, #tpu.memory_space<vmem>>, %arg4: memref<27x128xbf16, #tpu.memory_space<vmem>>, %arg5: memref<1x128xf32, #tpu.memory_space<vmem>>, %arg6: memref<256x128xf32, #tpu.memory_space<vmem>>) attributes {dimension_semantics = [#tpu.dimension_semantics<parallel>, #tpu.dimension_semantics<parallel>, #tpu.dimension_semantics<arbitrary>], iteration_bounds = array<i64: 8, 1, 1>, scalar_prefetch = 0 : i64, scratch_operands = 0 : i64, tpu.core_type = #tpu.core_type<tc>, window_params = [{transform_indices = @transform_0, window_bounds = array<i64: 256, 27>}, {transform_indices = @transform_1, window_bounds = array<i64: 27, 128>}, {transform_indices = @transform_2, window_bounds = array<i64: 1, 128>}, {transform_indices = @transform_3, window_bounds = array<i64: 256, 128>}]} {
    %c0 = arith.constant 0 : index
    %c0_0 = arith.constant 0 : index
    %0 = vector.load %arg3[%c0, %c0_0] : memref<256x27xbf16, #tpu.memory_space<vmem>>, vector<256x27xbf16>
    %c0_1 = arith.constant 0 : index
    %c0_2 = arith.constant 0 : index
    %1 = vector.load %arg4[%c0_1, %c0_2] : memref<27x128xbf16, #tpu.memory_space<vmem>>, vector<27x128xbf16>
    %cst = arith.constant dense<0.000000e+00> : vector<256x128xf32>
    %2 = tpu.matmul %0, %1, %cst {dimension_numbers = #tpu.dot_dimension_numbers<[1], [0], [0], [1], [0, 0, 1, 1], [], []>} : vector<256x27xbf16>, vector<27x128xbf16>, vector<256x128xf32> -> vector<256x128xf32>
    %c0_3 = arith.constant 0 : index
    %c0_4 = arith.constant 0 : index
    %3 = vector.load %arg5[%c0_3, %c0_4] : memref<1x128xf32, #tpu.memory_space<vmem>>, vector<1x128xf32>
    %4 = vector.broadcast %3 : vector<1x128xf32> to vector<256x128xf32>
    %5 = arith.addf %2, %4 : vector<256x128xf32>
    %cst_5 = arith.constant 0.000000e+00 : f32
    %6 = vector.broadcast %cst_5 : f32 to vector<256x128xf32>
    %7 = arith.maximumf %5, %6 : vector<256x128xf32>
    %c0_6 = arith.constant 0 : index
    %c0_7 = arith.constant 0 : index
    %8 = vector.load %arg6[%c0_6, %c0_7] : memref<256x128xf32, #tpu.memory_space<vmem>>, vector<256x128xf32>
    tpu.vector_store %arg6[%c0_6, %c0_7], %7 {strides = array<i32>} : memref<256x128xf32, #tpu.memory_space<vmem>>, vector<256x128xf32>,
    return
  }
  func.func @transform_0(%arg0: i32, %arg1: i32, %arg2: i32) -> (i32, i32) {
    %c0_i32 = arith.constant 0 : i32
    return %arg0, %arg2 : i32, i32
  }
  func.func @transform_1(%arg0: i32, %arg1: i32, %arg2: i32) -> (i32, i32) {
    %c0_i32 = arith.constant 0 : i32
    return %arg2, %arg1 : i32, i32
  }
  func.func @transform_2(%arg0: i32, %arg1: i32, %arg2: i32) -> (i32, i32) {
    %c0_i32 = arith.constant 0 : i32
    %c0_i32_0 = arith.constant 0 : i32
    return %c0_i32, %arg1 : i32, i32
  }
  func.func @transform_3(%arg0: i32, %arg1: i32, %arg2: i32) -> (i32, i32) {
    %c0_i32 = arith.constant 0 : i32
    return %arg0, %arg1 : i32, i32
  }
}

module attributes {stable_mosaic.version = 11 : i64} {
  func.func @_matmul_bias_kernel(%arg0: i32, %arg1: i32, %arg2: i32, %arg3: memref<256x576xbf16, #tpu.memory_space<vmem>>, %arg4: memref<576x128xbf16, #tpu.memory_space<vmem>>, %arg5: memref<1x128xf32, #tpu.memory_space<vmem>>, %arg6: memref<256x128xf32, #tpu.memory_space<vmem>>) attributes {dimension_semantics = [#tpu.dimension_semantics<parallel>, #tpu.dimension_semantics<parallel>, #tpu.dimension_semantics<arbitrary>], iteration_bounds = array<i64: 7, 1, 1>, scalar_prefetch = 0 : i64, scratch_operands = 0 : i64, tpu.core_type = #tpu.core_type<tc>, window_params = [{transform_indices = @transform_0, window_bounds = array<i64: 256, 576>}, {transform_indices = @transform_1, window_bounds = array<i64: 576, 128>}, {transform_indices = @transform_2, window_bounds = array<i64: 1, 128>}, {transform_indices = @transform_3, window_bounds = array<i64: 256, 128>}]} {
    %c0 = arith.constant 0 : index
    %c0_0 = arith.constant 0 : index
    %0 = vector.load %arg3[%c0, %c0_0] : memref<256x576xbf16, #tpu.memory_space<vmem>>, vector<256x576xbf16>
    %c0_1 = arith.constant 0 : index
    %c0_2 = arith.constant 0 : index
    %1 = vector.load %arg4[%c0_1, %c0_2] : memref<576x128xbf16, #tpu.memory_space<vmem>>, vector<576x128xbf16>
    %cst = arith.constant dense<0.000000e+00> : vector<256x128xf32>
    %2 = tpu.matmul %0, %1, %cst {dimension_numbers = #tpu.dot_dimension_numbers<[1], [0], [0], [1], [0, 0, 1, 1], [], []>} : vector<256x576xbf16>, vector<576x128xbf16>, vector<256x128xf32> -> vector<256x128xf32>
    %c0_3 = arith.constant 0 : index
    %c0_4 = arith.constant 0 : index
    %3 = vector.load %arg5[%c0_3, %c0_4] : memref<1x128xf32, #tpu.memory_space<vmem>>, vector<1x128xf32>
    %4 = vector.broadcast %3 : vector<1x128xf32> to vector<256x128xf32>
    %5 = arith.addf %2, %4 : vector<256x128xf32>
    %cst_5 = arith.constant 0.000000e+00 : f32
    %6 = vector.broadcast %cst_5 : f32 to vector<256x128xf32>
    %7 = arith.maximumf %5, %6 : vector<256x128xf32>
    %c0_6 = arith.constant 0 : index
    %c0_7 = arith.constant 0 : index
    %8 = vector.load %arg6[%c0_6, %c0_7] : memref<256x128xf32, #tpu.memory_space<vmem>>, vector<256x128xf32>
    tpu.vector_store %arg6[%c0_6, %c0_7], %7 {strides = array<i32>} : memref<256x128xf32, #tpu.memory_space<vmem>>, vector<256x128xf32>,
    return
  }
  func.func @transform_0(%arg0: i32, %arg1: i32, %arg2: i32) -> (i32, i32) {
    %c0_i32 = arith.constant 0 : i32
    return %arg0, %arg2 : i32, i32
  }
  func.func @transform_1(%arg0: i32, %arg1: i32, %arg2: i32) -> (i32, i32) {
    %c0_i32 = arith.constant 0 : i32
    return %arg2, %arg1 : i32, i32
  }
  func.func @transform_2(%arg0: i32, %arg1: i32, %arg2: i32) -> (i32, i32) {
    %c0_i32 = arith.constant 0 : i32
    %c0_i32_0 = arith.constant 0 : i32
    return %c0_i32, %arg1 : i32, i32
  }
  func.func @transform_3(%arg0: i32, %arg1: i32, %arg2: i32) -> (i32, i32) {
    %c0_i32 = arith.constant 0 : i32
    return %arg0, %arg1 : i32, i32
  }
}

module attributes {stable_mosaic.version = 11 : i64} {
  func.func @_matmul_bias_kernel(%arg0: i32, %arg1: i32, %arg2: i32, %arg3: memref<16x2048xbf16, #tpu.memory_space<vmem>>, %arg4: memref<2048x256xbf16, #tpu.memory_space<vmem>>, %arg5: memref<1x256xf32, #tpu.memory_space<vmem>>, %arg6: memref<16x256xf32, #tpu.memory_space<vmem>>) attributes {dimension_semantics = [#tpu.dimension_semantics<parallel>, #tpu.dimension_semantics<parallel>, #tpu.dimension_semantics<arbitrary>], iteration_bounds = array<i64: 1, 2, 49>, scalar_prefetch = 0 : i64, scratch_operands = 0 : i64, tpu.core_type = #tpu.core_type<tc>, window_params = [{transform_indices = @transform_0, window_bounds = array<i64: 16, 2048>}, {transform_indices = @transform_1, window_bounds = array<i64: 2048, 256>}, {transform_indices = @transform_2, window_bounds = array<i64: 1, 256>}, {transform_indices = @transform_3, window_bounds = array<i64: 16, 256>}]} {
    %c0_i32 = arith.constant 0 : i32
    %0 = arith.cmpi eq, %arg2, %c0_i32 : i32
    %1 = arith.extui %0 : i1 to i32
    %c0_i32_0 = arith.constant 0 : i32
    %2 = arith.cmpi ne, %1, %c0_i32_0 : i32
    scf.if %2 {
      %cst_9 = arith.constant 0.000000e+00 : f32
      %12 = vector.broadcast %cst_9 : f32 to vector<16x256xf32>
      %c0_10 = arith.constant 0 : index
      %c0_11 = arith.constant 0 : index
      %13 = vector.load %arg6[%c0_10, %c0_11] : memref<16x256xf32, #tpu.memory_space<vmem>>, vector<16x256xf32>
      tpu.vector_store %arg6[%c0_10, %c0_11], %12 {strides = array<i32>} : memref<16x256xf32, #tpu.memory_space<vmem>>, vector<16x256xf32>,
    } else {
    }
    %c0 = arith.constant 0 : index
    %c0_1 = arith.constant 0 : index
    %3 = vector.load %arg6[%c0, %c0_1] : memref<16x256xf32, #tpu.memory_space<vmem>>, vector<16x256xf32>
    %c0_2 = arith.constant 0 : index
    %c0_3 = arith.constant 0 : index
    %4 = vector.load %arg3[%c0_2, %c0_3] : memref<16x2048xbf16, #tpu.memory_space<vmem>>, vector<16x2048xbf16>
    %c0_4 = arith.constant 0 : index
    %c0_5 = arith.constant 0 : index
    %5 = vector.load %arg4[%c0_4, %c0_5] : memref<2048x256xbf16, #tpu.memory_space<vmem>>, vector<2048x256xbf16>
    %cst = arith.constant dense<0.000000e+00> : vector<16x256xf32>
    %6 = tpu.matmul %4, %5, %cst {dimension_numbers = #tpu.dot_dimension_numbers<[1], [0], [0], [1], [0, 0, 1, 1], [], []>} : vector<16x2048xbf16>, vector<2048x256xbf16>, vector<16x256xf32> -> vector<16x256xf32>
    %7 = arith.addf %3, %6 : vector<16x256xf32>
    %c0_6 = arith.constant 0 : index
    %c0_7 = arith.constant 0 : index
    %8 = vector.load %arg6[%c0_6, %c0_7] : memref<16x256xf32, #tpu.memory_space<vmem>>, vector<16x256xf32>
    tpu.vector_store %arg6[%c0_6, %c0_7], %7 {strides = array<i32>} : memref<16x256xf32, #tpu.memory_space<vmem>>, vector<16x256xf32>,
    %c48_i32 = arith.constant 48 : i32
    %9 = arith.cmpi eq, %arg2, %c48_i32 : i32
    %10 = arith.extui %9 : i1 to i32
    %c0_i32_8 = arith.constant 0 : i32
    %11 = arith.cmpi ne, %10, %c0_i32_8 : i32
    scf.if %11 {
      %c0_9 = arith.constant 0 : index
      %c0_10 = arith.constant 0 : index
      %12 = vector.load %arg6[%c0_9, %c0_10] : memref<16x256xf32, #tpu.memory_space<vmem>>, vector<16x256xf32>
      %c0_11 = arith.constant 0 : index
      %c0_12 = arith.constant 0 : index
      %13 = vector.load %arg5[%c0_11, %c0_12] : memref<1x256xf32, #tpu.memory_space<vmem>>, vector<1x256xf32>
      %14 = vector.broadcast %13 : vector<1x256xf32> to vector<16x256xf32>
      %15 = arith.addf %12, %14 : vector<16x256xf32>
      %cst_13 = arith.constant 0.000000e+00 : f32
      %16 = vector.broadcast %cst_13 : f32 to vector<16x256xf32>
      %17 = arith.maximumf %15, %16 : vector<16x256xf32>
      %c0_14 = arith.constant 0 : index
      %c0_15 = arith.constant 0 : index
      %18 = vector.load %arg6[%c0_14, %c0_15] : memref<16x256xf32, #tpu.memory_space<vmem>>, vector<16x256xf32>
      tpu.vector_store %arg6[%c0_14, %c0_15], %17 {strides = array<i32>} : memref<16x256xf32, #tpu.memory_space<vmem>>, vector<16x256xf32>,
    } else {
    }
    return
  }
  func.func @transform_0(%arg0: i32, %arg1: i32, %arg2: i32) -> (i32, i32) {
    %c0_i32 = arith.constant 0 : i32
    return %arg0, %arg2 : i32, i32
  }
  func.func @transform_1(%arg0: i32, %arg1: i32, %arg2: i32) -> (i32, i32) {
    %c0_i32 = arith.constant 0 : i32
    return %arg2, %arg1 : i32, i32
  }
  func.func @transform_2(%arg0: i32, %arg1: i32, %arg2: i32) -> (i32, i32) {
    %c0_i32 = arith.constant 0 : i32
    %c0_i32_0 = arith.constant 0 : i32
    return %c0_i32, %arg1 : i32, i32
  }
  func.func @transform_3(%arg0: i32, %arg1: i32, %arg2: i32) -> (i32, i32) {
    %c0_i32 = arith.constant 0 : i32
    return %arg0, %arg1 : i32, i32
  }
}

module attributes {stable_mosaic.version = 11 : i64} {
  func.func @_matmul_bias_kernel(%arg0: i32, %arg1: i32, %arg2: i32, %arg3: memref<16x512xbf16, #tpu.memory_space<vmem>>, %arg4: memref<512x256xbf16, #tpu.memory_space<vmem>>, %arg5: memref<1x256xf32, #tpu.memory_space<vmem>>, %arg6: memref<16x256xf32, #tpu.memory_space<vmem>>) attributes {dimension_semantics = [#tpu.dimension_semantics<parallel>, #tpu.dimension_semantics<parallel>, #tpu.dimension_semantics<arbitrary>], iteration_bounds = array<i64: 1, 1, 1>, scalar_prefetch = 0 : i64, scratch_operands = 0 : i64, tpu.core_type = #tpu.core_type<tc>, window_params = [{transform_indices = @transform_0, window_bounds = array<i64: 16, 512>}, {transform_indices = @transform_1, window_bounds = array<i64: 512, 256>}, {transform_indices = @transform_2, window_bounds = array<i64: 1, 256>}, {transform_indices = @transform_3, window_bounds = array<i64: 16, 256>}]} {
    %c0 = arith.constant 0 : index
    %c0_0 = arith.constant 0 : index
    %0 = vector.load %arg3[%c0, %c0_0] : memref<16x512xbf16, #tpu.memory_space<vmem>>, vector<16x512xbf16>
    %c0_1 = arith.constant 0 : index
    %c0_2 = arith.constant 0 : index
    %1 = vector.load %arg4[%c0_1, %c0_2] : memref<512x256xbf16, #tpu.memory_space<vmem>>, vector<512x256xbf16>
    %cst = arith.constant dense<0.000000e+00> : vector<16x256xf32>
    %2 = tpu.matmul %0, %1, %cst {dimension_numbers = #tpu.dot_dimension_numbers<[1], [0], [0], [1], [0, 0, 1, 1], [], []>} : vector<16x512xbf16>, vector<512x256xbf16>, vector<16x256xf32> -> vector<16x256xf32>
    %c0_3 = arith.constant 0 : index
    %c0_4 = arith.constant 0 : index
    %3 = vector.load %arg5[%c0_3, %c0_4] : memref<1x256xf32, #tpu.memory_space<vmem>>, vector<1x256xf32>
    %4 = vector.broadcast %3 : vector<1x256xf32> to vector<16x256xf32>
    %5 = arith.addf %2, %4 : vector<16x256xf32>
    %cst_5 = arith.constant 0.000000e+00 : f32
    %6 = vector.broadcast %cst_5 : f32 to vector<16x256xf32>
    %7 = arith.maximumf %5, %6 : vector<16x256xf32>
    %c0_6 = arith.constant 0 : index
    %c0_7 = arith.constant 0 : index
    %8 = vector.load %arg6[%c0_6, %c0_7] : memref<16x256xf32, #tpu.memory_space<vmem>>, vector<16x256xf32>
    tpu.vector_store %arg6[%c0_6, %c0_7], %7 {strides = array<i32>} : memref<16x256xf32, #tpu.memory_space<vmem>>, vector<16x256xf32>,
    return
  }
  func.func @transform_0(%arg0: i32, %arg1: i32, %arg2: i32) -> (i32, i32) {
    %c0_i32 = arith.constant 0 : i32
    return %arg0, %arg2 : i32, i32
  }
  func.func @transform_1(%arg0: i32, %arg1: i32, %arg2: i32) -> (i32, i32) {
    %c0_i32 = arith.constant 0 : i32
    return %arg2, %arg1 : i32, i32
  }
  func.func @transform_2(%arg0: i32, %arg1: i32, %arg2: i32) -> (i32, i32) {
    %c0_i32 = arith.constant 0 : i32
    %c0_i32_0 = arith.constant 0 : i32
    return %c0_i32, %arg1 : i32, i32
  }
  func.func @transform_3(%arg0: i32, %arg1: i32, %arg2: i32) -> (i32, i32) {
    %c0_i32 = arith.constant 0 : i32
    return %arg0, %arg1 : i32, i32
  }
}

module attributes {stable_mosaic.version = 11 : i64} {
  func.func @_matmul_bias_kernel(%arg0: i32, %arg1: i32, %arg2: i32, %arg3: memref<16x256xbf16, #tpu.memory_space<vmem>>, %arg4: memref<256x128xbf16, #tpu.memory_space<vmem>>, %arg5: memref<1x128xf32, #tpu.memory_space<vmem>>, %arg6: memref<16x128xf32, #tpu.memory_space<vmem>>) attributes {dimension_semantics = [#tpu.dimension_semantics<parallel>, #tpu.dimension_semantics<parallel>, #tpu.dimension_semantics<arbitrary>], iteration_bounds = array<i64: 1, 1, 1>, scalar_prefetch = 0 : i64, scratch_operands = 0 : i64, tpu.core_type = #tpu.core_type<tc>, window_params = [{transform_indices = @transform_0, window_bounds = array<i64: 16, 256>}, {transform_indices = @transform_1, window_bounds = array<i64: 256, 128>}, {transform_indices = @transform_2, window_bounds = array<i64: 1, 128>}, {transform_indices = @transform_3, window_bounds = array<i64: 16, 128>}]} {
    %c0 = arith.constant 0 : index
    %c0_0 = arith.constant 0 : index
    %0 = vector.load %arg3[%c0, %c0_0] : memref<16x256xbf16, #tpu.memory_space<vmem>>, vector<16x256xbf16>
    %c0_1 = arith.constant 0 : index
    %c0_2 = arith.constant 0 : index
    %1 = vector.load %arg4[%c0_1, %c0_2] : memref<256x128xbf16, #tpu.memory_space<vmem>>, vector<256x128xbf16>
    %cst = arith.constant dense<0.000000e+00> : vector<16x128xf32>
    %2 = tpu.matmul %0, %1, %cst {dimension_numbers = #tpu.dot_dimension_numbers<[1], [0], [0], [1], [0, 0, 1, 1], [], []>} : vector<16x256xbf16>, vector<256x128xbf16>, vector<16x128xf32> -> vector<16x128xf32>
    %c0_3 = arith.constant 0 : index
    %c0_4 = arith.constant 0 : index
    %3 = vector.load %arg5[%c0_3, %c0_4] : memref<1x128xf32, #tpu.memory_space<vmem>>, vector<1x128xf32>
    %4 = vector.broadcast %3 : vector<1x128xf32> to vector<16x128xf32>
    %5 = arith.addf %2, %4 : vector<16x128xf32>
    %c0_5 = arith.constant 0 : index
    %c0_6 = arith.constant 0 : index
    %6 = vector.load %arg6[%c0_5, %c0_6] : memref<16x128xf32, #tpu.memory_space<vmem>>, vector<16x128xf32>
    tpu.vector_store %arg6[%c0_5, %c0_6], %5 {strides = array<i32>} : memref<16x128xf32, #tpu.memory_space<vmem>>, vector<16x128xf32>,
    return
  }
  func.func @transform_0(%arg0: i32, %arg1: i32, %arg2: i32) -> (i32, i32) {
    %c0_i32 = arith.constant 0 : i32
    return %arg0, %arg2 : i32, i32
  }
  func.func @transform_1(%arg0: i32, %arg1: i32, %arg2: i32) -> (i32, i32) {
    %c0_i32 = arith.constant 0 : i32
    return %arg2, %arg1 : i32, i32
  }
  func.func @transform_2(%arg0: i32, %arg1: i32, %arg2: i32) -> (i32, i32) {
    %c0_i32 = arith.constant 0 : i32
    %c0_i32_0 = arith.constant 0 : i32
    return %c0_i32, %arg1 : i32, i32
  }
  func.func @transform_3(%arg0: i32, %arg1: i32, %arg2: i32) -> (i32, i32) {
    %c0_i32 = arith.constant 0 : i32
    return %arg0, %arg1 : i32, i32
  }
}

</mosaic_0001>

<bundles_post_ra>
// kernel: custom_cnn1_forward.5
= control target key start
LH: loop header
LB: loop body
LE: loop exit
PB: predicated region body
PF: predicated region fallthrough
CT: control target
= control target key end

     0   :  { %s980_s12 = smov 0   ;;  %s982_s13 = smov 0   ;;  %s1128_s0 = inlined_call_operand.vmem [shape: bf16[2048,27], index: 0, kind: input, shape index: {}]   ;;  %s1129_s1 = inlined_call_operand.vmem [shape: bf16[27,128], index: 1, kind: input, shape index: {}]   ;;  %s1130_s2 = inlined_call_operand.vmem [shape: f32[1,128], index: 2, kind: input, shape index: {}]   ;;  %s1131_s3 = inlined_call_operand.vmem [shape: f32[2048,128], index: 3, kind: output, shape index: {}]  }
   0x1   :  { %s984_s14 = smov 0  }
   0x2 LB: > { %s32_s15 = sadd.s32 1, %s953_s13  ;;  %p792_p0 = scmp.ge.s32.totalorder %s957_s14, 1  ;;  %s957_s14 = sphi %s984_s14, %s13_s14   ;;  %s953_s13 = sphi %s982_s13, %s1133_s13   ;;  %s949_s12 = sphi %s980_s12, %s1132_s12  }
   0x3   : > { %p34_p1 = scmp.ge.s32.totalorder %s32_s15, 8  ;;  %p188_p2 = scmp.lt.s32.totalorder %s957_s14, 9 }
   0x5   : > { %s1135_s15 = smov (%p34_p1, %s32_s15), 0  ;;  %p189_p3 = pnand %p792_p0, %p188_p2 }
   0x6   : > { %v917_v0 = vld [vmem:[%s1129_s1] sm:$0xff] (!%p189_p3)   ;;  %vm443_vm0 = vcmask (!%p189_p3), 1044480   ;;  %v918_v1 = vld [vmem:[%s1129_s1 + $0x8] sm:$0x3f] (!%p189_p3)   ;;  %vm444_vm1 = vcmask (!%p189_p3), 1045504   ;;  %s793_s20 = sshll.u32 (!%p189_p3), %s949_s12, 5 }
   0x7   : > { %192 = sbr.rel (%p189_p3) target bundleno = 264 (0x108), region = 32  ;;  %852 = vmatprep.subr.bf16.mxu0 (!%p189_p3), %v917_v0  ;;  %888 = vmatprep.subr.bf16.mxu1 (!%p189_p3), %v917_v0  ;;  %v959_v2 = vmov (!%p189_p3), 65535   ;;  %p230_p4 = scmp.lt.s32.totalorder (!%p189_p3), %s793_s20, 255  ;;  %vm394_vm2 = vcmask (!%p189_p3), 220160   ;;  %v1047_v22 = vld [vmem:[%s1130_s2] ss:$0 sm:$0xff] (!%p189_p3) }
   0x8   : > { %853 = vmatpush3.bf16.msra.mxu0 (!%p189_p3), %v917_v0  ;;  %890 = vmatpush3.bf16.msra.mxu1 (!%p189_p3), %v917_v0  ;;  %v445_v3 = vsel (!%p189_p3), %vm443_vm0, 4294967295, %v959_v2 }
   0x9   : > { %v446_v4 = vsel (!%p189_p3), %vm444_vm1, %v445_v3, 0 }
   0xa   : > { %v448_v5 = vand.u32 (!%p189_p3), %v918_v1, %v446_v4 }
   0xc   : > { %854 = vmatprep.subr.bf16.mxu0 (!%p189_p3), %v448_v5  ;;  %889 = vmatprep.subr.bf16.mxu1 (!%p189_p3), %v448_v5 }
   0xd   : > { %855 = vmatpush3.bf16.msra.mxu0 (!%p189_p3), %v448_v5  ;;  %891 = vmatpush3.bf16.msra.mxu1 (!%p189_p3), %v448_v5 }
   0xe   : > { %s1137_s20 = smov (!%p230_p4, %s793_s20), 255 }
   0xf   : > { %s794_s21 = sshll.u32 %s1137_s20, 2  ;;  %s796_s27 = sshll.u32 %s1137_s20, 3 }
  0x10   : > { %s1010_s24 = scalar_lea.vmem %s1128_s0, %s794_s21  ;;  %s1054_s30 = scalar_lea.vmem %s1131_s3, %s796_s27 }
  0x11   : > { %v919_v6 = vld [vmem:[%s1010_s24] sm:$0xff]   ;;  %v921_v8 = vld [vmem:[%s1010_s24 + $0x8] sm:$0xff]   ;;  %v923_v10 = vld [vmem:[%s1010_s24 + $0x10] sm:$0xff]  }
  0x12   : > { %v920_v7 = vld [vmem:[%s1010_s24 + $0x40] sm:$0xff]   ;;  %856 = vmatprep.mubr.msk.bf16.mxu0 %vm394_vm2, %v919_v6  ;;  %v922_v9 = vld [vmem:[%s1010_s24 + $0x48] sm:$0xff]   ;;  %v924_v11 = vld [vmem:[%s1010_s24 + $0x50] sm:$0xff]  }
  0x13   : > { %872 = vmatprep.mubr.msk.bf16.mxu1 %vm394_vm2, %v920_v7  ;;  %857 = vmatmul.mubr.msk.bf16.vlgmr.msra.gmra.mrb[0].mxu0 %vm394_vm2, %v921_v8  ;;  %v925_v12 = vld [vmem:[%s1010_s24 + $0x18] sm:$0xff]   ;;  %v927_v14 = vld [vmem:[%s1010_s24 + $0x20] sm:$0xff]   ;;  %v929_v16 = vld [vmem:[%s1010_s24 + $0x28] sm:$0xff]  }
  0x14   : > { %873 = vmatmul.mubr.msk.bf16.vlgmr.msra.gmra.mrb[0].mxu1 %vm394_vm2, %v922_v9  ;;  %860 = vmatprep.mubr.msk.bf16.mxu0 %vm394_vm2, %v923_v10  ;;  %v926_v13 = vld [vmem:[%s1010_s24 + $0x58] sm:$0xff]   ;;  %v928_v15 = vld [vmem:[%s1010_s24 + $0x60] sm:$0xff]   ;;  %v930_v17 = vld [vmem:[%s1010_s24 + $0x68] sm:$0xff]  }
  0x15   : > { %876 = vmatprep.mubr.msk.bf16.mxu1 %vm394_vm2, %v924_v11  ;;  %v931_v18 = vld [vmem:[%s1010_s24 + $0x30] sm:$0xff]   ;;  %v933_v20 = vld [vmem:[%s1010_s24 + $0x38] sm:$0xff]  }
  0x16   : > { %v932_v19 = vld [vmem:[%s1010_s24 + $0x70] sm:$0xff]   ;;  %v934_v21 = vld [vmem:[%s1010_s24 + $0x78] sm:$0xff]  }
  0x1b   : > { %861 = vmatmul.mubr.msk.bf16.gmra.mrb[4].mxu0 %vm394_vm2, %v925_v12 }
  0x1c   : > { %877 = vmatmul.mubr.msk.bf16.gmra.mrb[4].mxu1 %vm394_vm2, %v926_v13  ;;  %864 = vmatprep.mubr.msk.bf16.mxu0 %vm394_vm2, %v927_v14 }
  0x1d   : > { %880 = vmatprep.mubr.msk.bf16.mxu1 %vm394_vm2, %v928_v15 }
  0x23   : > { %865 = vmatmul.mubr.msk.bf16.gmra.mrb[8].mxu0 %vm394_vm2, %v929_v16 }
  0x24   : > { %881 = vmatmul.mubr.msk.bf16.gmra.mrb[8].mxu1 %vm394_vm2, %v930_v17  ;;  %868 = vmatprep.mubr.msk.bf16.mxu0 %vm394_vm2, %v931_v18 }
  0x25   : > { %884 = vmatprep.mubr.msk.bf16.mxu1 %vm394_vm2, %v932_v19 }
  0x2b   : > { %869 = vmatmul.mubr.msk.bf16.gmra.mrb[12].mxu0 %vm394_vm2, %v933_v20 }
  0x2c   : > { %885 = vmatmul.mubr.msk.bf16.gmra.mrb[12].mxu1 %vm394_vm2, %v934_v21 }
  0xe6   : > { %v858_v23 = vpop.f32.mrb[0].mxu0 }
  0xe7   : > { %v493_v24 = vadd.f32 %v858_v23, %v1047_v22  ;;  %v874_v25 = vpop.f32.mrb[0].mxu1  ;;  %v484_v26 = vpop.f32.mrb[1].mxu0 }
  0xe8   : > { %v557_v27 = vadd.f32 %v874_v25, %v1047_v22  ;;  %v485_v28 = vadd.f32 %v1047_v22, %v484_v26  ;;  %v548_v29 = vpop.f32.mrb[1].mxu1  ;;  %v859_v30 = vpop.f32.mrb[2].mxu0 }
  0xe9   : > { %v613_v31 = vmax.f32 %v493_v24, 0.0  ;;  %v549_v32 = vadd.f32 %v1047_v22, %v548_v29  ;;  %v496_v33 = vadd.f32 %v859_v30, %v1047_v22  ;;  %v875_v34 = vpop.f32.mrb[2].mxu1  ;;  %v487_v35 = vpop.f32.mrb[3].mxu0 }
  0xea   : > { %v629_v36 = vmax.f32 %v557_v27, 0.0  ;;  %v611_v37 = vmax.f32 %v485_v28, 0.0  ;;  %v560_v38 = vadd.f32 %v875_v34, %v1047_v22  ;;  %v488_v39 = vadd.f32 %v1047_v22, %v487_v35  ;;  %v551_v40 = vpop.f32.mrb[3].mxu1 }
  0xeb   : > { %645 = vst [vmem:[%s1054_s30 + $0x10] sm:$0xff] %v613_v31  ;;  %v627_v41 = vmax.f32 %v549_v32, 0.0  ;;  %v614_v42 = vmax.f32 %v496_v33, 0.0  ;;  %v552_v43 = vadd.f32 %v1047_v22, %v551_v40 }
  0xec   : > { %661 = vst [vmem:[%s1054_s30 + $0x90] sm:$0xff] %v629_v36  ;;  %643 = vst [vmem:[%s1054_s30] sm:$0xff] %v611_v37  ;;  %v630_v44 = vmax.f32 %v560_v38, 0.0  ;;  %v612_v45 = vmax.f32 %v488_v39, 0.0 }
  0xed   : > { %659 = vst [vmem:[%s1054_s30 + $0x80] sm:$0xff] %v627_v41  ;;  %646 = vst [vmem:[%s1054_s30 + $0x18] sm:$0xff] %v614_v42  ;;  %v628_v46 = vmax.f32 %v552_v43, 0.0 }
  0xee   : > { %662 = vst [vmem:[%s1054_s30 + $0x98] sm:$0xff] %v630_v44  ;;  %644 = vst [vmem:[%s1054_s30 + $0x8] sm:$0xff] %v612_v45  ;;  %v862_v47 = vpop.f32.mrb[4].mxu0 }
  0xef   : > { %660 = vst [vmem:[%s1054_s30 + $0x88] sm:$0xff] %v628_v46  ;;  %v509_v48 = vadd.f32 %v862_v47, %v1047_v22  ;;  %v878_v49 = vpop.f32.mrb[4].mxu1  ;;  %v500_v50 = vpop.f32.mrb[5].mxu0 }
  0xf0   : > { %v573_v51 = vadd.f32 %v878_v49, %v1047_v22  ;;  %v501_v52 = vadd.f32 %v1047_v22, %v500_v50  ;;  %v564_v53 = vpop.f32.mrb[5].mxu1  ;;  %v863_v54 = vpop.f32.mrb[6].mxu0 }
  0xf1   : > { %v617_v55 = vmax.f32 %v509_v48, 0.0  ;;  %v565_v56 = vadd.f32 %v1047_v22, %v564_v53  ;;  %v512_v57 = vadd.f32 %v863_v54, %v1047_v22  ;;  %v879_v58 = vpop.f32.mrb[6].mxu1  ;;  %v503_v59 = vpop.f32.mrb[7].mxu0 }
  0xf2   : > { %v633_v60 = vmax.f32 %v573_v51, 0.0  ;;  %v615_v61 = vmax.f32 %v501_v52, 0.0  ;;  %v576_v62 = vadd.f32 %v879_v58, %v1047_v22  ;;  %v504_v63 = vadd.f32 %v1047_v22, %v503_v59  ;;  %v567_v0 = vpop.f32.mrb[7].mxu1 }
  0xf3   : > { %649 = vst [vmem:[%s1054_s30 + $0x30] sm:$0xff] %v617_v55  ;;  %v631_v1 = vmax.f32 %v565_v56, 0.0  ;;  %v618_v2 = vmax.f32 %v512_v57, 0.0  ;;  %v568_v3 = vadd.f32 %v1047_v22, %v567_v0 }
  0xf4   : > { %665 = vst [vmem:[%s1054_s30 + $0xb0] sm:$0xff] %v633_v60  ;;  %647 = vst [vmem:[%s1054_s30 + $0x20] sm:$0xff] %v615_v61  ;;  %v634_v4 = vmax.f32 %v576_v62, 0.0  ;;  %v616_v5 = vmax.f32 %v504_v63, 0.0 }
  0xf5   : > { %663 = vst [vmem:[%s1054_s30 + $0xa0] sm:$0xff] %v631_v1  ;;  %650 = vst [vmem:[%s1054_s30 + $0x38] sm:$0xff] %v618_v2  ;;  %v632_v6 = vmax.f32 %v568_v3, 0.0 }
  0xf6   : > { %666 = vst [vmem:[%s1054_s30 + $0xb8] sm:$0xff] %v634_v4  ;;  %648 = vst [vmem:[%s1054_s30 + $0x28] sm:$0xff] %v616_v5  ;;  %v866_v7 = vpop.f32.mrb[8].mxu0 }
  0xf7   : > { %664 = vst [vmem:[%s1054_s30 + $0xa8] sm:$0xff] %v632_v6  ;;  %v525_v8 = vadd.f32 %v866_v7, %v1047_v22  ;;  %v882_v9 = vpop.f32.mrb[8].mxu1  ;;  %v516_v10 = vpop.f32.mrb[9].mxu0 }
  0xf8   : > { %v589_v11 = vadd.f32 %v882_v9, %v1047_v22  ;;  %v517_v12 = vadd.f32 %v1047_v22, %v516_v10  ;;  %v580_v13 = vpop.f32.mrb[9].mxu1  ;;  %v867_v14 = vpop.f32.mrb[10].mxu0 }
  0xf9   : > { %v621_v15 = vmax.f32 %v525_v8, 0.0  ;;  %v581_v16 = vadd.f32 %v1047_v22, %v580_v13  ;;  %v528_v17 = vadd.f32 %v867_v14, %v1047_v22  ;;  %v883_v18 = vpop.f32.mrb[10].mxu1  ;;  %v519_v19 = vpop.f32.mrb[11].mxu0 }
  0xfa   : > { %v637_v20 = vmax.f32 %v589_v11, 0.0  ;;  %v619_v21 = vmax.f32 %v517_v12, 0.0  ;;  %v592_v23 = vadd.f32 %v883_v18, %v1047_v22  ;;  %v520_v24 = vadd.f32 %v1047_v22, %v519_v19  ;;  %v583_v25 = vpop.f32.mrb[11].mxu1 }
  0xfb   : > { %653 = vst [vmem:[%s1054_s30 + $0x50] sm:$0xff] %v621_v15  ;;  %v635_v26 = vmax.f32 %v581_v16, 0.0  ;;  %v622_v27 = vmax.f32 %v528_v17, 0.0  ;;  %v584_v28 = vadd.f32 %v1047_v22, %v583_v25 }
  0xfc   : > { %669 = vst [vmem:[%s1054_s30 + $0xd0] sm:$0xff] %v637_v20  ;;  %651 = vst [vmem:[%s1054_s30 + $0x40] sm:$0xff] %v619_v21  ;;  %v638_v29 = vmax.f32 %v592_v23, 0.0  ;;  %v620_v30 = vmax.f32 %v520_v24, 0.0 }
  0xfd   : > { %667 = vst [vmem:[%s1054_s30 + $0xc0] sm:$0xff] %v635_v26  ;;  %654 = vst [vmem:[%s1054_s30 + $0x58] sm:$0xff] %v622_v27  ;;  %v636_v31 = vmax.f32 %v584_v28, 0.0 }
  0xfe   : > { %670 = vst [vmem:[%s1054_s30 + $0xd8] sm:$0xff] %v638_v29  ;;  %652 = vst [vmem:[%s1054_s30 + $0x48] sm:$0xff] %v620_v30  ;;  %v870_v32 = vpop.f32.mrb[12].mxu0 }
  0xff   : > { %668 = vst [vmem:[%s1054_s30 + $0xc8] sm:$0xff] %v636_v31  ;;  %v541_v33 = vadd.f32 %v870_v32, %v1047_v22  ;;  %v886_v34 = vpop.f32.mrb[12].mxu1  ;;  %v532_v35 = vpop.f32.mrb[13].mxu0 }
 0x100   : > { %v605_v36 = vadd.f32 %v886_v34, %v1047_v22  ;;  %v533_v37 = vadd.f32 %v1047_v22, %v532_v35  ;;  %v596_v38 = vpop.f32.mrb[13].mxu1  ;;  %v871_v39 = vpop.f32.mrb[14].mxu0 }
 0x101   : > { %v625_v40 = vmax.f32 %v541_v33, 0.0  ;;  %v597_v41 = vadd.f32 %v1047_v22, %v596_v38  ;;  %v544_v42 = vadd.f32 %v871_v39, %v1047_v22  ;;  %v887_v43 = vpop.f32.mrb[14].mxu1  ;;  %v535_v44 = vpop.f32.mrb[15].mxu0 }
 0x102   : > { %v641_v45 = vmax.f32 %v605_v36, 0.0  ;;  %v623_v46 = vmax.f32 %v533_v37, 0.0  ;;  %v608_v47 = vadd.f32 %v887_v43, %v1047_v22  ;;  %v536_v48 = vadd.f32 %v1047_v22, %v535_v44  ;;  %v599_v49 = vpop.f32.mrb[15].mxu1 }
 0x103   : > { %657 = vst [vmem:[%s1054_s30 + $0x70] sm:$0xff] %v625_v40  ;;  %v639_v50 = vmax.f32 %v597_v41, 0.0  ;;  %v626_v51 = vmax.f32 %v544_v42, 0.0  ;;  %v600_v52 = vadd.f32 %v1047_v22, %v599_v49 }
 0x104   : > { %673 = vst [vmem:[%s1054_s30 + $0xf0] sm:$0xff] %v641_v45  ;;  %655 = vst [vmem:[%s1054_s30 + $0x60] sm:$0xff] %v623_v46  ;;  %v642_v53 = vmax.f32 %v608_v47, 0.0  ;;  %v624_v54 = vmax.f32 %v536_v48, 0.0 }
 0x105   : > { %671 = vst [vmem:[%s1054_s30 + $0xe0] sm:$0xff] %v639_v50  ;;  %658 = vst [vmem:[%s1054_s30 + $0x78] sm:$0xff] %v626_v51  ;;  %v640_v55 = vmax.f32 %v600_v52, 0.0 }
 0x106   : > { %674 = vst [vmem:[%s1054_s30 + $0xf8] sm:$0xff] %v642_v53  ;;  %656 = vst [vmem:[%s1054_s30 + $0x68] sm:$0xff] %v624_v54 }
 0x107   : > { %672 = vst [vmem:[%s1054_s30 + $0xe8] sm:$0xff] %v640_v55 }
 0x108 PF: > { %s13_s14 = sadd.s32 1, %s957_s14   ;;  %s1132_s12 = smov %s953_s13 }
 0x109   : > { %p10_p5 = scmp.ge.s32.totalorder %s13_s14, 10   ;;  %s1133_s13 = smov %s1135_s15 }
 0x10b   :  { %12 = sbr.rel (!%p10_p5) target bundleno = 2 (0x2), region = 68 }

// kernel: custom_cnn1_forward.6
= control target key start
LH: loop header
LB: loop body
LE: loop exit
PB: predicated region body
PF: predicated region fallthrough
CT: control target
= control target key end

     0   :  { %s2432_s12 = smov 0   ;;  %s2434_s13 = smov 0   ;;  %s2857_s0 = inlined_call_operand.vmem [shape: bf16[1792,576], index: 0, kind: input, shape index: {}]   ;;  %s2858_s1 = inlined_call_operand.vmem [shape: bf16[576,128], index: 1, kind: input, shape index: {}]   ;;  %s2859_s2 = inlined_call_operand.vmem [shape: f32[1,128], index: 2, kind: input, shape index: {}]   ;;  %s2860_s3 = inlined_call_operand.vmem [shape: f32[1792,128], index: 3, kind: output, shape index: {}]  }
   0x1   :  { %s2436_s14 = smov 0  }
   0x2 LB: > { %s32_s15 = sadd.s32 1, %s2406_s13  ;;  %p1775_p0 = scmp.ge.s32.totalorder %s2410_s14, 1  ;;  %s2410_s14 = sphi %s2436_s14, %s13_s14   ;;  %s2406_s13 = sphi %s2434_s13, %s2862_s13   ;;  %s2402_s12 = sphi %s2432_s12, %s2861_s12  }
   0x3   : > { %p34_p1 = scmp.ge.s32.totalorder %s32_s15, 7  ;;  %p191_p2 = scmp.lt.s32.totalorder %s2410_s14, 8 }
   0x5   : > { %s2864_s15 = smov (%p34_p1, %s32_s15), 0  ;;  %p192_p3 = pnand %p1775_p0, %p191_p2 }
   0x6   : > { %v2240_v0 = vld [vmem:[%s2858_s1 + $0x40] sm:$0xff] (!%p192_p3)   ;;  %s1776_s18 = sshll.u32 (!%p192_p3), %s2402_s12, 5  ;;  %v2242_v2 = vld [vmem:[%s2858_s1 + $0x48] sm:$0xff] (!%p192_p3)   ;;  %v2244_v4 = vld [vmem:[%s2858_s1 + $0x50] sm:$0xff] (!%p192_p3)   ;;  %vm1059_vm0 = vcmask (!%p192_p3), 523264  }
   0x7   : > { %195 = sbr.rel (%p192_p3) target bundleno = 415 (0x19f), region = 32  ;;  %v2241_v1 = vld [vmem:[%s2858_s1] sm:$0xff] (!%p192_p3)   ;;  %1915 = vmatprep.subr.bf16.mxu0 (!%p192_p3), %v2240_v0  ;;  %2199 = vmatprep.subr.bf16.mxu1 (!%p192_p3), %v2240_v0  ;;  %p236_p4 = scmp.lt.s32.totalorder (!%p192_p3), %s1776_s18, 223  ;;  %v2243_v3 = vld [vmem:[%s2858_s1 + $0x8] sm:$0xff] (!%p192_p3)   ;;  %v2245_v5 = vld [vmem:[%s2858_s1 + $0x10] sm:$0xff] (!%p192_p3)  }
   0x8   : > { %1916 = vmatpush3.bf16.msra.mxu0 (!%p192_p3), %v2241_v1  ;;  %2207 = vmatpush3.bf16.msra.mxu1 (!%p192_p3), %v2241_v1  ;;  %v2246_v6 = vld [vmem:[%s2858_s1 + $0x58] sm:$0xff] (!%p192_p3)   ;;  %v2248_v8 = vld [vmem:[%s2858_s1 + $0x60] sm:$0xff] (!%p192_p3)   ;;  %v2250_v10 = vld [vmem:[%s2858_s1 + $0x68] sm:$0xff] (!%p192_p3)  }
   0x9   : > { %1917 = vmatprep.subr.bf16.mxu0 (!%p192_p3), %v2242_v2  ;;  %2200 = vmatprep.subr.bf16.mxu1 (!%p192_p3), %v2242_v2  ;;  %v2247_v7 = vld [vmem:[%s2858_s1 + $0x18] sm:$0xff] (!%p192_p3)   ;;  %v2249_v9 = vld [vmem:[%s2858_s1 + $0x20] sm:$0xff] (!%p192_p3)   ;;  %v2251_v13 = vld [vmem:[%s2858_s1 + $0x28] sm:$0xff] (!%p192_p3)  }
   0xa   : > { %v2252_v14 = vld [vmem:[%s2858_s1 + $0x70] sm:$0xff] (!%p192_p3)   ;;  %v2254_v16 = vld [vmem:[%s2858_s1 + $0x78] sm:$0xff] (!%p192_p3)   ;;  %v2262_v18 = vld [vmem:[%s2858_s1 + $0xc0] sm:$0xff] (!%p192_p3)  }
   0xb   : > { %v2253_v15 = vld [vmem:[%s2858_s1 + $0x30] sm:$0xff] (!%p192_p3)   ;;  %v2255_v17 = vld [vmem:[%s2858_s1 + $0x38] sm:$0xff] (!%p192_p3)   ;;  %v2265_v19 = vld [vmem:[%s2858_s1 + $0x100] sm:$0xff] (!%p192_p3)  }
   0xc   : > { %1918 = vmatpush3.bf16.msra.mxu0 (!%p192_p3), %v2243_v3  ;;  %2208 = vmatpush3.bf16.msra.mxu1 (!%p192_p3), %v2243_v3  ;;  %v2263_v22 = vld [vmem:[%s2858_s1 + $0x80] sm:$0xff] (!%p192_p3)   ;;  %v2264_v23 = vld [vmem:[%s2858_s1 + $0xc8] sm:$0xff] (!%p192_p3)   ;;  %v2273_v28 = vld [vmem:[%s2858_s1 + $0xd0] sm:$0xff] (!%p192_p3)  }
   0xd   : > { %1919 = vmatprep.subr.bf16.mxu0 (!%p192_p3), %v2244_v4  ;;  %2201 = vmatprep.subr.bf16.mxu1 (!%p192_p3), %v2244_v4  ;;  %v2266_v26 = vld [vmem:[%s2858_s1 + $0x88] sm:$0xff] (!%p192_p3)   ;;  %v2274_v30 = vld [vmem:[%s2858_s1 + $0x90] sm:$0xff] (!%p192_p3)   ;;  %v2275_v31 = vld [vmem:[%s2858_s1 + $0xd8] sm:$0xff] (!%p192_p3)  }
   0xe   : > { %s2866_s18 = smov (!%p236_p4, %s1776_s18), 223  ;;  %v2276_v34 = vld [vmem:[%s2858_s1 + $0x98] sm:$0xff]   ;;  %v2296_v35 = vld [vmem:[%s2858_s1 + $0x108] sm:$0xff]   ;;  %v2283_v37 = vld [vmem:[%s2858_s1 + $0xe0] sm:$0xff]  }
   0xf   : > { %s2215_s4 = smul.u32 20, %s2866_s18  ;;  %v2284_v39 = vld [vmem:[%s2858_s1 + $0xa0] sm:$0xff]   ;;  %v2285_v40 = vld [vmem:[%s2858_s1 + $0xe8] sm:$0xff]   ;;  %v2293_v46 = vld [vmem:[%s2858_s1 + $0xf0] sm:$0xff]   ;;  %s1779_s27 = sshll.u32 %s2866_s18, 3 }
  0x10   : > { %1920 = vmatpush3.bf16.msra.mxu0 %v2245_v5  ;;  %2209 = vmatpush3.bf16.msra.mxu1 %v2245_v5  ;;  %v2286_v43 = vld [vmem:[%s2858_s1 + $0xa8] sm:$0xff]   ;;  %v2316_v47 = vld [vmem:[%s2858_s1 + $0x110] sm:$0xff]   ;;  %v2295_v49 = vld [vmem:[%s2858_s1 + $0xf8] sm:$0xff]   ;;  %s2754_s30 = scalar_lea.vmem %s2860_s3, %s1779_s27 }
  0x11   : > { %1921 = vmatprep.subr.bf16.mxu0 %v2246_v6  ;;  %2202 = vmatprep.subr.bf16.mxu1 %v2246_v6  ;;  %s2483_s11 = scalar_lea.vmem %s2857_s0, %s2215_s4  ;;  %v2294_v48 = vld [vmem:[%s2858_s1 + $0xb0] sm:$0xff]   ;;  %v2297_v52 = vld [vmem:[%s2858_s1 + $0xb8] sm:$0xff]  }
  0x12   : > { %v2258_v11 = vld [vmem:[%s2483_s11 + $0x4] ss:$20 sps:$4 sm:$0xff]   ;;  %v2256_v20 = vld [vmem:[%s2483_s11] ss:$20 sps:$4 sm:$0xff]   ;;  %v2271_v27 = vld [vmem:[%s2483_s11 + $0x28] ss:$20 sps:$4 sm:$0xff]  }
  0x13   : > { %v2261_v12 = vld [vmem:[%s2483_s11 + $0x1e4] ss:$20 sps:$4 sm:$0xff]   ;;  %1140 = vmatprep.mubr.bf16.mxu0 %v2258_v11  ;;  %v2259_v21 = vld [vmem:[%s2483_s11 + $0x1e0] ss:$20 sps:$4 sm:$0xff]   ;;  %v2272_v29 = vld [vmem:[%s2483_s11 + $0x208] ss:$20 sps:$4 sm:$0xff]  }
  0x14   : > { %1922 = vmatpush3.bf16.msra.mxu0 %v2247_v7  ;;  %2210 = vmatpush3.bf16.msra.mxu1 %v2247_v7  ;;  %v2267_v24 = vld [vmem:[%s2483_s11 + $0x2c] ss:$20 sps:$4 sm:$0xff]   ;;  %v2277_v32 = vld [vmem:[%s2483_s11 + $0x54] ss:$20 sps:$4 sm:$0xff]   ;;  %v2281_v36 = vld [vmem:[%s2483_s11 + $0x50] ss:$20 sps:$4 sm:$0xff]  }
  0x15   : > { %1923 = vmatprep.subr.bf16.mxu0 %v2248_v8  ;;  %2203 = vmatprep.subr.bf16.mxu1 %v2248_v8  ;;  %v2269_v25 = vld [vmem:[%s2483_s11 + $0x20c] ss:$20 sps:$4 sm:$0xff]   ;;  %v2279_v33 = vld [vmem:[%s2483_s11 + $0x234] ss:$20 sps:$4 sm:$0xff]   ;;  %v2282_v38 = vld [vmem:[%s2483_s11 + $0x230] ss:$20 sps:$4 sm:$0xff]  }
  0x16   : > { %1236 = vmatprep.mubr.bf16.mxu1 %v2261_v12  ;;  %v2287_v41 = vld [vmem:[%s2483_s11 + $0x7c] ss:$20 sps:$4 sm:$0xff]   ;;  %v2291_v44 = vld [vmem:[%s2483_s11 + $0x78] ss:$20 sps:$4 sm:$0xff]   ;;  %v2303_v54 = vld [vmem:[%s2483_s11 + $0xa0] ss:$20 sps:$4 sm:$0xff]  }
  0x17   : > { %v2289_v42 = vld [vmem:[%s2483_s11 + $0x25c] ss:$20 sps:$4 sm:$0xff]   ;;  %v2292_v45 = vld [vmem:[%s2483_s11 + $0x258] ss:$20 sps:$4 sm:$0xff]   ;;  %v2306_v57 = vld [vmem:[%s2483_s11 + $0x34] ss:$20 sps:$4 sm:$0xff]  }
  0x18   : > { %1924 = vmatpush3.bf16.msra.mxu0 %v2249_v9  ;;  %2211 = vmatpush3.bf16.msra.mxu1 %v2249_v9  ;;  %v2298_v50 = vld [vmem:[%s2483_s11 + $0xa4] ss:$20 sps:$4 sm:$0xff]   ;;  %v2302_v51 = vld [vmem:[%s2483_s11 + $0xc] ss:$20 sps:$4 sm:$0xff]   ;;  %v2300_v53 = vld [vmem:[%s2483_s11 + $0x8] ss:$20 sps:$4 sm:$0xff]  }
  0x19   : > { %1925 = vmatprep.subr.bf16.mxu0 %v2250_v10  ;;  %2204 = vmatprep.subr.bf16.mxu1 %v2250_v10  ;;  %v2304_v55 = vld [vmem:[%s2483_s11 + $0xcc] ss:$20 sps:$4 sm:$0xff]   ;;  %v2335_v56 = vld [vmem:[%s2858_s1 + $0x118] sm:$0xff]   ;;  %v2309_v59 = vld [vmem:[%s2483_s11 + $0x30] ss:$20 sps:$4 sm:$0xff]  }
  0x1a   : > { %v2308_v58 = vld [vmem:[%s2483_s11 + $0xc8] ss:$20 sps:$4 sm:$0xff]   ;;  %v2314_v62 = vld [vmem:[%s2483_s11 + $0xf0] ss:$20 sps:$4 sm:$0xff]   ;;  %v2315_v63 = vld [vmem:[%s2483_s11 + $0x58] ss:$20 sps:$4 sm:$0xff]  }
  0x1b   : > { %v2310_v60 = vld [vmem:[%s2483_s11 + $0xf4] ss:$20 sps:$4 sm:$0xff]   ;;  %v2312_v61 = vld [vmem:[%s2483_s11 + $0x5c] ss:$20 sps:$4 sm:$0xff]   ;;  %v2319_v1 = vld [vmem:[%s2483_s11 + $0x84] ss:$20 sps:$4 sm:$0xff]  }
  0x1c   : > { %1926 = vmatpush3.bf16.msra.mxu0 %v2251_v13  ;;  %2212 = vmatpush3.bf16.msra.mxu1 %v2251_v13  ;;  %v2317_v0 = vld [vmem:[%s2483_s11 + $0x11c] ss:$20 sps:$4 sm:$0xff]   ;;  %v2321_v2 = vld [vmem:[%s2483_s11 + $0x118] ss:$20 sps:$4 sm:$0xff]   ;;  %v2322_v3 = vld [vmem:[%s2483_s11 + $0x80] ss:$20 sps:$4 sm:$0xff]  }
  0x1d   : > { %1927 = vmatprep.subr.bf16.mxu0 %v2252_v14  ;;  %2205 = vmatprep.subr.bf16.mxu1 %v2252_v14  ;;  %v2323_v4 = vld [vmem:[%s2483_s11 + $0x144] ss:$20 sps:$4 sm:$0xff]   ;;  %v2325_v5 = vld [vmem:[%s2483_s11 + $0xac] ss:$20 sps:$4 sm:$0xff]   ;;  %v2328_v7 = vld [vmem:[%s2483_s11 + $0xa8] ss:$20 sps:$4 sm:$0xff]  }
  0x1e   : > { %v2327_v6 = vld [vmem:[%s2483_s11 + $0x140] ss:$20 sps:$4 sm:$0xff]   ;;  %v2333_v10 = vld [vmem:[%s2483_s11 + $0x168] ss:$20 sps:$4 sm:$0xff]   ;;  %v2334_v11 = vld [vmem:[%s2483_s11 + $0xd0] ss:$20 sps:$4 sm:$0xff]  }
  0x1f   : > { %v2329_v8 = vld [vmem:[%s2483_s11 + $0x16c] ss:$20 sps:$4 sm:$0xff]   ;;  %v2331_v9 = vld [vmem:[%s2483_s11 + $0xd4] ss:$20 sps:$4 sm:$0xff]   ;;  %v2338_v13 = vld [vmem:[%s2483_s11 + $0xfc] ss:$20 sps:$4 sm:$0xff]  }
  0x20   : > { %1928 = vmatpush3.bf16.msra.mxu0 %v2253_v15  ;;  %2213 = vmatpush3.bf16.msra.mxu1 %v2253_v15  ;;  %v2336_v12 = vld [vmem:[%s2483_s11 + $0x194] ss:$20 sps:$4 sm:$0xff]   ;;  %v2340_v14 = vld [vmem:[%s2483_s11 + $0x190] ss:$20 sps:$4 sm:$0xff]   ;;  %v2341_v15 = vld [vmem:[%s2483_s11 + $0xf8] ss:$20 sps:$4 sm:$0xff]  }
  0x21   : > { %1929 = vmatprep.subr.bf16.mxu0 %v2254_v16  ;;  %2206 = vmatprep.subr.bf16.mxu1 %v2254_v16  ;;  %v2342_v16 = vld [vmem:[%s2483_s11 + $0x1bc] ss:$20 sps:$4 sm:$0xff]  }
  0x24   : > { %1930 = vmatpush3.bf16.msra.mxu0 %v2255_v17  ;;  %2214 = vmatpush3.bf16.msra.mxu1 %v2255_v17  ;;  %v2344_v17 = vld [vmem:[%s2483_s11 + $0x124] ss:$20 sps:$4 sm:$0xff]  }
  0x25   : > { %2027 = vmatprep.subr.bf16.mxu1 %v2262_v18  ;;  %2159 = vmatprep.subr.bf16.mxu0 %v2265_v19  ;;  %v2346_v18 = vld [vmem:[%s2483_s11 + $0x1b8] ss:$20 sps:$4 sm:$0xff]  }
  0x27   : > { %1141 = vmatmul.mubr.bf16.vlgmr.msra.gmra.mrb[0].mxu0 %v2256_v20  ;;  %1237 = vmatmul.mubr.bf16.vlgmr.msra.gmra.mrb[0].mxu1 %v2259_v21  ;;  %v2348_v20 = vld [vmem:[%s2483_s11 + $0x14c] ss:$20 sps:$4 sm:$0xff]   ;;  %v2350_v21 = vld [vmem:[%s2483_s11 + $0x10] ss:$20 sps:$4 sm:$0xff]  }
  0x28   : > { %2028 = vmatpush3.bf16.msra.mxu1 %v2263_v22  ;;  %2160 = vmatpush3.bf16.msra.mxu0 %v2265_v19  ;;  %v2347_v19 = vld [vmem:[%s2483_s11 + $0x120] ss:$20 sps:$4 sm:$0xff]   ;;  %v2351_v22 = vld [vmem:[%s2483_s11 + $0x148] ss:$20 sps:$4 sm:$0xff]  }
  0x29   : > { %2029 = vmatprep.subr.bf16.mxu1 %v2264_v23  ;;  %1148 = vmatprep.mubr.bf16.mxu0 %v2267_v24  ;;  %v2352_v23 = vld [vmem:[%s2483_s11 + $0x38] ss:$20 sps:$4 sm:$0xff]   ;;  %v2353_v24 = vld [vmem:[%s2483_s11 + $0x174] ss:$20 sps:$4 sm:$0xff]  }
  0x2a   : > { %1244 = vmatprep.mubr.bf16.mxu1 %v2269_v25  ;;  %2161 = vmatprep.subr.bf16.mxu0 %v2296_v35  ;;  %v2355_v25 = vld [vmem:[%s2483_s11 + $0x60] ss:$20 sps:$4 sm:$0xff]  }
  0x2c   : > { %2030 = vmatpush3.bf16.msra.mxu1 %v2266_v26  ;;  %2162 = vmatpush3.bf16.msra.mxu0 %v2296_v35  ;;  %v2356_v26 = vld [vmem:[%s2483_s11 + $0x170] ss:$20 sps:$4 sm:$0xff]   ;;  %v2367_v35 = vld [vmem:[%s2483_s11 + $0x128] ss:$20 sps:$4 sm:$0xff]  }
  0x2d   : > { %2031 = vmatprep.subr.bf16.mxu1 %v2273_v28  ;;  %2163 = vmatprep.subr.bf16.mxu0 %v2316_v47  ;;  %v2358_v28 = vld [vmem:[%s2483_s11 + $0x19c] ss:$20 sps:$4 sm:$0xff]  }
  0x2f   : > { %1149 = vmatmul.mubr.bf16.gmra.mrb[4].mxu0 %v2271_v27  ;;  %1245 = vmatmul.mubr.bf16.gmra.mrb[4].mxu1 %v2272_v29  ;;  %v2357_v27 = vld [vmem:[%s2483_s11 + $0x88] ss:$20 sps:$4 sm:$0xff]   ;;  %v2360_v29 = vld [vmem:[%s2483_s11 + $0xb0] ss:$20 sps:$4 sm:$0xff]  }
  0x30   : > { %2032 = vmatpush3.bf16.msra.mxu1 %v2274_v30  ;;  %1156 = vmatprep.mubr.bf16.mxu0 %v2277_v32  ;;  %v2361_v30 = vld [vmem:[%s2483_s11 + $0x198] ss:$20 sps:$4 sm:$0xff]  }
  0x31   : > { %2033 = vmatprep.subr.bf16.mxu1 %v2275_v31  ;;  %1252 = vmatprep.mubr.bf16.mxu1 %v2279_v33  ;;  %v2362_v31 = vld [vmem:[%s2483_s11 + $0xd8] ss:$20 sps:$4 sm:$0xff]   ;;  %v2365_v33 = vld [vmem:[%s2483_s11 + $0x100] ss:$20 sps:$4 sm:$0xff]  }
  0x32   : > { %2164 = vmatpush3.bf16.msra.mxu0 %v2316_v47  ;;  %v2363_v32 = vld [vmem:[%s2483_s11 + $0x1c4] ss:$20 sps:$4 sm:$0xff]  }
  0x33   : > { %2165 = vmatprep.subr.bf16.mxu0 %v2335_v56  ;;  %v2382_v47 = vld [vmem:[%s2483_s11 + $0x218] ss:$20 sps:$4 sm:$0xff]  }
  0x34   : > { %2034 = vmatpush3.bf16.msra.mxu1 %v2276_v34  ;;  %v2366_v34 = vld [vmem:[%s2483_s11 + $0x1c0] ss:$20 sps:$4 sm:$0xff]  }
  0x35   : > { %2035 = vmatprep.subr.bf16.mxu1 %v2283_v37  ;;  %v2370_v37 = vld [vmem:[%s2483_s11 + $0x150] ss:$20 sps:$4 sm:$0xff]  }
  0x36   : > { %2166 = vmatpush3.bf16.msra.mxu0 %v2335_v56 }
  0x37   : > { %1157 = vmatmul.mubr.bf16.gmra.mrb[8].mxu0 %v2281_v36  ;;  %1253 = vmatmul.mubr.bf16.gmra.mrb[8].mxu1 %v2282_v38  ;;  %v2368_v36 = vld [vmem:[%s2483_s11 + $0x1ec] ss:$20 sps:$4 sm:$0xff]   ;;  %v2371_v38 = vld [vmem:[%s2483_s11 + $0x1e8] ss:$20 sps:$4 sm:$0xff]  }
  0x38   : > { %2036 = vmatpush3.bf16.msra.mxu1 %v2284_v39  ;;  %1164 = vmatprep.mubr.bf16.mxu0 %v2287_v41  ;;  %v2372_v39 = vld [vmem:[%s2483_s11 + $0x178] ss:$20 sps:$4 sm:$0xff]   ;;  %v2375_v41 = vld [vmem:[%s2483_s11 + $0x1a0] ss:$20 sps:$4 sm:$0xff]  }
  0x39   : > { %2037 = vmatprep.subr.bf16.mxu1 %v2285_v40  ;;  %1260 = vmatprep.mubr.bf16.mxu1 %v2289_v42  ;;  %v2373_v40 = vld [vmem:[%s2483_s11 + $0x214] ss:$20 sps:$4 sm:$0xff]   ;;  %v2376_v42 = vld [vmem:[%s2483_s11 + $0x210] ss:$20 sps:$4 sm:$0xff]  }
  0x3c   : > { %2038 = vmatpush3.bf16.msra.mxu1 %v2286_v43  ;;  %v2377_v43 = vld [vmem:[%s2483_s11 + $0x1c8] ss:$20 sps:$4 sm:$0xff]  }
  0x3d   : > { %2039 = vmatprep.subr.bf16.mxu1 %v2293_v46  ;;  %v2381_v46 = vld [vmem:[%s2483_s11 + $0x238] ss:$20 sps:$4 sm:$0xff]  }
  0x3f   : > { %1165 = vmatmul.mubr.bf16.gmra.mrb[12].mxu0 %v2291_v44  ;;  %1261 = vmatmul.mubr.bf16.gmra.mrb[12].mxu1 %v2292_v45  ;;  %v2378_v44 = vld [vmem:[%s2483_s11 + $0x23c] ss:$20 sps:$4 sm:$0xff]  }
  0x40   : > { %2040 = vmatpush3.bf16.msra.mxu1 %v2294_v48  ;;  %1172 = vmatprep.mubr.bf16.mxu0 %v2298_v50  ;;  %v2380_v45 = vld [vmem:[%s2483_s11 + $0x1f0] ss:$20 sps:$4 sm:$0xff]   ;;  %v2386_v50 = vld [vmem:[%s2483_s11 + $0x260] ss:$20 sps:$4 sm:$0xff]  }
  0x41   : > { %2041 = vmatprep.subr.bf16.mxu1 %v2295_v49  ;;  %1301 = vmatprep.mubr.bf16.mxu1 %v2302_v51  ;;  %v2383_v48 = vld [vmem:[%s2483_s11 + $0x264] ss:$20 sps:$4 sm:$0xff]   ;;  %v2385_v49 = vld [vmem:[%s2483_s11 + $0x240] ss:$20 sps:$4 sm:$0xff]   ;;  %v2387_v51 = vld [vmem:[%s2483_s11 + $0x268] ss:$20 sps:$4 sm:$0xff]  }
  0x44   : > { %2042 = vmatpush3.bf16.msra.mxu1 %v2297_v52 }
  0x47   : > { %1173 = vmatmul.mubr.bf16.gmra.mrb[16].mxu0 %v2303_v54  ;;  %1302 = vmatmul.mubr.bf16.vlgmr.msra.gmra.mrb[16].mxu1 %v2300_v53 }
  0x48   : > { %1180 = vmatprep.mubr.bf16.mxu0 %v2304_v55  ;;  %1309 = vmatprep.mubr.bf16.mxu1 %v2306_v57 }
  0x4f   : > { %1181 = vmatmul.mubr.bf16.gmra.mrb[20].mxu0 %v2308_v58  ;;  %1310 = vmatmul.mubr.bf16.gmra.mrb[20].mxu1 %v2309_v59 }
  0x50   : > { %1188 = vmatprep.mubr.bf16.mxu0 %v2310_v60  ;;  %1317 = vmatprep.mubr.bf16.mxu1 %v2312_v61 }
  0x57   : > { %1189 = vmatmul.mubr.bf16.gmra.mrb[24].mxu0 %v2314_v62  ;;  %1318 = vmatmul.mubr.bf16.gmra.mrb[24].mxu1 %v2315_v63 }
  0x58   : > { %1196 = vmatprep.mubr.bf16.mxu0 %v2317_v0  ;;  %1325 = vmatprep.mubr.bf16.mxu1 %v2319_v1 }
  0x5f   : > { %1197 = vmatmul.mubr.bf16.gmra.mrb[28].mxu0 %v2321_v2  ;;  %1326 = vmatmul.mubr.bf16.gmra.mrb[28].mxu1 %v2322_v3 }
  0x60   : > { %1204 = vmatprep.mubr.bf16.mxu0 %v2323_v4  ;;  %1333 = vmatprep.mubr.bf16.mxu1 %v2325_v5 }
  0x67   : > { %1205 = vmatmul.mubr.bf16.gmra.mrb[32].mxu0 %v2327_v6  ;;  %1334 = vmatmul.mubr.bf16.gmra.mrb[32].mxu1 %v2328_v7 }
  0x68   : > { %1212 = vmatprep.mubr.bf16.mxu0 %v2329_v8  ;;  %1341 = vmatprep.mubr.bf16.mxu1 %v2331_v9 }
  0x6f   : > { %1213 = vmatmul.mubr.bf16.gmra.mrb[36].mxu0 %v2333_v10  ;;  %1342 = vmatmul.mubr.bf16.gmra.mrb[36].mxu1 %v2334_v11 }
  0x70   : > { %1220 = vmatprep.mubr.bf16.mxu0 %v2336_v12  ;;  %1349 = vmatprep.mubr.bf16.mxu1 %v2338_v13 }
  0x77   : > { %1221 = vmatmul.mubr.bf16.gmra.mrb[40].mxu0 %v2340_v14  ;;  %1350 = vmatmul.mubr.bf16.gmra.mrb[40].mxu1 %v2341_v15 }
  0x78   : > { %1228 = vmatprep.mubr.bf16.mxu0 %v2342_v16  ;;  %1357 = vmatprep.mubr.bf16.mxu1 %v2344_v17 }
  0x7f   : > { %1229 = vmatmul.mubr.bf16.gmra.mrb[44].mxu0 %v2346_v18  ;;  %1358 = vmatmul.mubr.bf16.gmra.mrb[44].mxu1 %v2347_v19 }
  0x80   : > { %1365 = vmatprep.mubr.bf16.mxu1 %v2348_v20  ;;  %2167 = vmatprep.mubr.msk.bf16.mxu0 %vm1059_vm0, %v2350_v21 }
  0x87   : > { %1366 = vmatmul.mubr.bf16.gmra.mrb[48].mxu1 %v2351_v22  ;;  %2168 = vmatmul.mubr.msk.bf16.vlgmr.msra.gmra.mrb[48].mxu0 %vm1059_vm0, %v2352_v23 }
  0x88   : > { %1373 = vmatprep.mubr.bf16.mxu1 %v2353_v24  ;;  %2171 = vmatprep.mubr.msk.bf16.mxu0 %vm1059_vm0, %v2355_v25 }
  0x8f   : > { %1374 = vmatmul.mubr.bf16.gmra.mrb[52].mxu1 %v2356_v26  ;;  %2172 = vmatmul.mubr.msk.bf16.gmra.mrb[52].mxu0 %vm1059_vm0, %v2357_v27 }
  0x90   : > { %1381 = vmatprep.mubr.bf16.mxu1 %v2358_v28  ;;  %2175 = vmatprep.mubr.msk.bf16.mxu0 %vm1059_vm0, %v2360_v29 }
  0x97   : > { %1382 = vmatmul.mubr.bf16.gmra.mrb[56].mxu1 %v2361_v30  ;;  %2176 = vmatmul.mubr.msk.bf16.gmra.mrb[56].mxu0 %vm1059_vm0, %v2362_v31 }
  0x98   : > { %1389 = vmatprep.mubr.bf16.mxu1 %v2363_v32  ;;  %2179 = vmatprep.mubr.msk.bf16.mxu0 %vm1059_vm0, %v2365_v33 }
  0x9f   : > { %1390 = vmatmul.mubr.bf16.gmra.mrb[60].mxu1 %v2366_v34  ;;  %2180 = vmatmul.mubr.msk.bf16.gmra.mrb[60].mxu0 %vm1059_vm0, %v2367_v35 }
  0xa0   : > { %1397 = vmatprep.mubr.bf16.mxu1 %v2368_v36  ;;  %2183 = vmatprep.mubr.msk.bf16.mxu0 %vm1059_vm0, %v2370_v37 }
  0xa7   : > { %1398 = vmatmul.mubr.bf16.gmra.mrb[64].mxu1 %v2371_v38  ;;  %2184 = vmatmul.mubr.msk.bf16.gmra.mrb[64].mxu0 %vm1059_vm0, %v2372_v39  ;;  %v2681_v38 = vld [vmem:[%s2859_s2] ss:$0 sm:$0xff] }
  0xa8   : > { %1405 = vmatprep.mubr.bf16.mxu1 %v2373_v40  ;;  %2187 = vmatprep.mubr.msk.bf16.mxu0 %vm1059_vm0, %v2375_v41 }
  0xaf   : > { %1406 = vmatmul.mubr.bf16.gmra.mrb[68].mxu1 %v2376_v42  ;;  %2188 = vmatmul.mubr.msk.bf16.gmra.mrb[68].mxu0 %vm1059_vm0, %v2377_v43 }
  0xb0   : > { %1413 = vmatprep.mubr.bf16.mxu1 %v2378_v44  ;;  %2191 = vmatprep.mubr.msk.bf16.mxu0 %vm1059_vm0, %v2380_v45 }
  0xb7   : > { %1414 = vmatmul.mubr.bf16.gmra.mrb[72].mxu1 %v2381_v46  ;;  %2192 = vmatmul.mubr.msk.bf16.gmra.mrb[72].mxu0 %vm1059_vm0, %v2382_v47 }
  0xb8   : > { %1421 = vmatprep.mubr.bf16.mxu1 %v2383_v48  ;;  %2195 = vmatprep.mubr.msk.bf16.mxu0 %vm1059_vm0, %v2385_v49 }
  0xbf   : > { %1422 = vmatmul.mubr.bf16.gmra.mrb[76].mxu1 %v2386_v50  ;;  %2196 = vmatmul.mubr.msk.bf16.gmra.mrb[76].mxu0 %vm1059_vm0, %v2387_v51 }
  0xfa   : > { %v2003_v52 = vpop.f32.mrb[0].mxu1  ;;  %v1931_v53 = vpop.f32.mrb[0].mxu0 }
  0xfb   : > { %v2004_v54 = vpop.f32.mrb[1].mxu1  ;;  %v1932_v55 = vpop.f32.mrb[1].mxu0 }
  0xfc   : > { %v2662_v56 = vadd.f32 %v2004_v54, %v2003_v52  ;;  %v2006_v57 = vpop.f32.mrb[2].mxu1  ;;  %v1933_v58 = vadd.f32 %v1932_v55, %v1931_v53  ;;  %v1934_v59 = vpop.f32.mrb[2].mxu0 }
  0xfd   : > { %v2007_v60 = vpop.f32.mrb[3].mxu1  ;;  %v1935_v61 = vpop.f32.mrb[3].mxu0 }
  0xfe   : > { %v2664_v62 = vadd.f32 %v2007_v60, %v2006_v57  ;;  %v1936_v63 = vadd.f32 %v1935_v61, %v1934_v59  ;;  %v1143_v41 = vadd.f32 %v1933_v58, %v2681_v38 }
 0x100   : > { %v1146_v48 = vadd.f32 %v1936_v63, %v2681_v38 }
 0x102   : > { %v2009_v0 = vpop.f32.mrb[4].mxu1  ;;  %v1937_v1 = vpop.f32.mrb[4].mxu0 }
 0x103   : > { %v2010_v2 = vpop.f32.mrb[5].mxu1  ;;  %v1938_v3 = vpop.f32.mrb[5].mxu0 }
 0x104   : > { %v2666_v4 = vadd.f32 %v2010_v2, %v2009_v0  ;;  %v2012_v5 = vpop.f32.mrb[6].mxu1  ;;  %v1939_v6 = vadd.f32 %v1938_v3, %v1937_v1  ;;  %v1940_v7 = vpop.f32.mrb[6].mxu0 }
 0x105   : > { %v2013_v8 = vpop.f32.mrb[7].mxu1  ;;  %v1941_v9 = vpop.f32.mrb[7].mxu0 }
 0x106   : > { %v2668_v10 = vadd.f32 %v2013_v8, %v2012_v5  ;;  %v1942_v11 = vadd.f32 %v1941_v9, %v1940_v7  ;;  %v1151_v58 = vadd.f32 %v1939_v6, %v2681_v38 }
 0x108   : > { %v1154_v63 = vadd.f32 %v1942_v11, %v2681_v38 }
 0x10a   : > { %v2015_v12 = vpop.f32.mrb[8].mxu1  ;;  %v1943_v13 = vpop.f32.mrb[8].mxu0 }
 0x10b   : > { %v2016_v14 = vpop.f32.mrb[9].mxu1  ;;  %v1944_v15 = vpop.f32.mrb[9].mxu0 }
 0x10c   : > { %v2670_v16 = vadd.f32 %v2016_v14, %v2015_v12  ;;  %v2018_v17 = vpop.f32.mrb[10].mxu1  ;;  %v1945_v18 = vadd.f32 %v1944_v15, %v1943_v13  ;;  %v1946_v19 = vpop.f32.mrb[10].mxu0 }
 0x10d   : > { %v2019_v20 = vpop.f32.mrb[11].mxu1  ;;  %v1947_v21 = vpop.f32.mrb[11].mxu0 }
 0x10e   : > { %v2672_v22 = vadd.f32 %v2019_v20, %v2018_v17  ;;  %v1948_v23 = vadd.f32 %v1947_v21, %v1946_v19  ;;  %v1159_v6 = vadd.f32 %v1945_v18, %v2681_v38 }
 0x110   : > { %v1162_v11 = vadd.f32 %v1948_v23, %v2681_v38 }
 0x112   : > { %v2021_v24 = vpop.f32.mrb[12].mxu1  ;;  %v1949_v25 = vpop.f32.mrb[12].mxu0 }
 0x113   : > { %v2022_v26 = vpop.f32.mrb[13].mxu1  ;;  %v1950_v27 = vpop.f32.mrb[13].mxu0 }
 0x114   : > { %v2674_v28 = vadd.f32 %v2022_v26, %v2021_v24  ;;  %v2024_v29 = vpop.f32.mrb[14].mxu1  ;;  %v1951_v30 = vadd.f32 %v1950_v27, %v1949_v25  ;;  %v1952_v31 = vpop.f32.mrb[14].mxu0 }
 0x115   : > { %v2025_v32 = vpop.f32.mrb[15].mxu1  ;;  %v1953_v33 = vpop.f32.mrb[15].mxu0 }
 0x116   : > { %v2676_v34 = vadd.f32 %v2025_v32, %v2024_v29  ;;  %v1954_v35 = vadd.f32 %v1953_v33, %v1952_v31  ;;  %v1167_v18 = vadd.f32 %v1951_v30, %v2681_v38 }
 0x118   : > { %v1170_v23 = vadd.f32 %v1954_v35, %v2681_v38 }
 0x11a   : > { %v2043_v36 = vpop.f32.mrb[16].mxu1  ;;  %v1955_v37 = vpop.f32.mrb[16].mxu0 }
 0x11b   : > { %v2044_v39 = vpop.f32.mrb[17].mxu1  ;;  %v1956_v40 = vpop.f32.mrb[17].mxu0 }
 0x11c   : > { %v2045_v42 = vadd.f32 %v2044_v39, %v2043_v36  ;;  %v2046_v43 = vpop.f32.mrb[18].mxu1  ;;  %v1957_v44 = vadd.f32 %v1956_v40, %v1955_v37  ;;  %v1958_v45 = vpop.f32.mrb[18].mxu0 }
 0x11d   : > { %v2047_v46 = vpop.f32.mrb[19].mxu1  ;;  %v1959_v47 = vpop.f32.mrb[19].mxu0 }
 0x11e   : > { %v2048_v49 = vadd.f32 %v2047_v46, %v2046_v43  ;;  %v1960_v50 = vadd.f32 %v1959_v47, %v1958_v45  ;;  %v2685_v51 = vadd.f32 %v2045_v42, %v1143_v41  ;;  %v1175_v30 = vadd.f32 %v1957_v44, %v2681_v38 }
 0x120   : > { %v2687_v52 = vadd.f32 %v2048_v49, %v1146_v48  ;;  %v1178_v35 = vadd.f32 %v1960_v50, %v2681_v38 }
 0x122   : > { %v2049_v53 = vpop.f32.mrb[20].mxu1  ;;  %v1961_v54 = vpop.f32.mrb[20].mxu0 }
 0x123   : > { %v2050_v55 = vpop.f32.mrb[21].mxu1  ;;  %v1962_v57 = vpop.f32.mrb[21].mxu0 }
 0x124   : > { %v2051_v59 = vadd.f32 %v2050_v55, %v2049_v53  ;;  %v2052_v60 = vpop.f32.mrb[22].mxu1  ;;  %v1963_v61 = vadd.f32 %v1962_v57, %v1961_v54  ;;  %v1964_v0 = vpop.f32.mrb[22].mxu0 }
 0x125   : > { %v2053_v1 = vpop.f32.mrb[23].mxu1  ;;  %v1965_v2 = vpop.f32.mrb[23].mxu0 }
 0x126   : > { %v2054_v3 = vadd.f32 %v2053_v1, %v2052_v60  ;;  %v1966_v5 = vadd.f32 %v1965_v2, %v1964_v0  ;;  %v2691_v7 = vadd.f32 %v2051_v59, %v1151_v58 }
 0x128   : > { %v2693_v8 = vadd.f32 %v2054_v3, %v1154_v63 }
 0x12a   : > { %v2055_v9 = vpop.f32.mrb[24].mxu1  ;;  %v1967_v12 = vpop.f32.mrb[24].mxu0 }
 0x12b   : > { %v2056_v13 = vpop.f32.mrb[25].mxu1  ;;  %v1968_v14 = vpop.f32.mrb[25].mxu0 }
 0x12c   : > { %v2057_v15 = vadd.f32 %v2056_v13, %v2055_v9  ;;  %v2058_v17 = vpop.f32.mrb[26].mxu1  ;;  %v1969_v19 = vadd.f32 %v1968_v14, %v1967_v12  ;;  %v1970_v20 = vpop.f32.mrb[26].mxu0 }
 0x12d   : > { %v2059_v21 = vpop.f32.mrb[27].mxu1  ;;  %v1971_v24 = vpop.f32.mrb[27].mxu0 }
 0x12e   : > { %v2060_v25 = vadd.f32 %v2059_v21, %v2058_v17  ;;  %v1972_v26 = vadd.f32 %v1971_v24, %v1970_v20  ;;  %v2697_v27 = vadd.f32 %v2057_v15, %v1159_v6  ;;  %v1183_v6 = vadd.f32 %v1963_v61, %v2681_v38 }
 0x130   : > { %v2699_v29 = vadd.f32 %v2060_v25, %v1162_v11  ;;  %v1186_v11 = vadd.f32 %v1966_v5, %v2681_v38 }
 0x132   : > { %v2061_v31 = vpop.f32.mrb[28].mxu1  ;;  %v1973_v32 = vpop.f32.mrb[28].mxu0 }
 0x133   : > { %v2062_v33 = vpop.f32.mrb[29].mxu1  ;;  %v1974_v36 = vpop.f32.mrb[29].mxu0 }
 0x134   : > { %v2063_v37 = vadd.f32 %v2062_v33, %v2061_v31  ;;  %v2064_v39 = vpop.f32.mrb[30].mxu1  ;;  %v1975_v40 = vadd.f32 %v1974_v36, %v1973_v32  ;;  %v1976_v41 = vpop.f32.mrb[30].mxu0 }
 0x135   : > { %v2065_v42 = vpop.f32.mrb[31].mxu1  ;;  %v1977_v43 = vpop.f32.mrb[31].mxu0 }
 0x136   : > { %v2066_v45 = vadd.f32 %v2065_v42, %v2064_v39  ;;  %v1978_v46 = vadd.f32 %v1977_v43, %v1976_v41  ;;  %v2703_v47 = vadd.f32 %v2063_v37, %v1167_v18  ;;  %v1191_v39 = vadd.f32 %v1969_v19, %v2681_v38 }
 0x138   : > { %v2705_v48 = vadd.f32 %v2066_v45, %v1170_v23 }
 0x13a   : > { %v2067_v49 = vpop.f32.mrb[32].mxu1  ;;  %v1979_v53 = vpop.f32.mrb[32].mxu0 }
 0x13b   : > { %v2068_v54 = vpop.f32.mrb[33].mxu1  ;;  %v1980_v55 = vpop.f32.mrb[33].mxu0 }
 0x13c   : > { %v2069_v57 = vadd.f32 %v2068_v54, %v2067_v49  ;;  %v2070_v58 = vpop.f32.mrb[34].mxu1  ;;  %v2708_v59 = vadd.f32 %v1980_v55, %v1979_v53  ;;  %v1982_v60 = vpop.f32.mrb[34].mxu0  ;;  %v1194_v49 = vadd.f32 %v1972_v26, %v2681_v38 }
 0x13d   : > { %v2071_v0 = vpop.f32.mrb[35].mxu1  ;;  %v1983_v1 = vpop.f32.mrb[35].mxu0 }
 0x13e   : > { %v2072_v2 = vadd.f32 %v2071_v0, %v2070_v58  ;;  %v2711_v63 = vadd.f32 %v1983_v1, %v1982_v60  ;;  %v2713_v3 = vadd.f32 %v2069_v57, %v1175_v30  ;;  %v1199_v0 = vadd.f32 %v1975_v40, %v2681_v38 }
 0x140   : > { %v2715_v9 = vadd.f32 %v2072_v2, %v1178_v35 }
 0x142   : > { %v2073_v12 = vpop.f32.mrb[36].mxu1  ;;  %v1985_v13 = vpop.f32.mrb[36].mxu0 }
 0x143   : > { %v2074_v14 = vpop.f32.mrb[37].mxu1  ;;  %v1986_v44 = vpop.f32.mrb[37].mxu0 }
 0x144   : > { %v2075_v15 = vadd.f32 %v2074_v14, %v2073_v12  ;;  %v2076_v17 = vpop.f32.mrb[38].mxu1  ;;  %v2718_v20 = vadd.f32 %v1986_v44, %v1985_v13  ;;  %v1988_v21 = vpop.f32.mrb[38].mxu0  ;;  %v1202_v14 = vadd.f32 %v1978_v46, %v2681_v38 }
 0x145   : > { %v2077_v24 = vpop.f32.mrb[39].mxu1  ;;  %v1989_v50 = vpop.f32.mrb[39].mxu0 }
 0x146   : > { %v2078_v25 = vadd.f32 %v2077_v24, %v2076_v17  ;;  %v2721_v31 = vadd.f32 %v1989_v50, %v1988_v21  ;;  %v2723_v32 = vadd.f32 %v2075_v15, %v1183_v6 }
 0x148   : > { %v2725_v33 = vadd.f32 %v2078_v25, %v1186_v11  ;;  %v1207_v25 = vadd.f32 %v2708_v59, %v2681_v38 }
 0x14a   : > { %v2079_v36 = vpop.f32.mrb[40].mxu1  ;;  %v1991_v18 = vpop.f32.mrb[40].mxu0 }
 0x14b   : > { %v2080_v37 = vpop.f32.mrb[41].mxu1  ;;  %v1992_v61 = vpop.f32.mrb[41].mxu0 }
 0x14c   : > { %v2081_v41 = vadd.f32 %v2080_v37, %v2079_v36  ;;  %v2082_v42 = vpop.f32.mrb[42].mxu1  ;;  %v2728_v43 = vadd.f32 %v1992_v61, %v1991_v18  ;;  %v1994_v23 = vpop.f32.mrb[42].mxu0 }
 0x14d   : > { %v2083_v45 = vpop.f32.mrb[43].mxu1  ;;  %v1995_v5 = vpop.f32.mrb[43].mxu0 }
 0x14e   : > { %v2084_v53 = vadd.f32 %v2083_v45, %v2082_v42  ;;  %v2731_v54 = vadd.f32 %v1995_v5, %v1994_v23  ;;  %v2733_v55 = vadd.f32 %v2081_v41, %v1191_v39 }
 0x150   : > { %v2735_v30 = vadd.f32 %v2084_v53, %v1194_v49 }
 0x152   : > { %v2085_v57 = vpop.f32.mrb[44].mxu1  ;;  %v1997_v58 = vpop.f32.mrb[44].mxu0 }
 0x153   : > { %v2086_v19 = vpop.f32.mrb[45].mxu1  ;;  %v1998_v60 = vpop.f32.mrb[45].mxu0 }
 0x154   : > { %v2087_v1 = vadd.f32 %v2086_v19, %v2085_v57  ;;  %v2088_v35 = vpop.f32.mrb[46].mxu1  ;;  %v2738_v2 = vadd.f32 %v1998_v60, %v1997_v58  ;;  %v2000_v12 = vpop.f32.mrb[46].mxu0 }
 0x155   : > { %v2089_v26 = vpop.f32.mrb[47].mxu1  ;;  %v2001_v13 = vpop.f32.mrb[47].mxu0 }
 0x156   : > { %v2090_v44 = vadd.f32 %v2089_v26, %v2088_v35  ;;  %v2741_v6 = vadd.f32 %v2001_v13, %v2000_v12  ;;  %v2743_v15 = vadd.f32 %v2087_v1, %v1199_v0  ;;  %v1218_v12 = vadd.f32 %v2721_v31, %v2681_v38 }
 0x158   : > { %v2745_v17 = vadd.f32 %v2090_v44, %v1202_v14 }
 0x15a   : > { %v2091_v21 = vpop.f32.mrb[48].mxu1  ;;  %v2169_v24 = vpop.f32.mrb[48].mxu0 }
 0x15b   : > { %v1473_v40 = vadd.f32 %v2169_v24, %v2691_v7  ;;  %v2092_v50 = vpop.f32.mrb[49].mxu1  ;;  %v1464_v11 = vpop.f32.mrb[49].mxu0  ;;  %v1210_v7 = vadd.f32 %v2711_v63, %v2681_v38 }
 0x15c   : > { %v2093_v46 = vadd.f32 %v2092_v50, %v2091_v21  ;;  %v1465_v36 = vadd.f32 %v1464_v11, %v2685_v51  ;;  %v2094_v18 = vpop.f32.mrb[50].mxu1  ;;  %v2170_v37 = vpop.f32.mrb[50].mxu0 }
 0x15d   : > { %v1593_v61 = vmax.f32 %v1473_v40, 0.0  ;;  %v1476_v59 = vadd.f32 %v2170_v37, %v2693_v8  ;;  %v2095_v39 = vpop.f32.mrb[51].mxu1  ;;  %v1467_v41 = vpop.f32.mrb[51].mxu0 }
 0x15e   : > { %v1591_v42 = vmax.f32 %v1465_v36, 0.0  ;;  %v2096_v23 = vadd.f32 %v2095_v39, %v2094_v18  ;;  %v1468_v45 = vadd.f32 %v1467_v41, %v2687_v52  ;;  %v2761_v5 = vadd.f32 %v2093_v46, %v1207_v25 }
 0x15f   : > { %1625 = vst [vmem:[%s2754_s30 + $0x10] sm:$0xff] %v1593_v61  ;;  %v1594_v51 = vmax.f32 %v1476_v59, 0.0  ;;  %v1215_v52 = vadd.f32 %v2718_v20, %v2681_v38  ;;  %v1223_v36 = vadd.f32 %v2728_v43, %v2681_v38  ;;  %v1226_v61 = vadd.f32 %v2731_v54, %v2681_v38 }
 0x160   : > { %1623 = vst [vmem:[%s2754_s30] sm:$0xff] %v1591_v42  ;;  %v1592_v49 = vmax.f32 %v1468_v45, 0.0  ;;  %v2765_v53 = vadd.f32 %v2096_v23, %v1210_v7 }
 0x161   : > { %1626 = vst [vmem:[%s2754_s30 + $0x18] sm:$0xff] %v1594_v51 }
 0x162   : > { %1624 = vst [vmem:[%s2754_s30 + $0x8] sm:$0xff] %v1592_v49  ;;  %v2097_v63 = vpop.f32.mrb[52].mxu1  ;;  %v2173_v57 = vpop.f32.mrb[52].mxu0 }
 0x163   : > { %v1489_v8 = vadd.f32 %v2173_v57, %v2703_v47  ;;  %v2098_v58 = vpop.f32.mrb[53].mxu1  ;;  %v1480_v19 = vpop.f32.mrb[53].mxu0 }
 0x164   : > { %v2099_v60 = vadd.f32 %v2098_v58, %v2097_v63  ;;  %v1481_v0 = vadd.f32 %v1480_v19, %v2697_v27  ;;  %v2100_v1 = vpop.f32.mrb[54].mxu1  ;;  %v2174_v35 = vpop.f32.mrb[54].mxu0 }
 0x165   : > { %v1597_v26 = vmax.f32 %v1489_v8, 0.0  ;;  %v1492_v47 = vadd.f32 %v2174_v35, %v2705_v48  ;;  %v2101_v13 = vpop.f32.mrb[55].mxu1  ;;  %v1483_v14 = vpop.f32.mrb[55].mxu0 }
 0x166   : > { %v1595_v44 = vmax.f32 %v1481_v0, 0.0  ;;  %v2102_v21 = vadd.f32 %v2101_v13, %v2100_v1  ;;  %v1484_v20 = vadd.f32 %v1483_v14, %v2699_v29  ;;  %v1376_v24 = vadd.f32 %v2099_v60, %v1215_v52 }
 0x167   : > { %1629 = vst [vmem:[%s2754_s30 + $0x30] sm:$0xff] %v1597_v26  ;;  %v1598_v40 = vmax.f32 %v1492_v47, 0.0  ;;  %v1234_v0 = vadd.f32 %v2741_v6, %v2681_v38 }
 0x168   : > { %1627 = vst [vmem:[%s2754_s30 + $0x20] sm:$0xff] %v1595_v44  ;;  %v1596_v27 = vmax.f32 %v1484_v20, 0.0  ;;  %v2779_v50 = vadd.f32 %v2102_v21, %v1218_v12 }
 0x169   : > { %1630 = vst [vmem:[%s2754_s30 + $0x38] sm:$0xff] %v1598_v40 }
 0x16a   : > { %1628 = vst [vmem:[%s2754_s30 + $0x28] sm:$0xff] %v1596_v27  ;;  %v2103_v11 = vpop.f32.mrb[56].mxu1  ;;  %v2177_v31 = vpop.f32.mrb[56].mxu0  ;;  %v1239_v27 = vadd.f32 %v2662_v56, %v2681_v38 }
 0x16b   : > { %v1505_v25 = vadd.f32 %v2177_v31, %v2723_v32  ;;  %v2104_v48 = vpop.f32.mrb[57].mxu1  ;;  %v1496_v46 = vpop.f32.mrb[57].mxu0 }
 0x16c   : > { %v2105_v29 = vadd.f32 %v2104_v48, %v2103_v11  ;;  %v1497_v18 = vadd.f32 %v1496_v46, %v2713_v3  ;;  %v2106_v37 = vpop.f32.mrb[58].mxu1  ;;  %v2178_v7 = vpop.f32.mrb[58].mxu0  ;;  %v1242_v48 = vadd.f32 %v2664_v62, %v2681_v38 }
 0x16d   : > { %v1601_v59 = vmax.f32 %v1505_v25, 0.0  ;;  %v1508_v32 = vadd.f32 %v2178_v7, %v2725_v33  ;;  %v2107_v39 = vpop.f32.mrb[59].mxu1  ;;  %v1499_v41 = vpop.f32.mrb[59].mxu0 }
 0x16e   : > { %v1599_v42 = vmax.f32 %v1497_v18, 0.0  ;;  %v2108_v23 = vadd.f32 %v2107_v39, %v2106_v37  ;;  %v1500_v43 = vadd.f32 %v1499_v41, %v2715_v9  ;;  %v2791_v45 = vadd.f32 %v2105_v29, %v1223_v36 }
 0x16f   : > { %1633 = vst [vmem:[%s2754_s30 + $0x50] sm:$0xff] %v1601_v59  ;;  %v1602_v3 = vmax.f32 %v1508_v32, 0.0  ;;  %v1231_v9 = vadd.f32 %v2738_v2, %v2681_v38 }
 0x170   : > { %1631 = vst [vmem:[%s2754_s30 + $0x40] sm:$0xff] %v1599_v42  ;;  %v1600_v51 = vmax.f32 %v1500_v43, 0.0  ;;  %v2795_v49 = vadd.f32 %v2108_v23, %v1226_v61  ;;  %v1247_v42 = vadd.f32 %v2666_v4, %v2681_v38 }
 0x171   : > { %1634 = vst [vmem:[%s2754_s30 + $0x58] sm:$0xff] %v1602_v3 }
 0x172   : > { %1632 = vst [vmem:[%s2754_s30 + $0x48] sm:$0xff] %v1600_v51  ;;  %v2109_v54 = vpop.f32.mrb[60].mxu1  ;;  %v2181_v63 = vpop.f32.mrb[60].mxu0  ;;  %v1250_v51 = vadd.f32 %v2668_v10, %v2681_v38 }
 0x173   : > { %v1521_v33 = vadd.f32 %v2181_v63, %v2743_v15  ;;  %v2110_v57 = vpop.f32.mrb[61].mxu1  ;;  %v1512_v8 = vpop.f32.mrb[61].mxu0 }
 0x174   : > { %v2111_v58 = vadd.f32 %v2110_v57, %v2109_v54  ;;  %v1513_v19 = vadd.f32 %v1512_v8, %v2733_v55  ;;  %v2112_v52 = vpop.f32.mrb[62].mxu1  ;;  %v2182_v60 = vpop.f32.mrb[62].mxu0 }
 0x175   : > { %v1605_v1 = vmax.f32 %v1521_v33, 0.0  ;;  %v1524_v15 = vadd.f32 %v2182_v60, %v2745_v17  ;;  %v2113_v35 = vpop.f32.mrb[63].mxu1  ;;  %v1515_v12 = vpop.f32.mrb[63].mxu0 }
 0x176   : > { %v1603_v26 = vmax.f32 %v1513_v19, 0.0  ;;  %v2114_v47 = vadd.f32 %v2113_v35, %v2112_v52  ;;  %v1516_v2 = vadd.f32 %v1515_v12, %v2735_v30  ;;  %v1392_v13 = vadd.f32 %v2111_v58, %v1231_v9 }
 0x177   : > { %1637 = vst [vmem:[%s2754_s30 + $0x70] sm:$0xff] %v1605_v1  ;;  %v1606_v14 = vmax.f32 %v1524_v15, 0.0  ;;  %v1255_v35 = vadd.f32 %v2670_v16, %v2681_v38 }
 0x178   : > { %1635 = vst [vmem:[%s2754_s30 + $0x60] sm:$0xff] %v1603_v26  ;;  %v1604_v55 = vmax.f32 %v1516_v2, 0.0  ;;  %v1395_v44 = vadd.f32 %v2114_v47, %v1234_v0  ;;  %v1258_v2 = vadd.f32 %v2672_v22, %v2681_v38 }
 0x179   : > { %1638 = vst [vmem:[%s2754_s30 + $0x78] sm:$0xff] %v1606_v14 }
 0x17a   : > { %1636 = vst [vmem:[%s2754_s30 + $0x68] sm:$0xff] %v1604_v55  ;;  %v2115_v21 = vpop.f32.mrb[64].mxu1  ;;  %v2185_v20 = vpop.f32.mrb[64].mxu0 }
 0x17b   : > { %v1537_v6 = vadd.f32 %v2185_v20, %v1376_v24  ;;  %v2116_v40 = vpop.f32.mrb[65].mxu1  ;;  %v1528_v17 = vpop.f32.mrb[65].mxu0 }
 0x17c   : > { %v2117_v11 = vadd.f32 %v2116_v40, %v2115_v21  ;;  %v1529_v30 = vadd.f32 %v1528_v17, %v2761_v5  ;;  %v2118_v31 = vpop.f32.mrb[66].mxu1  ;;  %v2186_v25 = vpop.f32.mrb[66].mxu0 }
 0x17d   : > { %v1609_v46 = vmax.f32 %v1537_v6, 0.0  ;;  %v1540_v24 = vadd.f32 %v2186_v25, %v2779_v50  ;;  %v2119_v36 = vpop.f32.mrb[67].mxu1  ;;  %v1531_v29 = vpop.f32.mrb[67].mxu0  ;;  %v1263_v25 = vadd.f32 %v2674_v28, %v2681_v38 }
 0x17e   : > { %v1607_v18 = vmax.f32 %v1529_v30, 0.0  ;;  %v2120_v37 = vadd.f32 %v2119_v36, %v2118_v31  ;;  %v1532_v56 = vadd.f32 %v1531_v29, %v2765_v53  ;;  %v1400_v7 = vadd.f32 %v2117_v11, %v1239_v27 }
 0x17f   : > { %1641 = vst [vmem:[%s2754_s30 + $0x90] sm:$0xff] %v1609_v46  ;;  %v1610_v61 = vmax.f32 %v1540_v24, 0.0  ;;  %v1266_v29 = vadd.f32 %v2676_v34, %v2681_v38 }
 0x180   : > { %1639 = vst [vmem:[%s2754_s30 + $0x80] sm:$0xff] %v1607_v18  ;;  %v1608_v5 = vmax.f32 %v1532_v56, 0.0  ;;  %v1403_v59 = vadd.f32 %v2120_v37, %v1242_v48 }
 0x181   : > { %1642 = vst [vmem:[%s2754_s30 + $0x98] sm:$0xff] %v1610_v61 }
 0x182   : > { %1640 = vst [vmem:[%s2754_s30 + $0x88] sm:$0xff] %v1608_v5  ;;  %v2121_v32 = vpop.f32.mrb[68].mxu1  ;;  %v2189_v39 = vpop.f32.mrb[68].mxu0 }
 0x183   : > { %v1553_v62 = vadd.f32 %v2189_v39, %v1392_v13  ;;  %v2122_v41 = vpop.f32.mrb[69].mxu1  ;;  %v1544_v50 = vpop.f32.mrb[69].mxu0 }
 0x184   : > { %v2123_v23 = vadd.f32 %v2122_v41, %v2121_v32  ;;  %v1545_v53 = vadd.f32 %v1544_v50, %v2791_v45  ;;  %v2124_v43 = vpop.f32.mrb[70].mxu1  ;;  %v2190_v3 = vpop.f32.mrb[70].mxu0 }
 0x185   : > { %v1613_v54 = vmax.f32 %v1553_v62, 0.0  ;;  %v1556_v63 = vadd.f32 %v2190_v3, %v1395_v44  ;;  %v2125_v33 = vpop.f32.mrb[71].mxu1  ;;  %v1547_v57 = vpop.f32.mrb[71].mxu0 }
 0x186   : > { %v1611_v8 = vmax.f32 %v1545_v53, 0.0  ;;  %v2126_v9 = vadd.f32 %v2125_v33, %v2124_v43  ;;  %v1548_v58 = vadd.f32 %v1547_v57, %v2795_v49  ;;  %v1408_v4 = vadd.f32 %v2123_v23, %v1247_v42 }
 0x187   : > { %1645 = vst [vmem:[%s2754_s30 + $0xb0] sm:$0xff] %v1613_v54  ;;  %v1614_v19 = vmax.f32 %v1556_v63, 0.0 }
 0x188   : > { %1643 = vst [vmem:[%s2754_s30 + $0xa0] sm:$0xff] %v1611_v8  ;;  %v1612_v45 = vmax.f32 %v1548_v58, 0.0  ;;  %v1411_v52 = vadd.f32 %v2126_v9, %v1250_v51 }
 0x189   : > { %1646 = vst [vmem:[%s2754_s30 + $0xb8] sm:$0xff] %v1614_v19 }
 0x18a   : > { %1644 = vst [vmem:[%s2754_s30 + $0xa8] sm:$0xff] %v1612_v45  ;;  %v2127_v60 = vpop.f32.mrb[72].mxu1  ;;  %v2193_v0 = vpop.f32.mrb[72].mxu0 }
 0x18b   : > { %v1569_v1 = vadd.f32 %v2193_v0, %v1408_v4  ;;  %v2128_v10 = vpop.f32.mrb[73].mxu1  ;;  %v1560_v15 = vpop.f32.mrb[73].mxu0 }
 0x18c   : > { %v2129_v12 = vadd.f32 %v2128_v10, %v2127_v60  ;;  %v1561_v49 = vadd.f32 %v1560_v15, %v1400_v7  ;;  %v2130_v26 = vpop.f32.mrb[74].mxu1  ;;  %v2194_v47 = vpop.f32.mrb[74].mxu0 }
 0x18d   : > { %v1617_v13 = vmax.f32 %v1569_v1, 0.0  ;;  %v1572_v14 = vadd.f32 %v2194_v47, %v1411_v52  ;;  %v2131_v55 = vpop.f32.mrb[75].mxu1  ;;  %v1563_v44 = vpop.f32.mrb[75].mxu0 }
 0x18e   : > { %v1615_v21 = vmax.f32 %v1561_v49, 0.0  ;;  %v2132_v20 = vadd.f32 %v2131_v55, %v2130_v26  ;;  %v1564_v6 = vadd.f32 %v1563_v44, %v1403_v59  ;;  %v1416_v40 = vadd.f32 %v2129_v12, %v1255_v35 }
 0x18f   : > { %1649 = vst [vmem:[%s2754_s30 + $0xd0] sm:$0xff] %v1617_v13  ;;  %v1618_v16 = vmax.f32 %v1572_v14, 0.0 }
 0x190   : > { %1647 = vst [vmem:[%s2754_s30 + $0xc0] sm:$0xff] %v1615_v21  ;;  %v1616_v17 = vmax.f32 %v1564_v6, 0.0  ;;  %v1419_v27 = vadd.f32 %v2132_v20, %v1258_v2 }
 0x191   : > { %1650 = vst [vmem:[%s2754_s30 + $0xd8] sm:$0xff] %v1618_v16 }
 0x192   : > { %1648 = vst [vmem:[%s2754_s30 + $0xc8] sm:$0xff] %v1616_v17  ;;  %v2133_v11 = vpop.f32.mrb[76].mxu1  ;;  %v2197_v30 = vpop.f32.mrb[76].mxu0 }
 0x193   : > { %v2134_v31 = vpop.f32.mrb[77].mxu1  ;;  %v1576_v22 = vpop.f32.mrb[77].mxu0 }
 0x194   : > { %v2135_v48 = vadd.f32 %v2134_v31, %v2133_v11  ;;  %v1577_v46 = vadd.f32 %v1576_v22, %v1416_v40  ;;  %v2136_v24 = vpop.f32.mrb[78].mxu1  ;;  %v2198_v36 = vpop.f32.mrb[78].mxu0 }
 0x195   : > { %v2137_v18 = vpop.f32.mrb[79].mxu1  ;;  %v1579_v37 = vpop.f32.mrb[79].mxu0 }
 0x196   : > { %v1424_v56 = vadd.f32 %v2135_v48, %v1263_v25  ;;  %v1619_v7 = vmax.f32 %v1577_v46, 0.0  ;;  %v2138_v61 = vadd.f32 %v2137_v18, %v2136_v24  ;;  %v1580_v5 = vadd.f32 %v1579_v37, %v1419_v27 }
 0x198   : > { %v1585_v59 = vadd.f32 %v2197_v30, %v1424_v56  ;;  %1651 = vst [vmem:[%s2754_s30 + $0xe0] sm:$0xff] %v1619_v7  ;;  %v1427_v32 = vadd.f32 %v2138_v61, %v1266_v29  ;;  %v1620_v28 = vmax.f32 %v1580_v5, 0.0 }
 0x19a   : > { %v1621_v39 = vmax.f32 %v1585_v59, 0.0  ;;  %v1588_v62 = vadd.f32 %v2198_v36, %v1427_v32  ;;  %1652 = vst [vmem:[%s2754_s30 + $0xe8] sm:$0xff] %v1620_v28 }
 0x19c   : > { %1653 = vst [vmem:[%s2754_s30 + $0xf0] sm:$0xff] %v1621_v39  ;;  %v1622_v41 = vmax.f32 %v1588_v62, 0.0 }
 0x19e   : > { %1654 = vst [vmem:[%s2754_s30 + $0xf8] sm:$0xff] %v1622_v41 }
 0x19f PF: > { %s13_s14 = sadd.s32 1, %s2410_s14   ;;  %s2861_s12 = smov %s2406_s13 }
 0x1a0   : > { %p10_p5 = scmp.ge.s32.totalorder %s13_s14, 9   ;;  %s2862_s13 = smov %s2864_s15 }
 0x1a2   :  { %12 = sbr.rel (!%p10_p5) target bundleno = 2 (0x2), region = 68 }

// kernel: custom_cnn1_forward.7
= control target key start
LH: loop header
LB: loop body
LE: loop exit
PB: predicated region body
PF: predicated region fallthrough
CT: control target
= control target key end

     0   :  { %s4041_s0 = inlined_call_operand.vmem [shape: bf16[16,100352], index: 0, kind: input, shape index: {}]   ;;  %s4042_s1 = inlined_call_operand.hbm [shape: bf16[100352,512], index: 1, kind: input, shape index: {}]   ;;  %s4043_s2 = inlined_call_operand.vmem [shape: f32[1,512], index: 2, kind: input, shape index: {}]   ;;  %s4044_s3 = inlined_call_operand.vmem [shape: f32[16,512], index: 3, kind: output, shape index: {}]  }
   0x1   :  { %4048 = sst [smem:[#allocation11_spill]] %s4041_s0 }
   0x2   :  { %8 = vsyncpa [#allocation4], 0 }
   0x3   :  { %10 = vsyncpa [#allocation4 + $0x1], 0  ;;  %s3453_s12 = smov 0   ;;  %s3455_s13 = smov 0  }
   0x4   :  { %s3457_s14 = smov 0   ;;  %s3459_s15 = smov 0  }
   0x5   :  { %s3461_s16 = smov 0   ;;  %s3463_s17 = smov 0  }
   0x6   :  { %s3465_s18 = smov 0   ;;  %s3467_s19 = smov 0  }
   0x7   :  { %s3469_s20 = smov 0   ;;  %s3471_s21 = smov 0  }
   0x8   :  { %s3473_s22 = smov 0   ;;  %s3475_s23 = smov 0  }
   0x9 LB: > { %4049 = sst [smem:[#allocation7_spill]] %s3422_s22  ;;  %s2487_s24 = sadd.s32 4294967295, %s3426_s23   ;;  %s3426_s23 = sphi %s3475_s23, %s16_s23   ;;  %s3422_s22 = sphi %s3473_s22, %s4062_s22   ;;  %s3418_s21 = sphi %s3471_s21, %s4072_s21   ;;  %s3414_s20 = sphi %s3469_s20, %s4071_s20   ;;  %s3410_s19 = sphi %s3467_s19, %s4070_s19   ;;  %s3406_s18 = sphi %s3465_s18, %s4069_s18   ;;  %s3402_s17 = sphi %s3463_s17, %s4068_s17   ;;  %s3398_s16 = sphi %s3461_s16, %s4067_s16   ;;  %s3394_s15 = sphi %s3459_s15, %s4066_s15   ;;  %s3390_s14 = sphi %s3457_s14, %s4065_s14   ;;  %s3386_s13 = sphi %s3455_s13, %s4064_s13   ;;  %s3382_s12 = sphi %s3453_s12, %s4063_s12  }
   0xa   : > { %s28_s25 = sadd.s32 1, %s3418_s21  ;;  %s31_s26 = sadd.s32 1, %s3422_s22 }
   0xb   : > { %p29_p0 = scmp.ge.s32.totalorder %s28_s25, 49  ;;  %s44_s27 = sadd.s32 1, %s3406_s18 }
   0xc   : > { %p51_p1 = scmp.ne.s32.totalorder %s3406_s18, %s3402_s17  ;;  %p52_p2 = scmp.eq.s32.totalorder %s3426_s23, 0 }
   0xd   : > { %s4074_s25 = smov (%p29_p0, %s28_s25), 0  ;;  %s4076_s26 = smov (!%p29_p0, %s31_s26), %s3422_s22 }
   0xe   : > { %4050 = sst [smem:[#allocation8_spill]] %s4074_s25  ;;  %s40_s28 = ssub.s32 %s3418_s21, %s4074_s25 }
   0xf   : > { %p33_p3 = scmp.ge.s32.totalorder %s4076_s26, 2  ;;  %p42_p4 = scmp.eq.s32.totalorder %s40_s28, 0 }
  0x10   : > { %p3525_p5 = por %p52_p2, %p51_p1  ;;  %s72_s30 = sadd.s32 1, %s3398_s16 }
  0x11   : > { %s4078_s26 = smov (%p33_p3, %s4076_s26), 0  ;;  %p79_p6 = scmp.ne.s32.totalorder %s3398_s16, %s3394_s15 }
  0x12   : > { %4052 = sst [smem:[#allocation9_spill]] %s4078_s26  ;;  %s68_s5 = ssub.s32 %s3422_s22, %s4078_s26 }
  0x13   : > { %s3533_s4 = scalar_select %p42_p4, %s3406_s18, %s44_s27  }
  0x14   : > { %s69_s6 = sor.u32 %s68_s5, %s40_s28  ;;  %p85_p7 = scmp.ne.s32.totalorder %s3394_s15, %s3390_s14 }
  0x15   : > { %4053 = sst [smem:[#allocation10_spill]] %s3533_s4  ;;  %p70_p8 = scmp.eq.s32.totalorder %s69_s6, 0 }
  0x16   : > { %p3541_p9 = por %p79_p6, %p52_p2  ;;  %p86_p10 = scmp.eq.s32.totalorder %s2487_s24, 0 }
  0x17   : > { %p124_p11 = scmp.eq.s32.totalorder %s68_s5, 0  ;;  %s126_s10 = sadd.s32 1, %s3386_s13 }
  0x18   : > { %s3548_s8 = scalar_select %p70_p8, %s3398_s16, %s72_s30  }
  0x19   : > { %p3550_p12 = por %p86_p10, %p85_p7  ;;  %p136_p13 = scmp.ne.s32.totalorder %s3386_s13, %s3382_s12 }
  0x1a   : > { %s3556_s11 = scalar_select %p124_p11, %s3386_s13, %s126_s10  }
  0x1b   : > { %p137_p0 = scmp.eq.s32.totalorder %s2487_s24, 97  ;;  %p2490_p2 = scmp.ge.s32.totalorder %s3426_s23, 98 }
  0x1d   : > { %p3562_p1 = por %p137_p0, %p136_p13  ;;  %159 = sbr.rel (%p2490_p2) target bundleno = 83 (0x53), region = 16 }
  0x1f   : > { %s4056_s14 = scalar_select %p3562_p1, 1, 0 }
  0x24   : > { %162 = sbr.rel (!%p3525_p5) target bundleno = 54 (0x36), region = 20  ;;  %s164_s27 = sand.u32 (%p3525_p5), 1, %s3406_s18  }
  0x25   : > { %s2783_s28 = sshll.u32 (%p3525_p5), %s3418_s21, 6  ;;  %s2491_s30 = sshll.u32 (%p3525_p5), %s164_s27, 7 }
  0x26   : > { %s4057_s0 = sld [smem:[#allocation11_spill]] (%p3525_p5)  ;;  %s166_s24 = scalar_lea.vmem (%p3525_p5), [#allocation2], %s2491_s30 }
  0x2c   : > { %s3574_s10 = scalar_lea.vmem %s4057_s0, %s2783_s28 }
  0x2d   : > { %v185_v0 = vld [vmem:[%s3574_s10] sm:$0xff]  ;;  %v187_v1 = vld [vmem:[%s3574_s10 + $0x8] sm:$0xff]  ;;  %v189_v2 = vld [vmem:[%s3574_s10 + $0x10] sm:$0xff] }
  0x2e   : > { %186 = vst [vmem:[%s166_s24] sm:$0xff] %v185_v0  ;;  %188 = vst [vmem:[%s166_s24 + $0x8] sm:$0xff] %v187_v1  ;;  %v191_v3 = vld [vmem:[%s3574_s10 + $0x18] sm:$0xff]  ;;  %v193_v4 = vld [vmem:[%s3574_s10 + $0x20] sm:$0xff] }
  0x2f   : > { %190 = vst [vmem:[%s166_s24 + $0x10] sm:$0xff] %v189_v2  ;;  %v195_v5 = vld [vmem:[%s3574_s10 + $0x28] sm:$0xff]  ;;  %192 = vst [vmem:[%s166_s24 + $0x18] sm:$0xff] %v191_v3  ;;  %v197_v6 = vld [vmem:[%s3574_s10 + $0x30] sm:$0xff] }
  0x30   : > { %194 = vst [vmem:[%s166_s24 + $0x20] sm:$0xff] %v193_v4  ;;  %196 = vst [vmem:[%s166_s24 + $0x28] sm:$0xff] %v195_v5  ;;  %v199_v7 = vld [vmem:[%s3574_s10 + $0x38] sm:$0xff]  ;;  %v201_v8 = vld [vmem:[%s3574_s10 + $0xc40] sm:$0xff] }
  0x31   : > { %198 = vst [vmem:[%s166_s24 + $0x30] sm:$0xff] %v197_v6  ;;  %200 = vst [vmem:[%s166_s24 + $0x38] sm:$0xff] %v199_v7  ;;  %v203_v9 = vld [vmem:[%s3574_s10 + $0xc48] sm:$0xff]  ;;  %v205_v10 = vld [vmem:[%s3574_s10 + $0xc50] sm:$0xff] }
  0x32   : > { %202 = vst [vmem:[%s166_s24 + $0x40] sm:$0xff] %v201_v8  ;;  %v207_v11 = vld [vmem:[%s3574_s10 + $0xc58] sm:$0xff]  ;;  %204 = vst [vmem:[%s166_s24 + $0x48] sm:$0xff] %v203_v9  ;;  %v209_v12 = vld [vmem:[%s3574_s10 + $0xc60] sm:$0xff] }
  0x33   : > { %206 = vst [vmem:[%s166_s24 + $0x50] sm:$0xff] %v205_v10  ;;  %208 = vst [vmem:[%s166_s24 + $0x58] sm:$0xff] %v207_v11  ;;  %v211_v13 = vld [vmem:[%s3574_s10 + $0xc68] sm:$0xff]  ;;  %v213_v14 = vld [vmem:[%s3574_s10 + $0xc70] sm:$0xff] }
  0x34   : > { %210 = vst [vmem:[%s166_s24 + $0x60] sm:$0xff] %v209_v12  ;;  %212 = vst [vmem:[%s166_s24 + $0x68] sm:$0xff] %v211_v13  ;;  %v215_v15 = vld [vmem:[%s3574_s10 + $0xc78] sm:$0xff] }
  0x35   : > { %214 = vst [vmem:[%s166_s24 + $0x70] sm:$0xff] %v213_v14  ;;  %216 = vst [vmem:[%s166_s24 + $0x78] sm:$0xff] %v215_v15 }
  0x36 PF: > { %s223_s29 = sand.u32 1, %s3398_s16   ;;  %s2496_s27 = sshll.u32 %s3422_s22, 1 }
  0x37   : > { %s2494_s28 = sshll.u32 %s223_s29, 11  ;;  %s2784_s30 = sshll.u32 %s3418_s21, 10 }
  0x38   : > { %s234_s5 = sadd.s32 %s2784_s30, %s2496_s27  ;;  %s227_s6 = scalar_lea.vmem [#allocation3], %s2494_s28 }
  0x39   : > { %s237_s0 = sshll.u32 %s227_s6, 4  ;;  %s2498_s26 = sshll.u32 %s234_s5, 6  ;;  %s3595_s0 = int_to_ptr.vmem [resolvable:$true] %s237_s0 }
  0x3a   : > { %s3600_s10 = scalar_lea.hbm %s4042_s1, %s2498_s26  ;;  %s3602_s24 = scalar_lea.sflag [#allocation4], %s223_s29 }
  0x3b   : > { %s3300_s22 = scalar_lea.hbm %s3600_s10, 32768  ;;  %s3304_s30 = scalar_lea.hbm %s4042_s1, 3211264 }
  0x3c   : > { %p3301_p3 = scmp.ne.s32.totalorder %s3600_s10, %s3300_s22  ;;  %p3305_p6 = scmp.lt.u32.totalorder %s3600_s10, %s4042_s1 }
  0x3d   : > { %p3306_p7 = scmp.lt.u32.totalorder %s3304_s30, %s3300_s22  ;;  %p3308_p10 = scmp.lt.u32.totalorder %s3300_s22, %s3600_s10 }
  0x3e   : > { %p3302_p4 = pnand %p3301_p3, %p3541_p9 }
  0x3f   : > { %p3307_p8 = por %p3306_p7, %p3305_p6 }
  0x40   : > { %p3303_p5 = pneg %p3302_p4 }
  0x41   : > { %p3309_p11 = por %p3308_p10, %p3307_p8 }
  0x43   : > { %p3310_p13 = pnand %p3309_p11, %p3303_p5 }
  0x45   : > { %3313 = shalt.err (!%p3310_p13)
}
  0x46   : > { %s3314_s25 = scalar_lea.vmem %s3595_s0, 32768  ;;  %s3428_s26 = smov [#allocation3]  }
  0x47   : > { %p3315_p0 = scmp.ne.s32.totalorder %s3595_s0, %s3314_s25  ;;  %s3318_s4 = sshll.u32 %s3428_s26, 4  ;;  %s3319_s4 = int_to_ptr.vmem [resolvable:$false] %s3318_s4 }
  0x48   : > { %s3320_s29 = scalar_lea.vmem %s3319_s4, 65536  ;;  %p3321_p4 = scmp.lt.s32.totalorder %s3595_s0, %s3319_s4 }
  0x49   : > { %p3316_p2 = pnand %p3315_p0, %p3541_p9  ;;  %p3322_p1 = scmp.lt.s32.totalorder %s3320_s29, %s3314_s25 }
  0x4b   : > { %p3317_p3 = pneg %p3316_p2  ;;  %p3323_p6 = por %p3322_p1, %p3321_p4 }
  0x4d   : > { %p3324_p7 = pnand %p3323_p6, %p3317_p3 }
  0x4f   : > { %3327 = shalt.err (!%p3324_p7)
}
  0x50   : > { %s3429_s22 = smov 256   ;;  %s3430_s27 = smov 128  }
  0x51   : > { %s3431_s28 = smov 8  }
  0x52   : > { %2814 = dma.hbm_to_vmem [thread:$0]  (%p3541_p9), %s3600_s10, 32768, %s3595_s0, %s3602_s24, %s3429_s22, %s3430_s27, %s3431_s28  }
  0x53 PF: > { %p2499_p5 = scmp.ge.s32.totalorder %s3426_s23, 1  ;;  %p253_p8 = scmp.lt.s32.totalorder %s3426_s23, 99 }
  0x55   : > { %p254_p10 = pnand %p2499_p5, %p253_p8 }
  0x56   : > { %s260_s30 = sand.u32 (!%p254_p10), 1, %s3402_s17   ;;  %s266_s5 = sand.u32 (!%p254_p10), 1, %s3394_s15  }
  0x57   : > { %257 = sbr.rel (%p254_p10) target bundleno = 605 (0x25d), region = 51  ;;  %s2500_s6 = sshll.u32 (!%p254_p10), %s260_s30, 7 }
  0x58   : > { %s2501_s25 = sshll.u32 (!%p254_p10), %s266_s5, 11  ;;  %s3630_s26 = scalar_lea.vmem (!%p254_p10), [#allocation2], %s2500_s6 }
  0x59   : > { %s267_s4 = scalar_lea.sflag (!%p254_p10), [#allocation4], %s266_s5  ;;  %s3632_s29 = scalar_lea.vmem (!%p254_p10), [#allocation3], %s2501_s25 }
  0x5e   : > { %3377 = dma.done.wait (%p3550_p12), %s267_s4, 32768  }
  0x5f   : > { %3379 = vsyncadd (%p3550_p12), %s267_s4, 4294934528  ;;  %s297_s0 = sand.u32 1, %s3382_s12   ;;  %s2503_s7 = sshll.u32 %s3414_s20, 1 }
  0x60   : > { %s2502_s10 = sshll.u32 %s297_s0, 5  ;;  %p305_p9 = scmp.lt.s32.totalorder %s2503_s7, 3 }
  0x61   : > { %s3646_s27 = scalar_lea.vmem [#allocation5], %s2502_s10  ;;  %p2504_p1 = scmp.ne.s32.totalorder %s3410_s19, 0 }
  0x62   : > { %s4080_s7 = smov (!%p305_p9, %s2503_s7), 3  ;;  %v3432_v16 = vmov (!%p2504_p1), 0.0  }
  0x63   : > { %s307_s22 = scalar_lea.vmem %s4043_s2, %s4080_s7  ;;  %314 = sbr.rel (%p2504_p1) target bundleno = 106 (0x6a), region = 63  ;;  %315 = vst [vmem:[%s3646_s27] sm:$0xff] (!%p2504_p1), %v3432_v16  ;;  %316 = vst [vmem:[%s3646_s27 + $0x8] sm:$0xff] (!%p2504_p1), %v3432_v16 }
  0x64   : > { %317 = vst [vmem:[%s3646_s27 + $0x10] sm:$0xff] (!%p2504_p1), %v3432_v16  ;;  %318 = vst [vmem:[%s3646_s27 + $0x18] sm:$0xff] (!%p2504_p1), %v3432_v16 }
  0x6a PF: > { %v2916_v17 = vld [vmem:[%s3632_s29 + $0x4] ss:$8 sps:$4 sm:$0xff]   ;;  %v2920_v19 = vld [vmem:[%s3632_s29] ss:$8 sps:$4 sm:$0xff]   ;;  %v2922_v21 = vld [vmem:[%s3632_s29 + $0x14] ss:$8 sps:$4 sm:$0xff]  }
  0x6b   : > { %v2918_v18 = vld [vmem:[%s3632_s29 + $0x404] ss:$8 sps:$4 sm:$0xff]   ;;  %1955 = vmatprep.subr.bf16.mxu1 %v2916_v17  ;;  %v2921_v20 = vld [vmem:[%s3632_s29 + $0x400] ss:$8 sps:$4 sm:$0xff]   ;;  %v2924_v22 = vld [vmem:[%s3632_s29 + $0x414] ss:$8 sps:$4 sm:$0xff]  }
  0x6c   : > { %2127 = vmatprep.subr.bf16.mxu0 %v2918_v18  ;;  %1956 = vmatpush1.bf16.msra.mxu1 %v2920_v19  ;;  %v2926_v23 = vld [vmem:[%s3632_s29 + $0x10] ss:$8 sps:$4 sm:$0xff]   ;;  %v2928_v25 = vld [vmem:[%s3632_s29 + $0x24] ss:$8 sps:$4 sm:$0xff]   ;;  %v2932_v27 = vld [vmem:[%s3632_s29 + $0x20] ss:$8 sps:$4 sm:$0xff]  }
  0x6d   : > { %2128 = vmatpush1.bf16.msra.mxu0 %v2921_v20  ;;  %1957 = vmatprep.subr.bf16.mxu1 %v2922_v21  ;;  %v2927_v24 = vld [vmem:[%s3632_s29 + $0x410] ss:$8 sps:$4 sm:$0xff]   ;;  %v2930_v26 = vld [vmem:[%s3632_s29 + $0x424] ss:$8 sps:$4 sm:$0xff]   ;;  %v2933_v28 = vld [vmem:[%s3632_s29 + $0x420] ss:$8 sps:$4 sm:$0xff]  }
  0x6e   : > { %2129 = vmatprep.subr.bf16.mxu0 %v2924_v22  ;;  %v2934_v29 = vld [vmem:[%s3632_s29 + $0x34] ss:$8 sps:$4 sm:$0xff]   ;;  %v2938_v31 = vld [vmem:[%s3632_s29 + $0x30] ss:$8 sps:$4 sm:$0xff]   ;;  %v2940_v33 = vld [vmem:[%s3632_s29 + $0x44] ss:$8 sps:$4 sm:$0xff]  }
  0x6f   : > { %v2936_v30 = vld [vmem:[%s3632_s29 + $0x434] ss:$8 sps:$4 sm:$0xff]   ;;  %v2939_v32 = vld [vmem:[%s3632_s29 + $0x430] ss:$8 sps:$4 sm:$0xff]   ;;  %v2942_v34 = vld [vmem:[%s3632_s29 + $0x444] ss:$8 sps:$4 sm:$0xff]  }
  0x70   : > { %1958 = vmatpush1.bf16.msra.mxu1 %v2926_v23  ;;  %v2944_v35 = vld [vmem:[%s3632_s29 + $0x40] ss:$8 sps:$4 sm:$0xff]   ;;  %v2946_v37 = vld [vmem:[%s3632_s29 + $0x54] ss:$8 sps:$4 sm:$0xff]   ;;  %v2950_v39 = vld [vmem:[%s3632_s29 + $0x50] ss:$8 sps:$4 sm:$0xff]  }
  0x71   : > { %2130 = vmatpush1.bf16.msra.mxu0 %v2927_v24  ;;  %1959 = vmatprep.subr.bf16.mxu1 %v2928_v25  ;;  %v2945_v36 = vld [vmem:[%s3632_s29 + $0x440] ss:$8 sps:$4 sm:$0xff]   ;;  %v2948_v38 = vld [vmem:[%s3632_s29 + $0x454] ss:$8 sps:$4 sm:$0xff]   ;;  %v2951_v40 = vld [vmem:[%s3632_s29 + $0x450] ss:$8 sps:$4 sm:$0xff]  }
  0x72   : > { %2131 = vmatprep.subr.bf16.mxu0 %v2930_v26  ;;  %v2952_v41 = vld [vmem:[%s3632_s29 + $0x64] ss:$8 sps:$4 sm:$0xff]   ;;  %v2956_v43 = vld [vmem:[%s3632_s29 + $0x60] ss:$8 sps:$4 sm:$0xff]   ;;  %v2958_v45 = vld [vmem:[%s3632_s29 + $0x74] ss:$8 sps:$4 sm:$0xff]  }
  0x73   : > { %v2954_v42 = vld [vmem:[%s3632_s29 + $0x464] ss:$8 sps:$4 sm:$0xff]   ;;  %v2957_v44 = vld [vmem:[%s3632_s29 + $0x460] ss:$8 sps:$4 sm:$0xff]   ;;  %v2960_v46 = vld [vmem:[%s3632_s29 + $0x474] ss:$8 sps:$4 sm:$0xff]  }
  0x74   : > { %1960 = vmatpush1.bf16.msra.mxu1 %v2932_v27  ;;  %v2962_v47 = vld [vmem:[%s3632_s29 + $0x70] ss:$8 sps:$4 sm:$0xff]   ;;  %v2964_v49 = vld [vmem:[%s3632_s29 + $0x84] ss:$8 sps:$4 sm:$0xff]   ;;  %v2968_v51 = vld [vmem:[%s3632_s29 + $0x80] ss:$8 sps:$4 sm:$0xff]  }
  0x75   : > { %2132 = vmatpush1.bf16.msra.mxu0 %v2933_v28  ;;  %1961 = vmatprep.subr.bf16.mxu1 %v2934_v29  ;;  %v2963_v48 = vld [vmem:[%s3632_s29 + $0x470] ss:$8 sps:$4 sm:$0xff]   ;;  %v2966_v50 = vld [vmem:[%s3632_s29 + $0x484] ss:$8 sps:$4 sm:$0xff]   ;;  %v2969_v52 = vld [vmem:[%s3632_s29 + $0x480] ss:$8 sps:$4 sm:$0xff]  }
  0x76   : > { %2133 = vmatprep.subr.bf16.mxu0 %v2936_v30  ;;  %v2970_v53 = vld [vmem:[%s3632_s29 + $0x94] ss:$8 sps:$4 sm:$0xff]   ;;  %v2974_v55 = vld [vmem:[%s3632_s29 + $0x90] ss:$8 sps:$4 sm:$0xff]   ;;  %v2976_v57 = vld [vmem:[%s3632_s29 + $0xa4] ss:$8 sps:$4 sm:$0xff]  }
  0x77   : > { %v2972_v54 = vld [vmem:[%s3632_s29 + $0x494] ss:$8 sps:$4 sm:$0xff]   ;;  %v2975_v56 = vld [vmem:[%s3632_s29 + $0x490] ss:$8 sps:$4 sm:$0xff]   ;;  %v2978_v58 = vld [vmem:[%s3632_s29 + $0x4a4] ss:$8 sps:$4 sm:$0xff]  }
  0x78   : > { %1962 = vmatpush1.bf16.msra.mxu1 %v2938_v31  ;;  %v2980_v59 = vld [vmem:[%s3632_s29 + $0xa0] ss:$8 sps:$4 sm:$0xff]   ;;  %v2982_v61 = vld [vmem:[%s3632_s29 + $0xb4] ss:$8 sps:$4 sm:$0xff]   ;;  %v2986_v63 = vld [vmem:[%s3632_s29 + $0xb0] ss:$8 sps:$4 sm:$0xff]  }
  0x79   : > { %2134 = vmatpush1.bf16.msra.mxu0 %v2939_v32  ;;  %1963 = vmatprep.subr.bf16.mxu1 %v2940_v33  ;;  %v2981_v60 = vld [vmem:[%s3632_s29 + $0x4a0] ss:$8 sps:$4 sm:$0xff]   ;;  %v2984_v62 = vld [vmem:[%s3632_s29 + $0x4b4] ss:$8 sps:$4 sm:$0xff]   ;;  %v2987_v0 = vld [vmem:[%s3632_s29 + $0x4b0] ss:$8 sps:$4 sm:$0xff]  }
  0x7a   : > { %2135 = vmatprep.subr.bf16.mxu0 %v2942_v34  ;;  %v323_v1 = vld [vmem:[%s3630_s26] sm:$0xff]  ;;  %v2994_v11 = vld [vmem:[%s3632_s29 + $0xd4] ss:$8 sps:$4 sm:$0xff]   ;;  %v2998_v13 = vld [vmem:[%s3632_s29 + $0xd0] ss:$8 sps:$4 sm:$0xff]   ;;  %p2777_p12 = scmp.ne.s32.totalorder %s3410_s19, 48 }
  0x7b   : > { %v331_v2 = vld [vmem:[%s3630_s26 + $0x40] sm:$0xff]  ;;  %v2996_v12 = vld [vmem:[%s3632_s29 + $0x4d4] ss:$8 sps:$4 sm:$0xff]   ;;  %v2999_v14 = vld [vmem:[%s3632_s29 + $0x4d0] ss:$8 sps:$4 sm:$0xff]  }
  0x7c   : > { %1964 = vmatpush1.bf16.msra.mxu1 %v2944_v35  ;;  %v2988_v3 = vld [vmem:[%s3632_s29 + $0xc4] ss:$8 sps:$4 sm:$0xff]   ;;  %v2506_v5 = vcombine.high %v323_v1, %v331_v2  ;;  %v2992_v9 = vld [vmem:[%s3632_s29 + $0xc0] ss:$8 sps:$4 sm:$0xff]   ;;  %v3006_v19 = vld [vmem:[%s3632_s29 + $0xf4] ss:$8 sps:$4 sm:$0xff]   ;;  %v2505_v25 = vcombine.low %v323_v1, %v331_v2 }
  0x7d   : > { %2136 = vmatpush1.bf16.msra.mxu0 %v2945_v36  ;;  %1965 = vmatprep.subr.bf16.mxu1 %v2946_v37  ;;  %v2990_v4 = vld [vmem:[%s3632_s29 + $0x4c4] ss:$8 sps:$4 sm:$0xff]   ;;  %v2993_v10 = vld [vmem:[%s3632_s29 + $0x4c0] ss:$8 sps:$4 sm:$0xff]   ;;  %v3008_v20 = vld [vmem:[%s3632_s29 + $0x4f4] ss:$8 sps:$4 sm:$0xff]  }
  0x7e   : > { %2137 = vmatprep.subr.bf16.mxu0 %v2948_v38  ;;  %v327_v6 = vld [vmem:[%s3630_s26 + $0x20] sm:$0xff]  ;;  %1987 = vmatprep.mubr.bf16.mxu1 %v2506_v5  ;;  %v3010_v21 = vld [vmem:[%s3632_s29 + $0xf0] ss:$8 sps:$4 sm:$0xff]   ;;  %v3020_v29 = vld [vmem:[%s3632_s29 + $0x114] ss:$8 sps:$4 sm:$0xff]  }
  0x7f   : > { %v335_v7 = vld [vmem:[%s3630_s26 + $0x60] sm:$0xff]  ;;  %v3011_v22 = vld [vmem:[%s3632_s29 + $0x4f0] ss:$8 sps:$4 sm:$0xff]   ;;  %v3023_v30 = vld [vmem:[%s3632_s29 + $0x514] ss:$8 sps:$4 sm:$0xff]  }
  0x80   : > { %1966 = vmatpush1.bf16.msra.mxu1 %v2950_v39  ;;  %v2514_v8 = vcombine.high %v327_v6, %v335_v7  ;;  %v3000_v15 = vld [vmem:[%s3632_s29 + $0xe4] ss:$8 sps:$4 sm:$0xff]   ;;  %v3004_v17 = vld [vmem:[%s3632_s29 + $0xe0] ss:$8 sps:$4 sm:$0xff]   ;;  %v2513_v27 = vcombine.low %v327_v6, %v335_v7  ;;  %v3018_v31 = vld [vmem:[%s3632_s29 + $0x110] ss:$8 sps:$4 sm:$0xff]  }
  0x81   : > { %2138 = vmatpush1.bf16.msra.mxu0 %v2951_v40  ;;  %1967 = vmatprep.subr.bf16.mxu1 %v2952_v41  ;;  %v3002_v16 = vld [vmem:[%s3632_s29 + $0x4e4] ss:$8 sps:$4 sm:$0xff]   ;;  %v3005_v18 = vld [vmem:[%s3632_s29 + $0x4e0] ss:$8 sps:$4 sm:$0xff]   ;;  %v3021_v32 = vld [vmem:[%s3632_s29 + $0x510] ss:$8 sps:$4 sm:$0xff]  }
  0x82   : > { %2139 = vmatprep.subr.bf16.mxu0 %v2954_v42  ;;  %2159 = vmatprep.mubr.bf16.mxu0 %v2514_v8  ;;  %v3014_v23 = vld [vmem:[%s3632_s29 + $0x104] ss:$8 sps:$4 sm:$0xff]   ;;  %v3012_v26 = vld [vmem:[%s3632_s29 + $0x100] ss:$8 sps:$4 sm:$0xff]   ;;  %v3032_v37 = vld [vmem:[%s3632_s29 + $0x134] ss:$8 sps:$4 sm:$0xff]  }
  0x83   : > { %v3017_v24 = vld [vmem:[%s3632_s29 + $0x504] ss:$8 sps:$4 sm:$0xff]   ;;  %v3015_v28 = vld [vmem:[%s3632_s29 + $0x500] ss:$8 sps:$4 sm:$0xff]   ;;  %v3035_v38 = vld [vmem:[%s3632_s29 + $0x534] ss:$8 sps:$4 sm:$0xff]  }
  0x84   : > { %1968 = vmatpush1.bf16.msra.mxu1 %v2956_v43  ;;  %v3026_v33 = vld [vmem:[%s3632_s29 + $0x124] ss:$8 sps:$4 sm:$0xff]   ;;  %v3024_v35 = vld [vmem:[%s3632_s29 + $0x120] ss:$8 sps:$4 sm:$0xff]   ;;  %v3030_v39 = vld [vmem:[%s3632_s29 + $0x130] ss:$8 sps:$4 sm:$0xff]  }
  0x85   : > { %2140 = vmatpush1.bf16.msra.mxu0 %v2957_v44  ;;  %1969 = vmatprep.subr.bf16.mxu1 %v2958_v45  ;;  %v3029_v34 = vld [vmem:[%s3632_s29 + $0x524] ss:$8 sps:$4 sm:$0xff]   ;;  %v3027_v36 = vld [vmem:[%s3632_s29 + $0x520] ss:$8 sps:$4 sm:$0xff]   ;;  %v3033_v40 = vld [vmem:[%s3632_s29 + $0x530] ss:$8 sps:$4 sm:$0xff]  }
  0x86   : > { %2141 = vmatprep.subr.bf16.mxu0 %v2960_v46  ;;  %v3038_v41 = vld [vmem:[%s3632_s29 + $0x144] ss:$8 sps:$4 sm:$0xff]   ;;  %v3036_v43 = vld [vmem:[%s3632_s29 + $0x140] ss:$8 sps:$4 sm:$0xff]   ;;  %v3044_v45 = vld [vmem:[%s3632_s29 + $0x154] ss:$8 sps:$4 sm:$0xff]  }
  0x87   : > { %v3041_v42 = vld [vmem:[%s3632_s29 + $0x544] ss:$8 sps:$4 sm:$0xff]   ;;  %v3039_v44 = vld [vmem:[%s3632_s29 + $0x540] ss:$8 sps:$4 sm:$0xff]   ;;  %v3047_v46 = vld [vmem:[%s3632_s29 + $0x554] ss:$8 sps:$4 sm:$0xff]  }
  0x88   : > { %1970 = vmatpush1.bf16.msra.mxu1 %v2962_v47  ;;  %v3042_v47 = vld [vmem:[%s3632_s29 + $0x150] ss:$8 sps:$4 sm:$0xff]   ;;  %v3060_v1 = vld [vmem:[%s3632_s29 + $0x180] ss:$8 sps:$4 sm:$0xff]   ;;  %v3074_v7 = vld [vmem:[%s3632_s29 + $0x1a4] ss:$8 sps:$4 sm:$0xff]  }
  0x89   : > { %2142 = vmatpush1.bf16.msra.mxu0 %v2963_v48  ;;  %1971 = vmatprep.subr.bf16.mxu1 %v2964_v49  ;;  %v3045_v48 = vld [vmem:[%s3632_s29 + $0x550] ss:$8 sps:$4 sm:$0xff]   ;;  %v3050_v49 = vld [vmem:[%s3632_s29 + $0x164] ss:$8 sps:$4 sm:$0xff]   ;;  %v3063_v2 = vld [vmem:[%s3632_s29 + $0x580] ss:$8 sps:$4 sm:$0xff]  }
  0x8a   : > { %2143 = vmatprep.subr.bf16.mxu0 %v2966_v50  ;;  %v3053_v50 = vld [vmem:[%s3632_s29 + $0x564] ss:$8 sps:$4 sm:$0xff]   ;;  %v3066_v5 = vld [vmem:[%s3632_s29 + $0x190] ss:$8 sps:$4 sm:$0xff]  }
  0x8b   : > { %v3069_v6 = vld [vmem:[%s3632_s29 + $0x590] ss:$8 sps:$4 sm:$0xff]   ;;  %v3077_v8 = vld [vmem:[%s3632_s29 + $0x5a4] ss:$8 sps:$4 sm:$0xff]  }
  0x8c   : > { %1972 = vmatpush1.bf16.msra.mxu1 %v2968_v51  ;;  %v3048_v51 = vld [vmem:[%s3632_s29 + $0x160] ss:$8 sps:$4 sm:$0xff]  }
  0x8d   : > { %2144 = vmatpush1.bf16.msra.mxu0 %v2969_v52  ;;  %1973 = vmatprep.subr.bf16.mxu1 %v2970_v53  ;;  %v3051_v52 = vld [vmem:[%s3632_s29 + $0x560] ss:$8 sps:$4 sm:$0xff]  }
  0x8e   : > { %2145 = vmatprep.subr.bf16.mxu0 %v2972_v54  ;;  %v3750_v53 = vld [vmem:[%s3630_s26 + $0x8] sm:$0xff] }
  0x8f   : > { %v3753_v54 = vld [vmem:[%s3630_s26 + $0x48] sm:$0xff] }
  0x90   : > { %1974 = vmatpush1.bf16.msra.mxu1 %v2974_v55  ;;  %v3056_v55 = vld [vmem:[%s3632_s29 + $0x174] ss:$8 sps:$4 sm:$0xff]  }
  0x91   : > { %2146 = vmatpush1.bf16.msra.mxu0 %v2975_v56  ;;  %1975 = vmatprep.subr.bf16.mxu1 %v2976_v57  ;;  %v3059_v56 = vld [vmem:[%s3632_s29 + $0x574] ss:$8 sps:$4 sm:$0xff]   ;;  %v2508_v57 = vcombine.high %v3750_v53, %v3753_v54 }
  0x92   : > { %2147 = vmatprep.subr.bf16.mxu0 %v2978_v58  ;;  %v3760_v58 = vld [vmem:[%s3630_s26 + $0x28] sm:$0xff] }
  0x94   : > { %1976 = vmatpush1.bf16.msra.mxu1 %v2980_v59  ;;  %v3763_v59 = vld [vmem:[%s3630_s26 + $0x68] sm:$0xff] }
  0x95   : > { %2148 = vmatpush1.bf16.msra.mxu0 %v2981_v60  ;;  %1977 = vmatprep.subr.bf16.mxu1 %v2982_v61  ;;  %v2516_v60 = vcombine.high %v3760_v58, %v3763_v59  ;;  %v3054_v61 = vld [vmem:[%s3632_s29 + $0x170] ss:$8 sps:$4 sm:$0xff]  }
  0x96   : > { %2149 = vmatprep.subr.bf16.mxu0 %v2984_v62  ;;  %v3057_v62 = vld [vmem:[%s3632_s29 + $0x570] ss:$8 sps:$4 sm:$0xff]  }
  0x98   : > { %1978 = vmatpush1.bf16.msra.mxu1 %v2986_v63  ;;  %v3062_v63 = vld [vmem:[%s3632_s29 + $0x184] ss:$8 sps:$4 sm:$0xff]  }
  0x99   : > { %2150 = vmatpush1.bf16.msra.mxu0 %v2987_v0  ;;  %1979 = vmatprep.subr.bf16.mxu1 %v2988_v3  ;;  %v3065_v0 = vld [vmem:[%s3632_s29 + $0x584] ss:$8 sps:$4 sm:$0xff]   ;;  %v3068_v3 = vld [vmem:[%s3632_s29 + $0x194] ss:$8 sps:$4 sm:$0xff]  }
  0x9a   : > { %2151 = vmatprep.subr.bf16.mxu0 %v2990_v4  ;;  %v3071_v4 = vld [vmem:[%s3632_s29 + $0x594] ss:$8 sps:$4 sm:$0xff]  }
  0x9c   : > { %1980 = vmatpush1.bf16.msra.mxu1 %v2992_v9  ;;  %v3072_v9 = vld [vmem:[%s3632_s29 + $0x1a0] ss:$8 sps:$4 sm:$0xff]  }
  0x9d   : > { %2152 = vmatpush1.bf16.msra.mxu0 %v2993_v10  ;;  %1981 = vmatprep.subr.bf16.mxu1 %v2994_v11  ;;  %v3075_v10 = vld [vmem:[%s3632_s29 + $0x5a0] ss:$8 sps:$4 sm:$0xff]   ;;  %v3080_v11 = vld [vmem:[%s3632_s29 + $0x1b4] ss:$8 sps:$4 sm:$0xff]  }
  0x9e   : > { %2153 = vmatprep.subr.bf16.mxu0 %v2996_v12  ;;  %v3083_v12 = vld [vmem:[%s3632_s29 + $0x5b4] ss:$8 sps:$4 sm:$0xff]  }
  0xa0   : > { %1982 = vmatpush1.bf16.msra.mxu1 %v2998_v13  ;;  %v3078_v13 = vld [vmem:[%s3632_s29 + $0x1b0] ss:$8 sps:$4 sm:$0xff]  }
  0xa1   : > { %2154 = vmatpush1.bf16.msra.mxu0 %v2999_v14  ;;  %1983 = vmatprep.subr.bf16.mxu1 %v3000_v15  ;;  %v3081_v14 = vld [vmem:[%s3632_s29 + $0x5b0] ss:$8 sps:$4 sm:$0xff]   ;;  %v3086_v15 = vld [vmem:[%s3632_s29 + $0x1c4] ss:$8 sps:$4 sm:$0xff]  }
  0xa2   : > { %2155 = vmatprep.subr.bf16.mxu0 %v3002_v16  ;;  %v3089_v16 = vld [vmem:[%s3632_s29 + $0x5c4] ss:$8 sps:$4 sm:$0xff]  }
  0xa4   : > { %1984 = vmatpush1.bf16.msra.mxu1 %v3004_v17  ;;  %v3084_v17 = vld [vmem:[%s3632_s29 + $0x1c0] ss:$8 sps:$4 sm:$0xff]  }
  0xa5   : > { %2156 = vmatpush1.bf16.msra.mxu0 %v3005_v18  ;;  %1985 = vmatprep.subr.bf16.mxu1 %v3006_v19  ;;  %v3087_v18 = vld [vmem:[%s3632_s29 + $0x5c0] ss:$8 sps:$4 sm:$0xff]   ;;  %v3092_v19 = vld [vmem:[%s3632_s29 + $0x1d4] ss:$8 sps:$4 sm:$0xff]  }
  0xa6   : > { %2157 = vmatprep.subr.bf16.mxu0 %v3008_v20  ;;  %v3095_v20 = vld [vmem:[%s3632_s29 + $0x5d4] ss:$8 sps:$4 sm:$0xff]  }
  0xa8   : > { %1986 = vmatpush1.bf16.msra.mxu1 %v3010_v21  ;;  %v3090_v21 = vld [vmem:[%s3632_s29 + $0x1d0] ss:$8 sps:$4 sm:$0xff]  }
  0xa9   : > { %2158 = vmatpush1.bf16.msra.mxu0 %v3011_v22  ;;  %1998 = vmatprep.subr.bf16.mxu1 %v3014_v23  ;;  %v3093_v22 = vld [vmem:[%s3632_s29 + $0x5d0] ss:$8 sps:$4 sm:$0xff]   ;;  %v3098_v23 = vld [vmem:[%s3632_s29 + $0x1e4] ss:$8 sps:$4 sm:$0xff]  }
  0xaa   : > { %2170 = vmatprep.subr.bf16.mxu0 %v3017_v24  ;;  %v3101_v24 = vld [vmem:[%s3632_s29 + $0x5e4] ss:$8 sps:$4 sm:$0xff]  }
  0xab   : > { %1988 = vmatmul.mubr.bf16.vlgmr.msra.gmra.mrb[0].mxu1 %v2505_v25  ;;  %v3096_v25 = vld [vmem:[%s3632_s29 + $0x1e0] ss:$8 sps:$4 sm:$0xff]  }
  0xac   : > { %2160 = vmatmul.mubr.bf16.vlgmr.msra.gmra.mrb[0].mxu0 %v2513_v27  ;;  %1999 = vmatpush1.bf16.msra.mxu1 %v3012_v26  ;;  %v3099_v26 = vld [vmem:[%s3632_s29 + $0x5e0] ss:$8 sps:$4 sm:$0xff]   ;;  %v3104_v27 = vld [vmem:[%s3632_s29 + $0x1f4] ss:$8 sps:$4 sm:$0xff]  }
  0xad   : > { %2171 = vmatpush1.bf16.msra.mxu0 %v3015_v28  ;;  %2000 = vmatprep.subr.bf16.mxu1 %v3020_v29  ;;  %v3107_v28 = vld [vmem:[%s3632_s29 + $0x5f4] ss:$8 sps:$4 sm:$0xff]   ;;  %v3102_v29 = vld [vmem:[%s3632_s29 + $0x1f0] ss:$8 sps:$4 sm:$0xff]  }
  0xae   : > { %2172 = vmatprep.subr.bf16.mxu0 %v3023_v30  ;;  %2030 = vmatprep.mubr.bf16.mxu1 %v2508_v57  ;;  %v3105_v30 = vld [vmem:[%s3632_s29 + $0x5f0] ss:$8 sps:$4 sm:$0xff]   ;;  %v3132_v57 = vld [vmem:[%s3632_s29 + $0x240] ss:$8 sps:$4 sm:$0xff]  }
  0xaf   : > { %2202 = vmatprep.mubr.bf16.mxu0 %v2516_v60  ;;  %v3143_v60 = vld [vmem:[%s3632_s29 + $0x654] ss:$8 sps:$4 sm:$0xff]  }
  0xb0   : > { %2001 = vmatpush1.bf16.msra.mxu1 %v3018_v31  ;;  %v3110_v31 = vld [vmem:[%s3632_s29 + $0x204] ss:$8 sps:$4 sm:$0xff]  }
  0xb1   : > { %2173 = vmatpush1.bf16.msra.mxu0 %v3021_v32  ;;  %2002 = vmatprep.subr.bf16.mxu1 %v3026_v33  ;;  %v3113_v32 = vld [vmem:[%s3632_s29 + $0x604] ss:$8 sps:$4 sm:$0xff]   ;;  %v2507_v33 = vcombine.low %v3750_v53, %v3753_v54  ;;  %v3126_v53 = vld [vmem:[%s3632_s29 + $0x230] ss:$8 sps:$4 sm:$0xff]  }
  0xb2   : > { %2174 = vmatprep.subr.bf16.mxu0 %v3029_v34  ;;  %v3108_v34 = vld [vmem:[%s3632_s29 + $0x200] ss:$8 sps:$4 sm:$0xff]   ;;  %v3129_v54 = vld [vmem:[%s3632_s29 + $0x630] ss:$8 sps:$4 sm:$0xff]  }
  0xb4   : > { %2003 = vmatpush1.bf16.msra.mxu1 %v3024_v35  ;;  %v2515_v35 = vcombine.low %v3760_v58, %v3763_v59  ;;  %v3135_v58 = vld [vmem:[%s3632_s29 + $0x640] ss:$8 sps:$4 sm:$0xff]   ;;  %v3140_v59 = vld [vmem:[%s3632_s29 + $0x254] ss:$8 sps:$4 sm:$0xff]  }
  0xb5   : > { %2175 = vmatpush1.bf16.msra.mxu0 %v3027_v36  ;;  %2004 = vmatprep.subr.bf16.mxu1 %v3032_v37  ;;  %v3111_v36 = vld [vmem:[%s3632_s29 + $0x600] ss:$8 sps:$4 sm:$0xff]   ;;  %v3116_v37 = vld [vmem:[%s3632_s29 + $0x214] ss:$8 sps:$4 sm:$0xff]  }
  0xb6   : > { %2176 = vmatprep.subr.bf16.mxu0 %v3035_v38  ;;  %v3119_v38 = vld [vmem:[%s3632_s29 + $0x614] ss:$8 sps:$4 sm:$0xff]  }
  0xb8   : > { %2005 = vmatpush1.bf16.msra.mxu1 %v3030_v39  ;;  %v3114_v39 = vld [vmem:[%s3632_s29 + $0x210] ss:$8 sps:$4 sm:$0xff]  }
  0xb9   : > { %2177 = vmatpush1.bf16.msra.mxu0 %v3033_v40  ;;  %2006 = vmatprep.subr.bf16.mxu1 %v3038_v41  ;;  %v3117_v40 = vld [vmem:[%s3632_s29 + $0x610] ss:$8 sps:$4 sm:$0xff]  }
  0xba   : > { %2178 = vmatprep.subr.bf16.mxu0 %v3041_v42  ;;  %v3814_v41 = vld [vmem:[%s3630_s26 + $0x10] sm:$0xff] }
  0xbb   : > { %v3817_v42 = vld [vmem:[%s3630_s26 + $0x50] sm:$0xff] }
  0xbc   : > { %2007 = vmatpush1.bf16.msra.mxu1 %v3036_v43  ;;  %v3122_v43 = vld [vmem:[%s3632_s29 + $0x224] ss:$8 sps:$4 sm:$0xff]  }
  0xbd   : > { %2179 = vmatpush1.bf16.msra.mxu0 %v3039_v44  ;;  %2008 = vmatprep.subr.bf16.mxu1 %v3044_v45  ;;  %v3125_v44 = vld [vmem:[%s3632_s29 + $0x624] ss:$8 sps:$4 sm:$0xff]   ;;  %v2510_v45 = vcombine.high %v3814_v41, %v3817_v42 }
  0xbe   : > { %2180 = vmatprep.subr.bf16.mxu0 %v3047_v46  ;;  %v3824_v46 = vld [vmem:[%s3630_s26 + $0x30] sm:$0xff] }
  0xc0   : > { %2009 = vmatpush1.bf16.msra.mxu1 %v3042_v47  ;;  %v3827_v47 = vld [vmem:[%s3630_s26 + $0x70] sm:$0xff] }
  0xc1   : > { %2181 = vmatpush1.bf16.msra.mxu0 %v3045_v48  ;;  %2010 = vmatprep.subr.bf16.mxu1 %v3050_v49  ;;  %v2518_v48 = vcombine.high %v3824_v46, %v3827_v47  ;;  %v3120_v49 = vld [vmem:[%s3632_s29 + $0x220] ss:$8 sps:$4 sm:$0xff]  }
  0xc2   : > { %2182 = vmatprep.subr.bf16.mxu0 %v3053_v50  ;;  %v3123_v50 = vld [vmem:[%s3632_s29 + $0x620] ss:$8 sps:$4 sm:$0xff]  }
  0xc4   : > { %2011 = vmatpush1.bf16.msra.mxu1 %v3048_v51  ;;  %v3128_v51 = vld [vmem:[%s3632_s29 + $0x234] ss:$8 sps:$4 sm:$0xff]  }
  0xc5   : > { %2183 = vmatpush1.bf16.msra.mxu0 %v3051_v52  ;;  %2012 = vmatprep.subr.bf16.mxu1 %v3056_v55  ;;  %v3131_v52 = vld [vmem:[%s3632_s29 + $0x634] ss:$8 sps:$4 sm:$0xff]   ;;  %v3134_v55 = vld [vmem:[%s3632_s29 + $0x244] ss:$8 sps:$4 sm:$0xff]  }
  0xc6   : > { %2184 = vmatprep.subr.bf16.mxu0 %v3059_v56  ;;  %v3137_v56 = vld [vmem:[%s3632_s29 + $0x644] ss:$8 sps:$4 sm:$0xff]  }
  0xc8   : > { %2013 = vmatpush1.bf16.msra.mxu1 %v3054_v61  ;;  %v3138_v61 = vld [vmem:[%s3632_s29 + $0x250] ss:$8 sps:$4 sm:$0xff]  }
  0xc9   : > { %2185 = vmatpush1.bf16.msra.mxu0 %v3057_v62  ;;  %2014 = vmatprep.subr.bf16.mxu1 %v3062_v63  ;;  %v3141_v62 = vld [vmem:[%s3632_s29 + $0x650] ss:$8 sps:$4 sm:$0xff]   ;;  %v3146_v63 = vld [vmem:[%s3632_s29 + $0x264] ss:$8 sps:$4 sm:$0xff]  }
  0xca   : > { %2186 = vmatprep.subr.bf16.mxu0 %v3065_v0  ;;  %v3149_v0 = vld [vmem:[%s3632_s29 + $0x664] ss:$8 sps:$4 sm:$0xff]  }
  0xcc   : > { %2015 = vmatpush1.bf16.msra.mxu1 %v3060_v1  ;;  %v3144_v1 = vld [vmem:[%s3632_s29 + $0x260] ss:$8 sps:$4 sm:$0xff]  }
  0xcd   : > { %2187 = vmatpush1.bf16.msra.mxu0 %v3063_v2  ;;  %2016 = vmatprep.subr.bf16.mxu1 %v3068_v3  ;;  %v3147_v2 = vld [vmem:[%s3632_s29 + $0x660] ss:$8 sps:$4 sm:$0xff]   ;;  %v3152_v3 = vld [vmem:[%s3632_s29 + $0x274] ss:$8 sps:$4 sm:$0xff]  }
  0xce   : > { %2188 = vmatprep.subr.bf16.mxu0 %v3071_v4  ;;  %v3155_v4 = vld [vmem:[%s3632_s29 + $0x674] ss:$8 sps:$4 sm:$0xff]  }
  0xd0   : > { %2017 = vmatpush1.bf16.msra.mxu1 %v3066_v5  ;;  %v3150_v5 = vld [vmem:[%s3632_s29 + $0x270] ss:$8 sps:$4 sm:$0xff]  }
  0xd1   : > { %2189 = vmatpush1.bf16.msra.mxu0 %v3069_v6  ;;  %2018 = vmatprep.subr.bf16.mxu1 %v3074_v7  ;;  %v3153_v6 = vld [vmem:[%s3632_s29 + $0x670] ss:$8 sps:$4 sm:$0xff]   ;;  %v3158_v7 = vld [vmem:[%s3632_s29 + $0x284] ss:$8 sps:$4 sm:$0xff]  }
  0xd2   : > { %2190 = vmatprep.subr.bf16.mxu0 %v3077_v8  ;;  %v3161_v8 = vld [vmem:[%s3632_s29 + $0x684] ss:$8 sps:$4 sm:$0xff]  }
  0xd4   : > { %2019 = vmatpush1.bf16.msra.mxu1 %v3072_v9  ;;  %v3156_v9 = vld [vmem:[%s3632_s29 + $0x280] ss:$8 sps:$4 sm:$0xff]  }
  0xd5   : > { %2191 = vmatpush1.bf16.msra.mxu0 %v3075_v10  ;;  %2020 = vmatprep.subr.bf16.mxu1 %v3080_v11  ;;  %v3159_v10 = vld [vmem:[%s3632_s29 + $0x680] ss:$8 sps:$4 sm:$0xff]   ;;  %v3164_v11 = vld [vmem:[%s3632_s29 + $0x294] ss:$8 sps:$4 sm:$0xff]  }
  0xd6   : > { %2192 = vmatprep.subr.bf16.mxu0 %v3083_v12  ;;  %v3167_v12 = vld [vmem:[%s3632_s29 + $0x694] ss:$8 sps:$4 sm:$0xff]  }
  0xd8   : > { %2021 = vmatpush1.bf16.msra.mxu1 %v3078_v13  ;;  %v3162_v13 = vld [vmem:[%s3632_s29 + $0x290] ss:$8 sps:$4 sm:$0xff]  }
  0xd9   : > { %2193 = vmatpush1.bf16.msra.mxu0 %v3081_v14  ;;  %2022 = vmatprep.subr.bf16.mxu1 %v3086_v15  ;;  %v3165_v14 = vld [vmem:[%s3632_s29 + $0x690] ss:$8 sps:$4 sm:$0xff]   ;;  %v3170_v15 = vld [vmem:[%s3632_s29 + $0x2a4] ss:$8 sps:$4 sm:$0xff]  }
  0xda   : > { %2194 = vmatprep.subr.bf16.mxu0 %v3089_v16  ;;  %v3173_v16 = vld [vmem:[%s3632_s29 + $0x6a4] ss:$8 sps:$4 sm:$0xff]  }
  0xdc   : > { %2023 = vmatpush1.bf16.msra.mxu1 %v3084_v17  ;;  %v3168_v17 = vld [vmem:[%s3632_s29 + $0x2a0] ss:$8 sps:$4 sm:$0xff]  }
  0xdd   : > { %2195 = vmatpush1.bf16.msra.mxu0 %v3087_v18  ;;  %2024 = vmatprep.subr.bf16.mxu1 %v3092_v19  ;;  %v3171_v18 = vld [vmem:[%s3632_s29 + $0x6a0] ss:$8 sps:$4 sm:$0xff]   ;;  %v3176_v19 = vld [vmem:[%s3632_s29 + $0x2b4] ss:$8 sps:$4 sm:$0xff]  }
  0xde   : > { %2196 = vmatprep.subr.bf16.mxu0 %v3095_v20  ;;  %v3179_v20 = vld [vmem:[%s3632_s29 + $0x6b4] ss:$8 sps:$4 sm:$0xff]  }
  0xe0   : > { %2025 = vmatpush1.bf16.msra.mxu1 %v3090_v21  ;;  %v3174_v21 = vld [vmem:[%s3632_s29 + $0x2b0] ss:$8 sps:$4 sm:$0xff]  }
  0xe1   : > { %2197 = vmatpush1.bf16.msra.mxu0 %v3093_v22  ;;  %2026 = vmatprep.subr.bf16.mxu1 %v3098_v23  ;;  %v3177_v22 = vld [vmem:[%s3632_s29 + $0x6b0] ss:$8 sps:$4 sm:$0xff]   ;;  %v3182_v23 = vld [vmem:[%s3632_s29 + $0x2c4] ss:$8 sps:$4 sm:$0xff]  }
  0xe2   : > { %2198 = vmatprep.subr.bf16.mxu0 %v3101_v24  ;;  %v3185_v24 = vld [vmem:[%s3632_s29 + $0x6c4] ss:$8 sps:$4 sm:$0xff]  }
  0xe4   : > { %2027 = vmatpush1.bf16.msra.mxu1 %v3096_v25  ;;  %v3180_v25 = vld [vmem:[%s3632_s29 + $0x2c0] ss:$8 sps:$4 sm:$0xff]  }
  0xe5   : > { %2199 = vmatpush1.bf16.msra.mxu0 %v3099_v26  ;;  %2028 = vmatprep.subr.bf16.mxu1 %v3104_v27  ;;  %v3183_v26 = vld [vmem:[%s3632_s29 + $0x6c0] ss:$8 sps:$4 sm:$0xff]   ;;  %v3188_v27 = vld [vmem:[%s3632_s29 + $0x2d4] ss:$8 sps:$4 sm:$0xff]  }
  0xe6   : > { %2200 = vmatprep.subr.bf16.mxu0 %v3107_v28  ;;  %v3191_v28 = vld [vmem:[%s3632_s29 + $0x6d4] ss:$8 sps:$4 sm:$0xff]  }
  0xe8   : > { %2029 = vmatpush1.bf16.msra.mxu1 %v3102_v29  ;;  %v3186_v29 = vld [vmem:[%s3632_s29 + $0x2d0] ss:$8 sps:$4 sm:$0xff]  }
  0xe9   : > { %2201 = vmatpush1.bf16.msra.mxu0 %v3105_v30  ;;  %2041 = vmatprep.subr.bf16.mxu1 %v3110_v31  ;;  %v3189_v30 = vld [vmem:[%s3632_s29 + $0x6d0] ss:$8 sps:$4 sm:$0xff]   ;;  %v3194_v31 = vld [vmem:[%s3632_s29 + $0x2e4] ss:$8 sps:$4 sm:$0xff]  }
  0xea   : > { %2213 = vmatprep.subr.bf16.mxu0 %v3113_v32  ;;  %v3197_v32 = vld [vmem:[%s3632_s29 + $0x6e4] ss:$8 sps:$4 sm:$0xff]  }
  0xeb   : > { %2031 = vmatmul.mubr.bf16.vlgmr.msra.gmra.mrb[0].mxu1 %v2507_v33  ;;  %v3192_v33 = vld [vmem:[%s3632_s29 + $0x2e0] ss:$8 sps:$4 sm:$0xff]  }
  0xec   : > { %2203 = vmatmul.mubr.bf16.vlgmr.msra.gmra.mrb[0].mxu0 %v2515_v35  ;;  %2042 = vmatpush1.bf16.msra.mxu1 %v3108_v34  ;;  %v3195_v34 = vld [vmem:[%s3632_s29 + $0x6e0] ss:$8 sps:$4 sm:$0xff]   ;;  %v3200_v35 = vld [vmem:[%s3632_s29 + $0x2f4] ss:$8 sps:$4 sm:$0xff]  }
  0xed   : > { %2214 = vmatpush1.bf16.msra.mxu0 %v3111_v36  ;;  %2043 = vmatprep.subr.bf16.mxu1 %v3116_v37  ;;  %v3203_v36 = vld [vmem:[%s3632_s29 + $0x6f4] ss:$8 sps:$4 sm:$0xff]   ;;  %v3198_v37 = vld [vmem:[%s3632_s29 + $0x2f0] ss:$8 sps:$4 sm:$0xff]  }
  0xee   : > { %2215 = vmatprep.subr.bf16.mxu0 %v3119_v38  ;;  %2073 = vmatprep.mubr.bf16.mxu1 %v2510_v45  ;;  %v3201_v38 = vld [vmem:[%s3632_s29 + $0x6f0] ss:$8 sps:$4 sm:$0xff]   ;;  %v2517_v45 = vcombine.low %v3824_v46, %v3827_v47 }
  0xef   : > { %2245 = vmatprep.mubr.bf16.mxu0 %v2518_v48  ;;  %v3895_v48 = vld [vmem:[%s3630_s26 + $0x58] sm:$0xff] }
  0xf0   : > { %2044 = vmatpush1.bf16.msra.mxu1 %v3114_v39  ;;  %v3206_v39 = vld [vmem:[%s3632_s29 + $0x304] ss:$8 sps:$4 sm:$0xff]  }
  0xf1   : > { %2216 = vmatpush1.bf16.msra.mxu0 %v3117_v40  ;;  %2045 = vmatprep.subr.bf16.mxu1 %v3122_v43  ;;  %v3209_v40 = vld [vmem:[%s3632_s29 + $0x704] ss:$8 sps:$4 sm:$0xff]   ;;  %v3888_v43 = vld [vmem:[%s3630_s26 + $0x18] sm:$0xff] }
  0xf2   : > { %2217 = vmatprep.subr.bf16.mxu0 %v3125_v44  ;;  %v2509_v44 = vcombine.low %v3814_v41, %v3817_v42  ;;  %v3212_v41 = vld [vmem:[%s3632_s29 + $0x314] ss:$8 sps:$4 sm:$0xff]   ;;  %v2512_v46 = vcombine.high %v3888_v43, %v3895_v48 }
  0xf3   : > { %v3215_v42 = vld [vmem:[%s3632_s29 + $0x714] ss:$8 sps:$4 sm:$0xff]  }
  0xf4   : > { %2046 = vmatpush1.bf16.msra.mxu1 %v3120_v49  ;;  %v3898_v49 = vld [vmem:[%s3630_s26 + $0x38] sm:$0xff] }
  0xf5   : > { %2218 = vmatpush1.bf16.msra.mxu0 %v3123_v50  ;;  %2047 = vmatprep.subr.bf16.mxu1 %v3128_v51  ;;  %v3901_v50 = vld [vmem:[%s3630_s26 + $0x78] sm:$0xff]  ;;  %v3204_v51 = vld [vmem:[%s3632_s29 + $0x300] ss:$8 sps:$4 sm:$0xff]  }
  0xf6   : > { %2219 = vmatprep.subr.bf16.mxu0 %v3131_v52  ;;  %v3207_v52 = vld [vmem:[%s3632_s29 + $0x700] ss:$8 sps:$4 sm:$0xff]   ;;  %v2520_v47 = vcombine.high %v3898_v49, %v3901_v50 }
  0xf8   : > { %2048 = vmatpush1.bf16.msra.mxu1 %v3126_v53  ;;  %v3210_v53 = vld [vmem:[%s3632_s29 + $0x310] ss:$8 sps:$4 sm:$0xff]  }
  0xf9   : > { %2220 = vmatpush1.bf16.msra.mxu0 %v3129_v54  ;;  %2049 = vmatprep.subr.bf16.mxu1 %v3134_v55  ;;  %v3213_v54 = vld [vmem:[%s3632_s29 + $0x710] ss:$8 sps:$4 sm:$0xff]   ;;  %v3218_v55 = vld [vmem:[%s3632_s29 + $0x324] ss:$8 sps:$4 sm:$0xff]  }
  0xfa   : > { %2221 = vmatprep.subr.bf16.mxu0 %v3137_v56  ;;  %v3221_v56 = vld [vmem:[%s3632_s29 + $0x724] ss:$8 sps:$4 sm:$0xff]  }
  0xfc   : > { %2050 = vmatpush1.bf16.msra.mxu1 %v3132_v57  ;;  %v3216_v57 = vld [vmem:[%s3632_s29 + $0x320] ss:$8 sps:$4 sm:$0xff]  }
  0xfd   : > { %2222 = vmatpush1.bf16.msra.mxu0 %v3135_v58  ;;  %2051 = vmatprep.subr.bf16.mxu1 %v3140_v59  ;;  %v3219_v58 = vld [vmem:[%s3632_s29 + $0x720] ss:$8 sps:$4 sm:$0xff]   ;;  %v3224_v59 = vld [vmem:[%s3632_s29 + $0x334] ss:$8 sps:$4 sm:$0xff]  }
  0xfe   : > { %2223 = vmatprep.subr.bf16.mxu0 %v3143_v60  ;;  %v3227_v60 = vld [vmem:[%s3632_s29 + $0x734] ss:$8 sps:$4 sm:$0xff]  }
 0x100   : > { %2052 = vmatpush1.bf16.msra.mxu1 %v3138_v61  ;;  %v3222_v61 = vld [vmem:[%s3632_s29 + $0x330] ss:$8 sps:$4 sm:$0xff]  }
 0x101   : > { %2224 = vmatpush1.bf16.msra.mxu0 %v3141_v62  ;;  %2053 = vmatprep.subr.bf16.mxu1 %v3146_v63  ;;  %v3225_v62 = vld [vmem:[%s3632_s29 + $0x730] ss:$8 sps:$4 sm:$0xff]   ;;  %v3230_v63 = vld [vmem:[%s3632_s29 + $0x344] ss:$8 sps:$4 sm:$0xff]  }
 0x102   : > { %2225 = vmatprep.subr.bf16.mxu0 %v3149_v0  ;;  %v3233_v0 = vld [vmem:[%s3632_s29 + $0x744] ss:$8 sps:$4 sm:$0xff]  }
 0x104   : > { %2054 = vmatpush1.bf16.msra.mxu1 %v3144_v1  ;;  %v3228_v1 = vld [vmem:[%s3632_s29 + $0x340] ss:$8 sps:$4 sm:$0xff]  }
 0x105   : > { %2226 = vmatpush1.bf16.msra.mxu0 %v3147_v2  ;;  %2055 = vmatprep.subr.bf16.mxu1 %v3152_v3  ;;  %v3231_v2 = vld [vmem:[%s3632_s29 + $0x740] ss:$8 sps:$4 sm:$0xff]   ;;  %v3236_v3 = vld [vmem:[%s3632_s29 + $0x354] ss:$8 sps:$4 sm:$0xff]  }
 0x106   : > { %2227 = vmatprep.subr.bf16.mxu0 %v3155_v4  ;;  %v3239_v4 = vld [vmem:[%s3632_s29 + $0x754] ss:$8 sps:$4 sm:$0xff]  }
 0x108   : > { %2056 = vmatpush1.bf16.msra.mxu1 %v3150_v5  ;;  %v3234_v5 = vld [vmem:[%s3632_s29 + $0x350] ss:$8 sps:$4 sm:$0xff]  }
 0x109   : > { %2228 = vmatpush1.bf16.msra.mxu0 %v3153_v6  ;;  %2057 = vmatprep.subr.bf16.mxu1 %v3158_v7  ;;  %v3237_v6 = vld [vmem:[%s3632_s29 + $0x750] ss:$8 sps:$4 sm:$0xff]   ;;  %v3242_v7 = vld [vmem:[%s3632_s29 + $0x364] ss:$8 sps:$4 sm:$0xff]  }
 0x10a   : > { %2229 = vmatprep.subr.bf16.mxu0 %v3161_v8  ;;  %v3245_v8 = vld [vmem:[%s3632_s29 + $0x764] ss:$8 sps:$4 sm:$0xff]  }
 0x10c   : > { %2058 = vmatpush1.bf16.msra.mxu1 %v3156_v9  ;;  %v3240_v9 = vld [vmem:[%s3632_s29 + $0x360] ss:$8 sps:$4 sm:$0xff]  }
 0x10d   : > { %2230 = vmatpush1.bf16.msra.mxu0 %v3159_v10  ;;  %2059 = vmatprep.subr.bf16.mxu1 %v3164_v11  ;;  %v3243_v10 = vld [vmem:[%s3632_s29 + $0x760] ss:$8 sps:$4 sm:$0xff]   ;;  %v3248_v11 = vld [vmem:[%s3632_s29 + $0x374] ss:$8 sps:$4 sm:$0xff]  }
 0x10e   : > { %2231 = vmatprep.subr.bf16.mxu0 %v3167_v12  ;;  %v3251_v12 = vld [vmem:[%s3632_s29 + $0x774] ss:$8 sps:$4 sm:$0xff]  }
 0x110   : > { %2060 = vmatpush1.bf16.msra.mxu1 %v3162_v13  ;;  %v3246_v13 = vld [vmem:[%s3632_s29 + $0x370] ss:$8 sps:$4 sm:$0xff]  }
 0x111   : > { %2232 = vmatpush1.bf16.msra.mxu0 %v3165_v14  ;;  %2061 = vmatprep.subr.bf16.mxu1 %v3170_v15  ;;  %v3249_v14 = vld [vmem:[%s3632_s29 + $0x770] ss:$8 sps:$4 sm:$0xff]   ;;  %v3254_v15 = vld [vmem:[%s3632_s29 + $0x384] ss:$8 sps:$4 sm:$0xff]  }
 0x112   : > { %2233 = vmatprep.subr.bf16.mxu0 %v3173_v16  ;;  %v3257_v16 = vld [vmem:[%s3632_s29 + $0x784] ss:$8 sps:$4 sm:$0xff]  }
 0x114   : > { %2062 = vmatpush1.bf16.msra.mxu1 %v3168_v17  ;;  %v3252_v17 = vld [vmem:[%s3632_s29 + $0x380] ss:$8 sps:$4 sm:$0xff]  }
 0x115   : > { %2234 = vmatpush1.bf16.msra.mxu0 %v3171_v18  ;;  %2063 = vmatprep.subr.bf16.mxu1 %v3176_v19  ;;  %v3255_v18 = vld [vmem:[%s3632_s29 + $0x780] ss:$8 sps:$4 sm:$0xff]   ;;  %v3260_v19 = vld [vmem:[%s3632_s29 + $0x394] ss:$8 sps:$4 sm:$0xff]  }
 0x116   : > { %2235 = vmatprep.subr.bf16.mxu0 %v3179_v20  ;;  %v3263_v20 = vld [vmem:[%s3632_s29 + $0x794] ss:$8 sps:$4 sm:$0xff]  }
 0x118   : > { %2064 = vmatpush1.bf16.msra.mxu1 %v3174_v21  ;;  %v3258_v21 = vld [vmem:[%s3632_s29 + $0x390] ss:$8 sps:$4 sm:$0xff]  }
 0x119   : > { %2236 = vmatpush1.bf16.msra.mxu0 %v3177_v22  ;;  %2065 = vmatprep.subr.bf16.mxu1 %v3182_v23  ;;  %v3261_v22 = vld [vmem:[%s3632_s29 + $0x790] ss:$8 sps:$4 sm:$0xff]   ;;  %v3266_v23 = vld [vmem:[%s3632_s29 + $0x3a4] ss:$8 sps:$4 sm:$0xff]  }
 0x11a   : > { %2237 = vmatprep.subr.bf16.mxu0 %v3185_v24  ;;  %v3269_v24 = vld [vmem:[%s3632_s29 + $0x7a4] ss:$8 sps:$4 sm:$0xff]  }
 0x11c   : > { %2066 = vmatpush1.bf16.msra.mxu1 %v3180_v25  ;;  %v3264_v25 = vld [vmem:[%s3632_s29 + $0x3a0] ss:$8 sps:$4 sm:$0xff]  }
 0x11d   : > { %2238 = vmatpush1.bf16.msra.mxu0 %v3183_v26  ;;  %2067 = vmatprep.subr.bf16.mxu1 %v3188_v27  ;;  %v3267_v26 = vld [vmem:[%s3632_s29 + $0x7a0] ss:$8 sps:$4 sm:$0xff]   ;;  %v3272_v27 = vld [vmem:[%s3632_s29 + $0x3b4] ss:$8 sps:$4 sm:$0xff]  }
 0x11e   : > { %2239 = vmatprep.subr.bf16.mxu0 %v3191_v28  ;;  %v3275_v28 = vld [vmem:[%s3632_s29 + $0x7b4] ss:$8 sps:$4 sm:$0xff]  }
 0x120   : > { %2068 = vmatpush1.bf16.msra.mxu1 %v3186_v29  ;;  %v3270_v29 = vld [vmem:[%s3632_s29 + $0x3b0] ss:$8 sps:$4 sm:$0xff]  }
 0x121   : > { %2240 = vmatpush1.bf16.msra.mxu0 %v3189_v30  ;;  %2069 = vmatprep.subr.bf16.mxu1 %v3194_v31  ;;  %v3273_v30 = vld [vmem:[%s3632_s29 + $0x7b0] ss:$8 sps:$4 sm:$0xff]   ;;  %v3278_v31 = vld [vmem:[%s3632_s29 + $0x3c4] ss:$8 sps:$4 sm:$0xff]  }
 0x122   : > { %2241 = vmatprep.subr.bf16.mxu0 %v3197_v32  ;;  %v3281_v32 = vld [vmem:[%s3632_s29 + $0x7c4] ss:$8 sps:$4 sm:$0xff]  }
 0x124   : > { %2070 = vmatpush1.bf16.msra.mxu1 %v3192_v33  ;;  %v3276_v33 = vld [vmem:[%s3632_s29 + $0x3c0] ss:$8 sps:$4 sm:$0xff]  }
 0x125   : > { %2242 = vmatpush1.bf16.msra.mxu0 %v3195_v34  ;;  %2071 = vmatprep.subr.bf16.mxu1 %v3200_v35  ;;  %v3279_v34 = vld [vmem:[%s3632_s29 + $0x7c0] ss:$8 sps:$4 sm:$0xff]   ;;  %v3284_v35 = vld [vmem:[%s3632_s29 + $0x3d4] ss:$8 sps:$4 sm:$0xff]  }
 0x126   : > { %2243 = vmatprep.subr.bf16.mxu0 %v3203_v36  ;;  %v3287_v36 = vld [vmem:[%s3632_s29 + $0x7d4] ss:$8 sps:$4 sm:$0xff]  }
 0x128   : > { %2072 = vmatpush1.bf16.msra.mxu1 %v3198_v37  ;;  %v3282_v37 = vld [vmem:[%s3632_s29 + $0x3d0] ss:$8 sps:$4 sm:$0xff]  }
 0x129   : > { %2244 = vmatpush1.bf16.msra.mxu0 %v3201_v38  ;;  %2084 = vmatprep.subr.bf16.mxu1 %v3206_v39  ;;  %v3285_v38 = vld [vmem:[%s3632_s29 + $0x7d0] ss:$8 sps:$4 sm:$0xff]   ;;  %v3290_v39 = vld [vmem:[%s3632_s29 + $0x3e4] ss:$8 sps:$4 sm:$0xff]  }
 0x12a   : > { %2256 = vmatprep.subr.bf16.mxu0 %v3209_v40  ;;  %v3293_v40 = vld [vmem:[%s3632_s29 + $0x7e4] ss:$8 sps:$4 sm:$0xff]  }
 0x12b   : > { %2074 = vmatmul.mubr.bf16.vlgmr.msra.gmra.mrb[0].mxu1 %v2509_v44  ;;  %v3288_v44 = vld [vmem:[%s3632_s29 + $0x3e0] ss:$8 sps:$4 sm:$0xff]  }
 0x12c   : > { %2246 = vmatmul.mubr.bf16.vlgmr.msra.gmra.mrb[0].mxu0 %v2517_v45  ;;  %2085 = vmatpush1.bf16.msra.mxu1 %v3204_v51  ;;  %v3291_v45 = vld [vmem:[%s3632_s29 + $0x7e0] ss:$8 sps:$4 sm:$0xff]   ;;  %v3296_v51 = vld [vmem:[%s3632_s29 + $0x3f4] ss:$8 sps:$4 sm:$0xff]  }
 0x12d   : > { %2257 = vmatpush1.bf16.msra.mxu0 %v3207_v52  ;;  %2086 = vmatprep.subr.bf16.mxu1 %v3212_v41  ;;  %v3299_v52 = vld [vmem:[%s3632_s29 + $0x7f4] ss:$8 sps:$4 sm:$0xff]   ;;  %v3294_v41 = vld [vmem:[%s3632_s29 + $0x3f0] ss:$8 sps:$4 sm:$0xff]  }
 0x12e   : > { %2258 = vmatprep.subr.bf16.mxu0 %v3215_v42  ;;  %2116 = vmatprep.mubr.bf16.mxu1 %v2512_v46  ;;  %v3297_v42 = vld [vmem:[%s3632_s29 + $0x7f0] ss:$8 sps:$4 sm:$0xff]   ;;  %v2511_v46 = vcombine.low %v3888_v43, %v3895_v48 }
 0x12f   : > { %2288 = vmatprep.mubr.bf16.mxu0 %v2520_v47  ;;  %v2519_v47 = vcombine.low %v3898_v49, %v3901_v50  ;;  %v321_v48 = vld [vmem:[%s3646_s27 + $0x10] sm:$0xff] }
 0x130   : > { %2087 = vmatpush1.bf16.msra.mxu1 %v3210_v53 }
 0x131   : > { %2259 = vmatpush1.bf16.msra.mxu0 %v3213_v54  ;;  %2088 = vmatprep.subr.bf16.mxu1 %v3218_v55  ;;  %v319_v54 = vld [vmem:[%s3646_s27] sm:$0xff] }
 0x132   : > { %2260 = vmatprep.subr.bf16.mxu0 %v3221_v56 }
 0x134   : > { %2089 = vmatpush1.bf16.msra.mxu1 %v3216_v57 }
 0x135   : > { %2261 = vmatpush1.bf16.msra.mxu0 %v3219_v58  ;;  %2090 = vmatprep.subr.bf16.mxu1 %v3224_v59  ;;  %v320_v58 = vld [vmem:[%s3646_s27 + $0x8] sm:$0xff] }
 0x136   : > { %2262 = vmatprep.subr.bf16.mxu0 %v3227_v60 }
 0x138   : > { %2091 = vmatpush1.bf16.msra.mxu1 %v3222_v61 }
 0x139   : > { %2263 = vmatpush1.bf16.msra.mxu0 %v3225_v62  ;;  %2092 = vmatprep.subr.bf16.mxu1 %v3230_v63  ;;  %v322_v63 = vld [vmem:[%s3646_s27 + $0x18] sm:$0xff] }
 0x13a   : > { %2264 = vmatprep.subr.bf16.mxu0 %v3233_v0 }
 0x13c   : > { %2093 = vmatpush1.bf16.msra.mxu1 %v3228_v1 }
 0x13d   : > { %2265 = vmatpush1.bf16.msra.mxu0 %v3231_v2  ;;  %2094 = vmatprep.subr.bf16.mxu1 %v3236_v3 }
 0x13e   : > { %2266 = vmatprep.subr.bf16.mxu0 %v3239_v4 }
 0x140   : > { %2095 = vmatpush1.bf16.msra.mxu1 %v3234_v5  ;;  %v2317_v5 = vlaneseq (!%p2777_p12) }
 0x141   : > { %2267 = vmatpush1.bf16.msra.mxu0 %v3237_v6  ;;  %2096 = vmatprep.subr.bf16.mxu1 %v3242_v7  ;;  %v2315_v7 = vld [vmem:[%s307_s22] sm:$0x3] (!%p2777_p12) }
 0x142   : > { %2268 = vmatprep.subr.bf16.mxu0 %v3245_v8  ;;  %v2318_v6 = vshrl.u32 (!%p2777_p12), %v2317_v5, 7 }
 0x144   : > { %2097 = vmatpush1.bf16.msra.mxu1 %v3240_v9  ;;  %v2319_v9 = vsub.s32 (!%p2777_p12), 0, %v2318_v6 }
 0x145   : > { %2269 = vmatpush1.bf16.msra.mxu0 %v3243_v10  ;;  %2098 = vmatprep.subr.bf16.mxu1 %v3248_v11  ;;  %v2323_v10 = vsub.s32 (!%p2777_p12), 1, %v2318_v6 }
 0x146   : > { %2270 = vmatprep.subr.bf16.mxu0 %v3251_v12 }
 0x148   : > { %2099 = vmatpush1.bf16.msra.mxu1 %v3246_v13 }
 0x149   : > { %2271 = vmatpush1.bf16.msra.mxu0 %v3249_v14  ;;  %2100 = vmatprep.subr.bf16.mxu1 %v3254_v15  ;;  %v2320_v14 = vrot.slane (!%p2777_p12), %v2315_v7, %v2319_v9  ;;  %v2324_v15 = vrot.slane (!%p2777_p12), %v2315_v7, %v2323_v10 }
 0x14a   : > { %2272 = vmatprep.subr.bf16.mxu0 %v3257_v16 }
 0x14c   : > { %2101 = vmatpush1.bf16.msra.mxu1 %v3252_v17 }
 0x14d   : > { %2273 = vmatpush1.bf16.msra.mxu0 %v3255_v18  ;;  %2102 = vmatprep.subr.bf16.mxu1 %v3260_v19 }
 0x14e   : > { %2274 = vmatprep.subr.bf16.mxu0 %v3263_v20 }
 0x150   : > { %2103 = vmatpush1.bf16.msra.mxu1 %v3258_v21 }
 0x151   : > { %2275 = vmatpush1.bf16.msra.mxu0 %v3261_v22  ;;  %2104 = vmatprep.subr.bf16.mxu1 %v3266_v23 }
 0x152   : > { %2276 = vmatprep.subr.bf16.mxu0 %v3269_v24 }
 0x154   : > { %2105 = vmatpush1.bf16.msra.mxu1 %v3264_v25 }
 0x155   : > { %2277 = vmatpush1.bf16.msra.mxu0 %v3267_v26  ;;  %2106 = vmatprep.subr.bf16.mxu1 %v3272_v27 }
 0x156   : > { %2278 = vmatprep.subr.bf16.mxu0 %v3275_v28 }
 0x158   : > { %2107 = vmatpush1.bf16.msra.mxu1 %v3270_v29 }
 0x159   : > { %2279 = vmatpush1.bf16.msra.mxu0 %v3273_v30  ;;  %2108 = vmatprep.subr.bf16.mxu1 %v3278_v31 }
 0x15a   : > { %2280 = vmatprep.subr.bf16.mxu0 %v3281_v32 }
 0x15c   : > { %2109 = vmatpush1.bf16.msra.mxu1 %v3276_v33 }
 0x15d   : > { %2281 = vmatpush1.bf16.msra.mxu0 %v3279_v34  ;;  %2110 = vmatprep.subr.bf16.mxu1 %v3284_v35 }
 0x15e   : > { %2282 = vmatprep.subr.bf16.mxu0 %v3287_v36 }
 0x160   : > { %2111 = vmatpush1.bf16.msra.mxu1 %v3282_v37 }
 0x161   : > { %2283 = vmatpush1.bf16.msra.mxu0 %v3285_v38  ;;  %2112 = vmatprep.subr.bf16.mxu1 %v3290_v39 }
 0x162   : > { %2284 = vmatprep.subr.bf16.mxu0 %v3293_v40 }
 0x164   : > { %2113 = vmatpush1.bf16.msra.mxu1 %v3288_v44 }
 0x165   : > { %2285 = vmatpush1.bf16.msra.mxu0 %v3291_v45  ;;  %2114 = vmatprep.subr.bf16.mxu1 %v3296_v51 }
 0x166   : > { %2286 = vmatprep.subr.bf16.mxu0 %v3299_v52 }
 0x168   : > { %2115 = vmatpush1.bf16.msra.mxu1 %v3294_v41 }
 0x169   : > { %2287 = vmatpush1.bf16.msra.mxu0 %v3297_v42 }
 0x16b   : > { %2117 = vmatmul.mubr.bf16.vlgmr.msra.gmra.mrb[0].mxu1 %v2511_v46 }
 0x16c   : > { %2289 = vmatmul.mubr.bf16.vlgmr.msra.gmra.mrb[0].mxu0 %v2519_v47 }
 0x23e   : > { %v2118_v53 = vpop.f32.mrb[0].mxu1 }
 0x23f   : > { %v2290_v55 = vpop.f32.mrb[0].mxu0  ;;  %v2120_v57 = vpop.f32.mrb[1].mxu1 }
 0x240   : > { %v2786_v56 = vadd.f32 %v2290_v55, %v2118_v53  ;;  %v2292_v59 = vpop.f32.mrb[1].mxu0  ;;  %v2122_v43 = vpop.f32.mrb[2].mxu1 }
 0x241   : > { %v2787_v60 = vadd.f32 %v2292_v59, %v2120_v57  ;;  %v2294_v49 = vpop.f32.mrb[2].mxu0  ;;  %v2124_v62 = vpop.f32.mrb[3].mxu1  ;;  %2310 = sbr.rel (%p2777_p12) target bundleno = 596 (0x254), region = 67 }
 0x242   : > { %v2299_v50 = vadd.f32 %v2786_v56, %v319_v54  ;;  %v2788_v61 = vadd.f32 %v2294_v49, %v2122_v43  ;;  %v2296_v0 = vpop.f32.mrb[3].mxu0 }
 0x243   : > { %v2300_v1 = vadd.f32 %v2787_v60, %v320_v58  ;;  %v2789_v2 = vadd.f32 %v2296_v0, %v2124_v62 }
 0x244   : > { %2303 = vst [vmem:[%s3646_s27] sm:$0xff] %v2299_v50  ;;  %v2301_v3 = vadd.f32 %v2788_v61, %v321_v48 }
 0x245   : > { %2304 = vst [vmem:[%s3646_s27 + $0x8] sm:$0xff] %v2300_v1  ;;  %v2302_v4 = vadd.f32 %v2789_v2, %v322_v63 }
 0x246   : > { %2305 = vst [vmem:[%s3646_s27 + $0x10] sm:$0xff] %v2301_v3 }
 0x247   : > { %2306 = vst [vmem:[%s3646_s27 + $0x18] sm:$0xff] %v2302_v4 }
 0x24b   : > { %v2311_v8 = vld [vmem:[%s3646_s27] sm:$0xff] }
 0x24c   : > { %v2312_v11 = vld [vmem:[%s3646_s27 + $0x8] sm:$0xff]  ;;  %v2327_v16 = vadd.f32 %v2320_v14, %v2311_v8 }
 0x24d   : > { %v2313_v12 = vld [vmem:[%s3646_s27 + $0x10] sm:$0xff]  ;;  %v2328_v17 = vadd.f32 %v2324_v15, %v2312_v11 }
 0x24e   : > { %v2314_v13 = vld [vmem:[%s3646_s27 + $0x18] sm:$0xff]  ;;  %v2329_v18 = vadd.f32 %v2320_v14, %v2313_v12  ;;  %v2331_v20 = vmax.f32 %v2327_v16, 0.0 }
 0x24f   : > { %v2330_v19 = vadd.f32 %v2324_v15, %v2314_v13  ;;  %v2332_v21 = vmax.f32 %v2328_v17, 0.0 }
 0x250   : > { %v2333_v22 = vmax.f32 %v2329_v18, 0.0  ;;  %2335 = vst [vmem:[%s3646_s27] sm:$0xff] %v2331_v20 }
 0x251   : > { %v2334_v23 = vmax.f32 %v2330_v19, 0.0  ;;  %2336 = vst [vmem:[%s3646_s27 + $0x8] sm:$0xff] %v2332_v21 }
 0x252   : > { %2337 = vst [vmem:[%s3646_s27 + $0x10] sm:$0xff] %v2333_v22 }
 0x253   : > { %2338 = vst [vmem:[%s3646_s27 + $0x18] sm:$0xff] %v2334_v23 }
 0x254 PF: > { %p4058_p11 = scmp.ne.s32.totalorder %s4056_s14, 0 }
 0x255   : > { %s2785_s19 = sshll.u32 (%p4058_p11), %s3414_s20, 4 }
 0x256   : > { %2345 = sbr.rel (!%p4058_p11) target bundleno = 605 (0x25d), region = 71  ;;  %s2351_s5 = scalar_lea.vmem (%p4058_p11), %s4044_s3, %s2785_s19 }
 0x257   : > { %v2364_v24 = vld [vmem:[%s3646_s27] sm:$0xff] (%p4058_p11) }
 0x258   : > { %v2366_v25 = vld [vmem:[%s3646_s27 + $0x8] sm:$0xff] (%p4058_p11)  ;;  %2365 = vst [vmem:[%s2351_s5] sm:$0xff] (%p4058_p11), %v2364_v24 }
 0x259   : > { %v2368_v26 = vld [vmem:[%s3646_s27 + $0x10] sm:$0xff] (%p4058_p11)  ;;  %2367 = vst [vmem:[%s2351_s5 + $0x8] sm:$0xff] (%p4058_p11), %v2366_v25 }
 0x25a   : > { %v2370_v27 = vld [vmem:[%s3646_s27 + $0x18] sm:$0xff] (%p4058_p11)  ;;  %2369 = vst [vmem:[%s2351_s5 + $0x20] sm:$0xff] (%p4058_p11), %v2368_v26 }
 0x25b   : > { %2371 = vst [vmem:[%s2351_s5 + $0x28] sm:$0xff] (%p4058_p11), %v2370_v27 }
 0x25d PF: > { %s16_s23 = sadd.s32 1, %s3426_s23   ;;  %s4059_s20 = sld [smem:[#allocation10_spill]] }
 0x25e   : > { %p13_p13 = scmp.ge.s32.totalorder %s16_s23, 100   ;;  %s4060_s6 = sld [smem:[#allocation7_spill]] }
 0x25f   : > { %s4061_s25 = sld [smem:[#allocation8_spill]]  ;;  %s4062_s22 = sld [smem:[#allocation9_spill]] }
 0x260   : > { %s4063_s12 = smov %s3386_s13  ;;  %s4064_s13 = smov %s3556_s11 }
 0x261   : > { %s4065_s14 = smov %s3394_s15  ;;  %s4066_s15 = smov %s3398_s16 }
 0x262   : > { %s4067_s16 = smov %s3548_s8  ;;  %s4068_s17 = smov %s3406_s18 }
 0x263   : > { %s4069_s18 = smov %s4059_s20  ;;  %s4070_s19 = smov %s3418_s21 }
 0x264   : > { %s4071_s20 = smov %s4060_s6  ;;  %15 = sbr.rel (!%p13_p13) target bundleno = 9 (0x9), region = 137 }
 0x265   : > { %s4072_s21 = smov %s4061_s25 }
 0x26b   :  { %2387 = vsyncpa [#allocation4], 1 }
 0x26c   :  { %2389 = vsyncpa [#allocation4 + $0x1], 1 }

// kernel: custom_cnn1_forward.8
= control target key start
LH: loop header
LB: loop body
LE: loop exit
PB: predicated region body
PF: predicated region fallthrough
CT: control target
= control target key end

     0   :  { %s949_s1 = inlined_call_operand.vmem [shape: bf16[512,256], index: 1, kind: input, shape index: {}]   ;;  %s950_s0 = inlined_call_operand.vmem [shape: bf16[16,512], index: 0, kind: input, shape index: {}]   ;;  %s951_s2 = inlined_call_operand.vmem [shape: f32[1,256], index: 2, kind: input, shape index: {}]   ;;  %s952_s3 = inlined_call_operand.vmem [shape: f32[16,256], index: 3, kind: output, shape index: {}]  }
   0x1   :  { %v608_v0 = vld [vmem:[%s949_s1 + $0x4] ss:$8 sps:$4 sm:$0xff]   ;;  %v612_v2 = vld [vmem:[%s949_s1] ss:$8 sps:$4 sm:$0xff]   ;;  %v614_v4 = vld [vmem:[%s949_s1 + $0x14] ss:$8 sps:$4 sm:$0xff]  }
   0x2   :  { %v610_v1 = vld [vmem:[%s949_s1 + $0x104] ss:$8 sps:$4 sm:$0xff]   ;;  %434 = vmatprep.subr.bf16.mxu1 %v608_v0  ;;  %v613_v3 = vld [vmem:[%s949_s1 + $0x100] ss:$8 sps:$4 sm:$0xff]   ;;  %v616_v5 = vld [vmem:[%s949_s1 + $0x114] ss:$8 sps:$4 sm:$0xff]  }
   0x3   :  { %477 = vmatprep.subr.bf16.mxu0 %v610_v1  ;;  %435 = vmatpush1.bf16.msra.mxu1 %v612_v2  ;;  %v618_v6 = vld [vmem:[%s949_s1 + $0x10] ss:$8 sps:$4 sm:$0xff]   ;;  %v620_v8 = vld [vmem:[%s949_s1 + $0x24] ss:$8 sps:$4 sm:$0xff]   ;;  %v624_v10 = vld [vmem:[%s949_s1 + $0x20] ss:$8 sps:$4 sm:$0xff]  }
   0x4   :  { %478 = vmatpush1.bf16.msra.mxu0 %v613_v3  ;;  %436 = vmatprep.subr.bf16.mxu1 %v614_v4  ;;  %v619_v7 = vld [vmem:[%s949_s1 + $0x110] ss:$8 sps:$4 sm:$0xff]   ;;  %v622_v9 = vld [vmem:[%s949_s1 + $0x124] ss:$8 sps:$4 sm:$0xff]   ;;  %v625_v11 = vld [vmem:[%s949_s1 + $0x120] ss:$8 sps:$4 sm:$0xff]   ;;  %v84_v4 = vlaneseq }
   0x5   :  { %479 = vmatprep.subr.bf16.mxu0 %v616_v5  ;;  %v626_v12 = vld [vmem:[%s949_s1 + $0x34] ss:$8 sps:$4 sm:$0xff]   ;;  %v630_v14 = vld [vmem:[%s949_s1 + $0x30] ss:$8 sps:$4 sm:$0xff]   ;;  %v632_v16 = vld [vmem:[%s949_s1 + $0x44] ss:$8 sps:$4 sm:$0xff]  }
   0x6   :  { %v628_v13 = vld [vmem:[%s949_s1 + $0x134] ss:$8 sps:$4 sm:$0xff]   ;;  %v631_v15 = vld [vmem:[%s949_s1 + $0x130] ss:$8 sps:$4 sm:$0xff]   ;;  %v634_v17 = vld [vmem:[%s949_s1 + $0x144] ss:$8 sps:$4 sm:$0xff]  }
   0x7   :  { %437 = vmatpush1.bf16.msra.mxu1 %v618_v6  ;;  %v636_v18 = vld [vmem:[%s949_s1 + $0x40] ss:$8 sps:$4 sm:$0xff]   ;;  %v638_v20 = vld [vmem:[%s949_s1 + $0x54] ss:$8 sps:$4 sm:$0xff]   ;;  %v642_v22 = vld [vmem:[%s949_s1 + $0x50] ss:$8 sps:$4 sm:$0xff]  }
   0x8   :  { %480 = vmatpush1.bf16.msra.mxu0 %v619_v7  ;;  %438 = vmatprep.subr.bf16.mxu1 %v620_v8  ;;  %v637_v19 = vld [vmem:[%s949_s1 + $0x140] ss:$8 sps:$4 sm:$0xff]   ;;  %v640_v21 = vld [vmem:[%s949_s1 + $0x154] ss:$8 sps:$4 sm:$0xff]   ;;  %v643_v23 = vld [vmem:[%s949_s1 + $0x150] ss:$8 sps:$4 sm:$0xff]  }
   0x9   :  { %481 = vmatprep.subr.bf16.mxu0 %v622_v9  ;;  %v644_v24 = vld [vmem:[%s949_s1 + $0x64] ss:$8 sps:$4 sm:$0xff]   ;;  %v648_v26 = vld [vmem:[%s949_s1 + $0x60] ss:$8 sps:$4 sm:$0xff]   ;;  %v650_v28 = vld [vmem:[%s949_s1 + $0x74] ss:$8 sps:$4 sm:$0xff]  }
   0xa   :  { %v646_v25 = vld [vmem:[%s949_s1 + $0x164] ss:$8 sps:$4 sm:$0xff]   ;;  %v649_v27 = vld [vmem:[%s949_s1 + $0x160] ss:$8 sps:$4 sm:$0xff]   ;;  %v652_v29 = vld [vmem:[%s949_s1 + $0x174] ss:$8 sps:$4 sm:$0xff]  }
   0xb   :  { %439 = vmatpush1.bf16.msra.mxu1 %v624_v10  ;;  %v654_v30 = vld [vmem:[%s949_s1 + $0x70] ss:$8 sps:$4 sm:$0xff]   ;;  %v656_v32 = vld [vmem:[%s949_s1 + $0x84] ss:$8 sps:$4 sm:$0xff]   ;;  %v660_v34 = vld [vmem:[%s949_s1 + $0x80] ss:$8 sps:$4 sm:$0xff]  }
   0xc   :  { %482 = vmatpush1.bf16.msra.mxu0 %v625_v11  ;;  %440 = vmatprep.subr.bf16.mxu1 %v626_v12  ;;  %v655_v31 = vld [vmem:[%s949_s1 + $0x170] ss:$8 sps:$4 sm:$0xff]   ;;  %v658_v33 = vld [vmem:[%s949_s1 + $0x184] ss:$8 sps:$4 sm:$0xff]   ;;  %v661_v35 = vld [vmem:[%s949_s1 + $0x180] ss:$8 sps:$4 sm:$0xff]  }
   0xd   :  { %483 = vmatprep.subr.bf16.mxu0 %v628_v13  ;;  %v662_v36 = vld [vmem:[%s949_s1 + $0x94] ss:$8 sps:$4 sm:$0xff]   ;;  %v666_v38 = vld [vmem:[%s949_s1 + $0x90] ss:$8 sps:$4 sm:$0xff]   ;;  %v668_v40 = vld [vmem:[%s949_s1 + $0xa4] ss:$8 sps:$4 sm:$0xff]  }
   0xe   :  { %v664_v37 = vld [vmem:[%s949_s1 + $0x194] ss:$8 sps:$4 sm:$0xff]   ;;  %v667_v39 = vld [vmem:[%s949_s1 + $0x190] ss:$8 sps:$4 sm:$0xff]   ;;  %v670_v41 = vld [vmem:[%s949_s1 + $0x1a4] ss:$8 sps:$4 sm:$0xff]  }
   0xf   :  { %441 = vmatpush1.bf16.msra.mxu1 %v630_v14  ;;  %v672_v42 = vld [vmem:[%s949_s1 + $0xa0] ss:$8 sps:$4 sm:$0xff]   ;;  %v674_v44 = vld [vmem:[%s949_s1 + $0xb4] ss:$8 sps:$4 sm:$0xff]   ;;  %v678_v46 = vld [vmem:[%s949_s1 + $0xb0] ss:$8 sps:$4 sm:$0xff]  }
  0x10   :  { %484 = vmatpush1.bf16.msra.mxu0 %v631_v15  ;;  %442 = vmatprep.subr.bf16.mxu1 %v632_v16  ;;  %v673_v43 = vld [vmem:[%s949_s1 + $0x1a0] ss:$8 sps:$4 sm:$0xff]   ;;  %v676_v45 = vld [vmem:[%s949_s1 + $0x1b4] ss:$8 sps:$4 sm:$0xff]   ;;  %v679_v48 = vld [vmem:[%s949_s1 + $0x1b0] ss:$8 sps:$4 sm:$0xff]  }
  0x11   :  { %485 = vmatprep.subr.bf16.mxu0 %v634_v17  ;;  %v706_v47 = vld [vmem:[%s950_s0 + $0x4] ss:$16 sps:$4 sm:$0xff]   ;;  %v709_v51 = vld [vmem:[%s950_s0 + $0xc] ss:$16 sps:$4 sm:$0xff]   ;;  %v684_v52 = vld [vmem:[%s949_s1 + $0xc0] ss:$8 sps:$4 sm:$0xff]  }
  0x12   :  { %v680_v49 = vld [vmem:[%s949_s1 + $0xc4] ss:$8 sps:$4 sm:$0xff]   ;;  %466 = vmatprep.mubr.bf16.mxu1 %v706_v47  ;;  %509 = vmatprep.mubr.bf16.mxu0 %v709_v51  ;;  %v685_v53 = vld [vmem:[%s949_s1 + $0x1c0] ss:$8 sps:$4 sm:$0xff]   ;;  %v686_v54 = vld [vmem:[%s949_s1 + $0xd4] ss:$8 sps:$4 sm:$0xff]  }
  0x13   :  { %443 = vmatpush1.bf16.msra.mxu1 %v636_v18  ;;  %v682_v50 = vld [vmem:[%s949_s1 + $0x1c4] ss:$8 sps:$4 sm:$0xff]   ;;  %v688_v55 = vld [vmem:[%s949_s1 + $0x1d4] ss:$8 sps:$4 sm:$0xff]   ;;  %v690_v56 = vld [vmem:[%s949_s1 + $0xd0] ss:$8 sps:$4 sm:$0xff]  }
  0x14   :  { %486 = vmatpush1.bf16.msra.mxu0 %v637_v19  ;;  %444 = vmatprep.subr.bf16.mxu1 %v638_v20  ;;  %v691_v57 = vld [vmem:[%s949_s1 + $0x1d0] ss:$8 sps:$4 sm:$0xff]   ;;  %v692_v58 = vld [vmem:[%s949_s1 + $0xe4] ss:$8 sps:$4 sm:$0xff]   ;;  %v696_v60 = vld [vmem:[%s949_s1 + $0xe0] ss:$8 sps:$4 sm:$0xff]  }
  0x15   :  { %487 = vmatprep.subr.bf16.mxu0 %v640_v21  ;;  %v694_v59 = vld [vmem:[%s949_s1 + $0x1e4] ss:$8 sps:$4 sm:$0xff]   ;;  %v697_v61 = vld [vmem:[%s949_s1 + $0x1e0] ss:$8 sps:$4 sm:$0xff]   ;;  %v698_v62 = vld [vmem:[%s949_s1 + $0xf4] ss:$8 sps:$4 sm:$0xff]  }
  0x16   :  { %v700_v63 = vld [vmem:[%s949_s1 + $0x1f4] ss:$8 sps:$4 sm:$0xff]   ;;  %v702_v0 = vld [vmem:[%s949_s1 + $0xf0] ss:$8 sps:$4 sm:$0xff]   ;;  %v85_v5 = vshrl.u32 %v84_v4, 7 }
  0x17   :  { %445 = vmatpush1.bf16.msra.mxu1 %v642_v22  ;;  %v703_v1 = vld [vmem:[%s949_s1 + $0x1f0] ss:$8 sps:$4 sm:$0xff]   ;;  %v82_v7 = vld [vmem:[%s951_s2] sm:$0x3] }
  0x18   :  { %488 = vmatpush1.bf16.msra.mxu0 %v643_v23  ;;  %446 = vmatprep.subr.bf16.mxu1 %v644_v24  ;;  %v704_v2 = vld [vmem:[%s950_s0] ss:$16 sps:$4 sm:$0xff]   ;;  %v707_v3 = vld [vmem:[%s950_s0 + $0x8] ss:$16 sps:$4 sm:$0xff]   ;;  %v86_v6 = vsub.s32 0, %v85_v5  ;;  %v90_v8 = vsub.s32 1, %v85_v5 }
  0x19   :  { %489 = vmatprep.subr.bf16.mxu0 %v646_v25 }
  0x1a   :  { %v87_v9 = vrot.slane %v82_v7, %v86_v6  ;;  %v91_v10 = vrot.slane %v82_v7, %v90_v8 }
  0x1b   :  { %447 = vmatpush1.bf16.msra.mxu1 %v648_v26 }
  0x1c   :  { %490 = vmatpush1.bf16.msra.mxu0 %v649_v27  ;;  %448 = vmatprep.subr.bf16.mxu1 %v650_v28 }
  0x1d   :  { %491 = vmatprep.subr.bf16.mxu0 %v652_v29 }
  0x1f   :  { %449 = vmatpush1.bf16.msra.mxu1 %v654_v30 }
  0x20   :  { %492 = vmatpush1.bf16.msra.mxu0 %v655_v31  ;;  %450 = vmatprep.subr.bf16.mxu1 %v656_v32 }
  0x21   :  { %493 = vmatprep.subr.bf16.mxu0 %v658_v33 }
  0x23   :  { %451 = vmatpush1.bf16.msra.mxu1 %v660_v34 }
  0x24   :  { %494 = vmatpush1.bf16.msra.mxu0 %v661_v35  ;;  %452 = vmatprep.subr.bf16.mxu1 %v662_v36 }
  0x25   :  { %495 = vmatprep.subr.bf16.mxu0 %v664_v37 }
  0x27   :  { %453 = vmatpush1.bf16.msra.mxu1 %v666_v38 }
  0x28   :  { %496 = vmatpush1.bf16.msra.mxu0 %v667_v39  ;;  %454 = vmatprep.subr.bf16.mxu1 %v668_v40 }
  0x29   :  { %497 = vmatprep.subr.bf16.mxu0 %v670_v41 }
  0x2b   :  { %455 = vmatpush1.bf16.msra.mxu1 %v672_v42 }
  0x2c   :  { %498 = vmatpush1.bf16.msra.mxu0 %v673_v43  ;;  %456 = vmatprep.subr.bf16.mxu1 %v674_v44 }
  0x2d   :  { %499 = vmatprep.subr.bf16.mxu0 %v676_v45 }
  0x2f   :  { %457 = vmatpush1.bf16.msra.mxu1 %v678_v46 }
  0x30   :  { %500 = vmatpush1.bf16.msra.mxu0 %v679_v48  ;;  %458 = vmatprep.subr.bf16.mxu1 %v680_v49 }
  0x31   :  { %501 = vmatprep.subr.bf16.mxu0 %v682_v50 }
  0x33   :  { %459 = vmatpush1.bf16.msra.mxu1 %v684_v52 }
  0x34   :  { %502 = vmatpush1.bf16.msra.mxu0 %v685_v53  ;;  %460 = vmatprep.subr.bf16.mxu1 %v686_v54 }
  0x35   :  { %503 = vmatprep.subr.bf16.mxu0 %v688_v55 }
  0x37   :  { %461 = vmatpush1.bf16.msra.mxu1 %v690_v56 }
  0x38   :  { %504 = vmatpush1.bf16.msra.mxu0 %v691_v57  ;;  %462 = vmatprep.subr.bf16.mxu1 %v692_v58 }
  0x39   :  { %505 = vmatprep.subr.bf16.mxu0 %v694_v59 }
  0x3b   :  { %463 = vmatpush1.bf16.msra.mxu1 %v696_v60 }
  0x3c   :  { %506 = vmatpush1.bf16.msra.mxu0 %v697_v61  ;;  %464 = vmatprep.subr.bf16.mxu1 %v698_v62 }
  0x3d   :  { %507 = vmatprep.subr.bf16.mxu0 %v700_v63 }
  0x3f   :  { %465 = vmatpush1.bf16.msra.mxu1 %v702_v0 }
  0x40   :  { %508 = vmatpush1.bf16.msra.mxu0 %v703_v1 }
  0x42   :  { %467 = vmatmul.mubr.bf16.vlgmr.msra.gmra.mrb[0].mxu1 %v704_v2 }
  0x43   :  { %510 = vmatmul.mubr.bf16.vlgmr.msra.gmra.mrb[0].mxu0 %v707_v3 }
 0x115   :  { %v468_v11 = vpop.f32.mrb[0].mxu1 }
 0x116   :  { %v511_v12 = vpop.f32.mrb[0].mxu0  ;;  %v469_v13 = vadd.f32 %v468_v11, %v87_v9  ;;  %v470_v14 = vpop.f32.mrb[1].mxu1 }
 0x117   :  { %v513_v15 = vpop.f32.mrb[1].mxu0  ;;  %v471_v16 = vadd.f32 %v470_v14, %v91_v10  ;;  %v472_v17 = vpop.f32.mrb[2].mxu1 }
 0x118   :  { %v515_v18 = vpop.f32.mrb[2].mxu0  ;;  %v512_v19 = vadd.f32 %v511_v12, %v469_v13  ;;  %v473_v20 = vadd.f32 %v472_v17, %v87_v9  ;;  %v474_v21 = vpop.f32.mrb[3].mxu1 }
 0x119   :  { %v517_v22 = vpop.f32.mrb[3].mxu0  ;;  %v514_v23 = vadd.f32 %v513_v15, %v471_v16  ;;  %v475_v24 = vadd.f32 %v474_v21, %v91_v10 }
 0x11a   :  { %v520_v25 = vmax.f32 %v512_v19, 0.0  ;;  %v516_v26 = vadd.f32 %v515_v18, %v473_v20 }
 0x11b   :  { %v521_v27 = vmax.f32 %v514_v23, 0.0  ;;  %v518_v28 = vadd.f32 %v517_v22, %v475_v24 }
 0x11c   :  { %524 = vst [vmem:[%s952_s3] sm:$0xff] %v520_v25  ;;  %v522_v29 = vmax.f32 %v516_v26, 0.0 }
 0x11d   :  { %525 = vst [vmem:[%s952_s3 + $0x8] sm:$0xff] %v521_v27  ;;  %v523_v30 = vmax.f32 %v518_v28, 0.0 }
 0x11e   :  { %526 = vst [vmem:[%s952_s3 + $0x10] sm:$0xff] %v522_v29 }
 0x11f   :  { %527 = vst [vmem:[%s952_s3 + $0x18] sm:$0xff] %v523_v30 }

// kernel: custom_cnn1_forward.9
= control target key start
LH: loop header
LB: loop body
LE: loop exit
PB: predicated region body
PF: predicated region fallthrough
CT: control target
= control target key end

     0   :  { %s352_s1 = inlined_call_operand.vmem [shape: bf16[256,128], index: 1, kind: input, shape index: {}]   ;;  %s353_s0 = inlined_call_operand.vmem [shape: bf16[16,256], index: 0, kind: input, shape index: {}]   ;;  %s354_s2 = inlined_call_operand.vmem [shape: f32[1,128], index: 2, kind: input, shape index: {}]   ;;  %s355_s3 = inlined_call_operand.vmem [shape: f32[16,128], index: 3, kind: output, shape index: {}]  }
   0x1   :  { %v250_v0 = vld [vmem:[%s352_s1 + $0x40] sm:$0xff]   ;;  %v252_v2 = vld [vmem:[%s352_s1 + $0x48] sm:$0xff]   ;;  %v254_v4 = vld [vmem:[%s352_s1 + $0x50] sm:$0xff]  }
   0x2   :  { %v251_v1 = vld [vmem:[%s352_s1] sm:$0xff]   ;;  %228 = vmatprep.subr.bf16.mxu0 %v250_v0  ;;  %v253_v3 = vld [vmem:[%s352_s1 + $0x8] sm:$0xff]   ;;  %v255_v5 = vld [vmem:[%s352_s1 + $0x10] sm:$0xff]  }
   0x3   :  { %229 = vmatpush3.bf16.msra.mxu0 %v251_v1  ;;  %v256_v6 = vld [vmem:[%s352_s1 + $0x58] sm:$0xff]   ;;  %v258_v8 = vld [vmem:[%s352_s1 + $0x60] sm:$0xff]   ;;  %v260_v10 = vld [vmem:[%s352_s1 + $0x68] sm:$0xff]  }
   0x4   :  { %230 = vmatprep.subr.bf16.mxu0 %v252_v2  ;;  %v257_v7 = vld [vmem:[%s352_s1 + $0x18] sm:$0xff]   ;;  %v259_v9 = vld [vmem:[%s352_s1 + $0x20] sm:$0xff]   ;;  %v261_v12 = vld [vmem:[%s352_s1 + $0x28] sm:$0xff]  }
   0x5   :  { %v268_v11 = vld [vmem:[%s353_s0 + $0x4] ss:$8 sps:$4 sm:$0xff]   ;;  %v262_v13 = vld [vmem:[%s352_s1 + $0x70] sm:$0xff]   ;;  %v264_v15 = vld [vmem:[%s352_s1 + $0x78] sm:$0xff]  }
   0x6   :  { %194 = vmatprep.mubr.bf16.mxu0 %v268_v11  ;;  %v263_v14 = vld [vmem:[%s352_s1 + $0x30] sm:$0xff]   ;;  %v265_v16 = vld [vmem:[%s352_s1 + $0x38] sm:$0xff]   ;;  %v266_v17 = vld [vmem:[%s353_s0] ss:$8 sps:$4 sm:$0xff]  }
   0x7   :  { %231 = vmatpush3.bf16.msra.mxu0 %v253_v3  ;;  %v209_v19 = vld [vmem:[%s354_s2] ss:$0 sm:$0xff] }
   0x8   :  { %232 = vmatprep.subr.bf16.mxu0 %v254_v4 }
   0xb   :  { %233 = vmatpush3.bf16.msra.mxu0 %v255_v5 }
   0xc   :  { %234 = vmatprep.subr.bf16.mxu0 %v256_v6 }
   0xf   :  { %235 = vmatpush3.bf16.msra.mxu0 %v257_v7 }
  0x10   :  { %236 = vmatprep.subr.bf16.mxu0 %v258_v8 }
  0x13   :  { %237 = vmatpush3.bf16.msra.mxu0 %v259_v9 }
  0x14   :  { %238 = vmatprep.subr.bf16.mxu0 %v260_v10 }
  0x17   :  { %239 = vmatpush3.bf16.msra.mxu0 %v261_v12 }
  0x18   :  { %240 = vmatprep.subr.bf16.mxu0 %v262_v13 }
  0x1b   :  { %241 = vmatpush3.bf16.msra.mxu0 %v263_v14 }
  0x1c   :  { %242 = vmatprep.subr.bf16.mxu0 %v264_v15 }
  0x1f   :  { %243 = vmatpush3.bf16.msra.mxu0 %v265_v16 }
  0x22   :  { %195 = vmatmul.mubr.bf16.vlgmr.msra.gmra.mrb[0].mxu0 %v266_v17 }
  0xf5   :  { %v244_v18 = vpop.f32.mrb[0].mxu0 }
  0xf6   :  { %v245_v20 = vpop.f32.mrb[1].mxu0 }
  0xf7   :  { %v246_v21 = vadd.f32 %v245_v20, %v244_v18  ;;  %v247_v22 = vpop.f32.mrb[2].mxu0 }
  0xf8   :  { %v248_v23 = vpop.f32.mrb[3].mxu0 }
  0xf9   :  { %v197_v24 = vadd.f32 %v246_v21, %v209_v19  ;;  %v249_v25 = vadd.f32 %v248_v23, %v247_v22 }
  0xfb   :  { %203 = vst [vmem:[%s355_s3] sm:$0xff] %v197_v24  ;;  %v200_v26 = vadd.f32 %v249_v25, %v209_v19 }
  0xfd   :  { %204 = vst [vmem:[%s355_s3 + $0x8] sm:$0xff] %v200_v26 }

</bundles_post_ra>
